<compile_context>
chip_gen: v6e
topology: v6e:2x2x1
jax: 0.10.0
libtpu: 0.0.40
codegen_flags: <defaults>
</compile_context>

<pallas_src>
import math

import jax
import jax.numpy as jnp
from jax import lax
from jax.experimental import pallas as pl
from jax.experimental.pallas import tpu as pltpu

LOG_STD_MAX = 2.0
LOG_STD_MIN = -20.0
_LOG_2PI = math.log(2.0 * math.pi)
_LOG_2 = math.log(2.0)


# ---------------------------------------------------------------------------
# shared math helpers
# ---------------------------------------------------------------------------
def _softplus(x):
    # numerically stable softplus (used both in-kernel and in the reference)
    return jnp.maximum(x, 0.0) + jnp.log1p(jnp.exp(-jnp.abs(x)))


def _sigmoid_exact(x):
    return 1.0 / (1.0 + jnp.exp(-x))


# ---------------------------------------------------------------------------
# Pallas kernel
# ---------------------------------------------------------------------------
def _make_actor_kernel(act_limit, T, B, H, A):
    H3 = 3 * H

    def sigmoid(x):
        # exp -> EUP, approx reciprocal -> EUP; keeps the VALU/MXU slots free
        # on the recurrent critical path.
        return pl.reciprocal(1.0 + jnp.exp(-x), approx=True)

    def gru_gates(gx, gh, bhn, h_prev):
        # gx already contains [b_ir+b_hr, b_iz+b_hz, b_in]; bhn added under r.
        r = sigmoid(gx[:, 0:H] + gh[:, 0:H])
        z = sigmoid(gx[:, H:2 * H] + gh[:, H:2 * H])
        n = jnp.tanh(gx[:, 2 * H:H3] + r * (gh[:, 2 * H:H3] + bhn))
        return (1.0 - z) * n + z * h_prev

    def kernel(x_ref, eps_ref,
               wx0_ref, wh0_ref, b0_ref,
               wx1_ref, wh1_ref, b1_ref,
               wm1_ref, bm1_ref, wm2_ref, bm2_ref,
               whd_ref, bhd_ref,
               pi_ref, logp_ref,
               xproj_ref):
        # ---- layer-0 input projection, hoisted out of the recurrence -------
        # One (T*B, D) @ (D, 3H) matmul instead of T x 3 tiny matmuls.
        xp = jnp.dot(x_ref[...], wx0_ref[...],
                     preferred_element_type=jnp.float32) + b0_ref[:, 0:H3]
        for t in range(T):                       # static slices / static stores
            xproj_ref[t] = xp[t * B:(t + 1) * B, :]

        # ---- recurrence: 3 fused matmuls per timestep -----------------------
        def step(t, carry):
            h0, h1 = carry
            gx0 = xproj_ref[t]                                        # (B, 3H)
            gh0 = jnp.dot(h0, wh0_ref[...],
                          preferred_element_type=jnp.float32)
            h0n = gru_gates(gx0, gh0, b0_ref[:, H3:H3 + H], h0)

            gx1 = jnp.dot(h0n, wx1_ref[...],
                          preferred_element_type=jnp.float32) + b1_ref[:, 0:H3]
            gh1 = jnp.dot(h1, wh1_ref[...],
                          preferred_element_type=jnp.float32)
            h1n = gru_gates(gx1, gh1, b1_ref[:, H3:H3 + H], h1)
            return h0n, h1n

        h0 = jnp.zeros((B, H), jnp.float32)
        h1 = jnp.zeros((B, H), jnp.float32)
        # TODO(synk): stateful hidden carry (save_hidden / self.h) is host-side
        # state; zero init is used (matches the module's default code path).
        _, h1 = lax.fori_loop(0, T, step, (h0, h1), unroll=True)

        # ---- MLP + gaussian heads + squashed sampling / log-prob ------------
        net = jnp.maximum(
            jnp.dot(h1, wm1_ref[...], preferred_element_type=jnp.float32)
            + bm1_ref[...], 0.0)
        net = jnp.maximum(
            jnp.dot(net, wm2_ref[...], preferred_element_type=jnp.float32)
            + bm2_ref[...], 0.0)
        heads = jnp.dot(net, whd_ref[...],
                        preferred_element_type=jnp.float32) + bhd_ref[...]
        mu = heads[:, 0:A]
        log_std = jnp.clip(heads[:, A:2 * A], LOG_STD_MIN, LOG_STD_MAX)
        std = jnp.exp(log_std)
        inv_std = jnp.exp(-log_std)

        eps = eps_ref[...]
        a = mu + std * eps                                  # Normal rsample()

        # Normal log_prob summed over action dim
        logp = jnp.sum(-0.5 * jnp.square((a - mu) * inv_std) - log_std
                       - 0.5 * jnp.float32(_LOG_2PI), axis=-1, keepdims=True)
        # tanh-squash correction: 2*(log 2 - a - softplus(-2a))
        logp = logp - jnp.sum(
            2.0 * (jnp.float32(_LOG_2) - a - _softplus(-2.0 * a)),
            axis=-1, keepdims=True)

        pi_ref[...] = jnp.float32(act_limit) * jnp.tanh(a)
        logp_ref[...] = logp

    return kernel


# ---------------------------------------------------------------------------
# host-side parameter packing (gate fusion + bias pre-summing + head concat)
# ---------------------------------------------------------------------------
def pack_params(raw):
    (w0xr, w0xz, w0xn, w0hr, w0hz, w0hn,
     b0ir, b0iz, b0in, b0hr, b0hz, b0hn,
     w1xr, w1xz, w1xn, w1hr, w1hz, w1hn,
     b1ir, b1iz, b1in, b1hr, b1hz, b1hn,
     wm1, bm1, wm2, bm2, wmu, bmu, wls, bls) = raw

    wx0 = jnp.concatenate([w0xr, w0xz, w0xn], axis=1)             # (D, 3H)
    wh0 = jnp.concatenate([w0hr, w0hz, w0hn], axis=1)             # (H, 3H)
    b0 = jnp.concatenate([b0ir + b0hr, b0iz + b0hz, b0in, b0hn], axis=1)  # (1,4H)
    wx1 = jnp.concatenate([w1xr, w1xz, w1xn], axis=1)             # (H, 3H)
    wh1 = jnp.concatenate([w1hr, w1hz, w1hn], axis=1)             # (H, 3H)
    b1 = jnp.concatenate([b1ir + b1hr, b1iz + b1hz, b1in, b1hn], axis=1)  # (1,4H)
    whd = jnp.concatenate([wmu, wls], axis=1)                     # (M2, 2A)
    bhd = jnp.concatenate([bmu, bls], axis=1)                     # (1, 2A)
    return (wx0, wh0, b0, wx1, wh1, b1, wm1, bm1, wm2, bm2, whd, bhd)


# ---------------------------------------------------------------------------
# wrapper
# ---------------------------------------------------------------------------
def squashed_gaussian_rnn_actor(obs_seq, eps, raw_params, act_limit):
    """obs_seq: tuple of (B, T, d_i) f32 arrays. Returns (pi_action, logp_pi)."""
    x = jnp.concatenate([o.astype(jnp.float32) for o in obs_seq], axis=-1)  # (B,T,D)
    B, T, D = x.shape
    # time-major rows (t, b) so the hoisted layer-0 projection is one matmul
    x_flat = jnp.transpose(x, (1, 0, 2)).reshape(T * B, D)

    H = raw_params[3].shape[0]     # w0hr: (H, H)
    A = raw_params[-4].shape[1]    # wmu:  (M2, A)
    packed = pack_params(raw_params)

    vmem = pl.BlockSpec(memory_space=pltpu.MemorySpace.VMEM)
    # TODO(synk): for production T/B/D, stream the time axis with a gridded
    # BlockSpec (and split the batch across v7x's two TensorCores) instead of
    # holding the whole sequence resident in VMEM; trivial at these test sizes.
    pi, logp = pl.pallas_call(
        _make_actor_kernel(act_limit, T, B, H, A),
        out_shape=(jax.ShapeDtypeStruct((B, A), jnp.float32),
                   jax.ShapeDtypeStruct((B, 1), jnp.float32)),
        in_specs=[vmem] * (2 + len(packed)),
        out_specs=(vmem, vmem),
        scratch_shapes=[pltpu.VMEM((T, B, 3 * H), jnp.float32)],
    )(x_flat, eps.astype(jnp.float32), *packed)

    # PyTorch does pi_action.squeeze() (all singleton dims); logp_pi keeps (B,)
    return jnp.squeeze(pi), jnp.squeeze(logp, axis=-1)


# ---------------------------------------------------------------------------
# pure-JAX reference (unfused math, exact sigmoid) for validation
# ---------------------------------------------------------------------------
def _gru_cell_ref(x_t, h, wxr, wxz, wxn, whr, whz, whn,
                  bir, biz, bin_, bhr, bhz, bhn):
    r = _sigmoid_exact(x_t @ wxr + bir + h @ whr + bhr)
    z = _sigmoid_exact(x_t @ wxz + biz + h @ whz + bhz)
    n = jnp.tanh(x_t @ wxn + bin_ + r * (h @ whn + bhn))
    return (1.0 - z) * n + z * h


def reference_forward(obs_seq, eps, params, act_limit):
    (w0xr, w0xz, w0xn, w0hr, w0hz, w0hn,
     b0ir, b0iz, b0in, b0hr, b0hz, b0hn,
     w1xr, w1xz, w1xn, w1hr, w1hz, w1hn,
     b1ir, b1iz, b1in, b1hr, b1hz, b1hn,
     wm1, bm1, wm2, bm2, wmu, bmu, wls, bls) = params
    x = jnp.concatenate([o.astype(jnp.float32) for o in obs_seq], axis=-1)
    B, T, _ = x.shape
    H = w0hr.shape[0]
    h0 = jnp.zeros((B, H), jnp.float32)
    h1 = jnp.zeros((B, H), jnp.float32)
    for t in range(T):
        x_t = x[:, t, :]
        h0 = _gru_cell_ref(x_t, h0, w0xr, w0xz, w0xn, w0hr, w0hz, w0hn,
                           b0ir, b0iz, b0in, b0hr, b0hz, b0hn)
        h1 = _gru_cell_ref(h0, h1, w1xr, w1xz, w1xn, w1hr, w1hz, w1hn,
                           b1ir, b1iz, b1in, b1hr, b1hz, b1hn)
    net = jnp.maximum(h1 @ wm1 + bm1, 0.0)
    net = jnp.maximum(net @ wm2 + bm2, 0.0)
    mu = net @ wmu + bmu
    log_std = jnp.clip(net @ wls + bls, LOG_STD_MIN, LOG_STD_MAX)
    std = jnp.exp(log_std)
    a = mu + std * eps
    logp = jnp.sum(-0.5 * jnp.square((a - mu) / std) - log_std
                   - 0.5 * jnp.float32(_LOG_2PI), axis=-1, keepdims=True)
    logp = logp - jnp.sum(2.0 * (jnp.float32(_LOG_2) - a - _softplus(-2.0 * a)),
                          axis=-1, keepdims=True)
    pi = jnp.float32(act_limit) * jnp.tanh(a)
    return jnp.squeeze(pi), jnp.squeeze(logp, axis=-1)


# ---------------------------------------------------------------------------
# deterministic parameter construction (per-gate, pre-transposed (in, out))
# ---------------------------------------------------------------------------
def init_params(key, D, H, M1, M2, A):
    shapes = []
    for d_in in (D, H):                 # GRU layer 0 (input D), layer 1 (input H)
        shapes += [(d_in, H)] * 3       # Wxr, Wxz, Wxn
        shapes += [(H, H)] * 3          # Whr, Whz, Whn
        shapes += [(1, H)] * 6          # b_ir, b_iz, b_in, b_hr, b_hz, b_hn
    shapes += [(H, M1), (1, M1), (M1, M2), (1, M2)]      # MLP
    shapes += [(M2, A), (1, A), (M2, A), (1, A)]         # mu / log_std heads
    keys = jax.random.split(key, len(shapes))
    return [0.1 * jax.random.normal(k, s, dtype=jnp.float32)
            for k, s in zip(keys, shapes)]


if __name__ == "__main__":
    # small synthetic config: obs_space = two boxes of dim 8 -> dim_obs = 16
    B, T = 2, 8
    obs_dims = (8, 8)
    H = 32           # rnn_size (rnn_len fixed at 2 as in the module default)
    M1, M2 = 32, 32  # mlp_sizes
    A = 4            # dim_act
    ACT_LIMIT = 1.0

    root = jax.random.PRNGKey(0)
    k_obs0, k_obs1, k_eps, k_par = jax.random.split(root, 4)
    obs_seq = (jax.random.normal(k_obs0, (B, T, obs_dims[0]), dtype=jnp.float32),
               jax.random.normal(k_obs1, (B, T, obs_dims[1]), dtype=jnp.float32))
    eps = jax.random.normal(k_eps, (B, A), dtype=jnp.float32)  # Normal.rsample noise
    params = init_params(k_par, sum(obs_dims), H, M1, M2, A)

    pi, logp = squashed_gaussian_rnn_actor(obs_seq, eps, params, ACT_LIMIT)
    pi = jax.block_until_ready(pi)
    logp = jax.block_until_ready(logp)

    pi_ref, logp_ref = reference_forward(obs_seq, eps, params, ACT_LIMIT)
    assert pi.shape == (B, A) and logp.shape == (B,)
    assert jnp.allclose(pi, pi_ref, atol=1e-2, rtol=1e-2), (pi, pi_ref)
    assert jnp.allclose(logp, logp_ref, atol=1e-2, rtol=1e-2), (logp, logp_ref)

    print("KERNEL_OK")
</pallas_src>

<mosaic_0001>
module attributes {stable_mosaic.version = 11 : i64} {
  func.func @kernel(%arg0: memref<16x16xf32, #tpu.memory_space<vmem>>, %arg1: memref<2x4xf32, #tpu.memory_space<vmem>>, %arg2: memref<16x96xf32, #tpu.memory_space<vmem>>, %arg3: memref<32x96xf32, #tpu.memory_space<vmem>>, %arg4: memref<1x128xf32, #tpu.memory_space<vmem>>, %arg5: memref<32x96xf32, #tpu.memory_space<vmem>>, %arg6: memref<32x96xf32, #tpu.memory_space<vmem>>, %arg7: memref<1x128xf32, #tpu.memory_space<vmem>>, %arg8: memref<32x32xf32, #tpu.memory_space<vmem>>, %arg9: memref<1x32xf32, #tpu.memory_space<vmem>>, %arg10: memref<32x32xf32, #tpu.memory_space<vmem>>, %arg11: memref<1x32xf32, #tpu.memory_space<vmem>>, %arg12: memref<32x8xf32, #tpu.memory_space<vmem>>, %arg13: memref<1x8xf32, #tpu.memory_space<vmem>>, %arg14: memref<2x4xf32, #tpu.memory_space<vmem>>, %arg15: memref<2x1xf32, #tpu.memory_space<vmem>>, %arg16: memref<8x2x96xf32, #tpu.memory_space<vmem>>) attributes {dimension_semantics = [], scalar_prefetch = 0 : i64, scratch_operands = 1 : i64, tpu.core_type = #tpu.core_type<tc>} {
    %c0 = arith.constant 0 : index
    %c0_0 = arith.constant 0 : index
    %0 = vector.load %arg0[%c0, %c0_0] : memref<16x16xf32, #tpu.memory_space<vmem>>, vector<16x16xf32>
    %c0_1 = arith.constant 0 : index
    %c0_2 = arith.constant 0 : index
    %1 = vector.load %arg2[%c0_1, %c0_2] : memref<16x96xf32, #tpu.memory_space<vmem>>, vector<16x96xf32>
    %cst = arith.constant dense<0.000000e+00> : vector<16x96xf32>
    %2 = tpu.matmul %0, %1, %cst {dimension_numbers = #tpu.dot_dimension_numbers<[1], [0], [0], [1], [0, 0, 1, 1], [], []>} : vector<16x16xf32>, vector<16x96xf32>, vector<16x96xf32> -> vector<16x96xf32>
    %c0_3 = arith.constant 0 : index
    %c0_4 = arith.constant 0 : index
    %3 = vector.load %arg4[%c0_3, %c0_4] : memref<1x128xf32, #tpu.memory_space<vmem>>, vector<1x96xf32>
    %4 = vector.broadcast %3 : vector<1x96xf32> to vector<16x96xf32>
    %5 = arith.addf %2, %4 : vector<16x96xf32>
    %6 = vector.extract_strided_slice %5 {offsets = [0, 0], sizes = [2, 96], strides = [1, 1]} : vector<16x96xf32> to vector<2x96xf32>
    %c0_5 = arith.constant 0 : index
    %c0_6 = arith.constant 0 : index
    %c0_7 = arith.constant 0 : index
    %7 = vector.load %arg16[%c0_5, %c0_6, %c0_7] : memref<8x2x96xf32, #tpu.memory_space<vmem>>, vector<1x2x96xf32>
    %8 = vector.shape_cast %7 : vector<1x2x96xf32> to vector<2x96xf32>
    %9 = vector.shape_cast %6 : vector<2x96xf32> to vector<1x2x96xf32>
    tpu.vector_store %arg16[%c0_5, %c0_6, %c0_7], %9 {strides = array<i32>} : memref<8x2x96xf32, #tpu.memory_space<vmem>>, vector<1x2x96xf32>,
    %10 = vector.extract_strided_slice %5 {offsets = [2, 0], sizes = [2, 96], strides = [1, 1]} : vector<16x96xf32> to vector<2x96xf32>
    %c1 = arith.constant 1 : index
    %c0_8 = arith.constant 0 : index
    %c0_9 = arith.constant 0 : index
    %11 = vector.load %arg16[%c1, %c0_8, %c0_9] : memref<8x2x96xf32, #tpu.memory_space<vmem>>, vector<1x2x96xf32>
    %12 = vector.shape_cast %11 : vector<1x2x96xf32> to vector<2x96xf32>
    %13 = vector.shape_cast %10 : vector<2x96xf32> to vector<1x2x96xf32>
    tpu.vector_store %arg16[%c1, %c0_8, %c0_9], %13 {strides = array<i32>} : memref<8x2x96xf32, #tpu.memory_space<vmem>>, vector<1x2x96xf32>,
    %14 = vector.extract_strided_slice %5 {offsets = [4, 0], sizes = [2, 96], strides = [1, 1]} : vector<16x96xf32> to vector<2x96xf32>
    %c2 = arith.constant 2 : index
    %c0_10 = arith.constant 0 : index
    %c0_11 = arith.constant 0 : index
    %15 = vector.load %arg16[%c2, %c0_10, %c0_11] : memref<8x2x96xf32, #tpu.memory_space<vmem>>, vector<1x2x96xf32>
    %16 = vector.shape_cast %15 : vector<1x2x96xf32> to vector<2x96xf32>
    %17 = vector.shape_cast %14 : vector<2x96xf32> to vector<1x2x96xf32>
    tpu.vector_store %arg16[%c2, %c0_10, %c0_11], %17 {strides = array<i32>} : memref<8x2x96xf32, #tpu.memory_space<vmem>>, vector<1x2x96xf32>,
    %18 = vector.extract_strided_slice %5 {offsets = [6, 0], sizes = [2, 96], strides = [1, 1]} : vector<16x96xf32> to vector<2x96xf32>
    %c3 = arith.constant 3 : index
    %c0_12 = arith.constant 0 : index
    %c0_13 = arith.constant 0 : index
    %19 = vector.load %arg16[%c3, %c0_12, %c0_13] : memref<8x2x96xf32, #tpu.memory_space<vmem>>, vector<1x2x96xf32>
    %20 = vector.shape_cast %19 : vector<1x2x96xf32> to vector<2x96xf32>
    %21 = vector.shape_cast %18 : vector<2x96xf32> to vector<1x2x96xf32>
    tpu.vector_store %arg16[%c3, %c0_12, %c0_13], %21 {strides = array<i32>} : memref<8x2x96xf32, #tpu.memory_space<vmem>>, vector<1x2x96xf32>,
    %22 = vector.extract_strided_slice %5 {offsets = [8, 0], sizes = [2, 96], strides = [1, 1]} : vector<16x96xf32> to vector<2x96xf32>
    %c4 = arith.constant 4 : index
    %c0_14 = arith.constant 0 : index
    %c0_15 = arith.constant 0 : index
    %23 = vector.load %arg16[%c4, %c0_14, %c0_15] : memref<8x2x96xf32, #tpu.memory_space<vmem>>, vector<1x2x96xf32>
    %24 = vector.shape_cast %23 : vector<1x2x96xf32> to vector<2x96xf32>
    %25 = vector.shape_cast %22 : vector<2x96xf32> to vector<1x2x96xf32>
    tpu.vector_store %arg16[%c4, %c0_14, %c0_15], %25 {strides = array<i32>} : memref<8x2x96xf32, #tpu.memory_space<vmem>>, vector<1x2x96xf32>,
    %26 = vector.extract_strided_slice %5 {offsets = [10, 0], sizes = [2, 96], strides = [1, 1]} : vector<16x96xf32> to vector<2x96xf32>
    %c5 = arith.constant 5 : index
    %c0_16 = arith.constant 0 : index
    %c0_17 = arith.constant 0 : index
    %27 = vector.load %arg16[%c5, %c0_16, %c0_17] : memref<8x2x96xf32, #tpu.memory_space<vmem>>, vector<1x2x96xf32>
    %28 = vector.shape_cast %27 : vector<1x2x96xf32> to vector<2x96xf32>
    %29 = vector.shape_cast %26 : vector<2x96xf32> to vector<1x2x96xf32>
    tpu.vector_store %arg16[%c5, %c0_16, %c0_17], %29 {strides = array<i32>} : memref<8x2x96xf32, #tpu.memory_space<vmem>>, vector<1x2x96xf32>,
    %30 = vector.extract_strided_slice %5 {offsets = [12, 0], sizes = [2, 96], strides = [1, 1]} : vector<16x96xf32> to vector<2x96xf32>
    %c6 = arith.constant 6 : index
    %c0_18 = arith.constant 0 : index
    %c0_19 = arith.constant 0 : index
    %31 = vector.load %arg16[%c6, %c0_18, %c0_19] : memref<8x2x96xf32, #tpu.memory_space<vmem>>, vector<1x2x96xf32>
    %32 = vector.shape_cast %31 : vector<1x2x96xf32> to vector<2x96xf32>
    %33 = vector.shape_cast %30 : vector<2x96xf32> to vector<1x2x96xf32>
    tpu.vector_store %arg16[%c6, %c0_18, %c0_19], %33 {strides = array<i32>} : memref<8x2x96xf32, #tpu.memory_space<vmem>>, vector<1x2x96xf32>,
    %34 = vector.extract_strided_slice %5 {offsets = [14, 0], sizes = [2, 96], strides = [1, 1]} : vector<16x96xf32> to vector<2x96xf32>
    %c7 = arith.constant 7 : index
    %c0_20 = arith.constant 0 : index
    %c0_21 = arith.constant 0 : index
    %35 = vector.load %arg16[%c7, %c0_20, %c0_21] : memref<8x2x96xf32, #tpu.memory_space<vmem>>, vector<1x2x96xf32>
    %36 = vector.shape_cast %35 : vector<1x2x96xf32> to vector<2x96xf32>
    %37 = vector.shape_cast %34 : vector<2x96xf32> to vector<1x2x96xf32>
    tpu.vector_store %arg16[%c7, %c0_20, %c0_21], %37 {strides = array<i32>} : memref<8x2x96xf32, #tpu.memory_space<vmem>>, vector<1x2x96xf32>,
    %cst_22 = arith.constant 0.000000e+00 : f32
    %38 = vector.broadcast %cst_22 : f32 to vector<2x32xf32>
    %cst_23 = arith.constant 0.000000e+00 : f32
    %39 = vector.broadcast %cst_23 : f32 to vector<2x32xf32>
    %c0_i32 = arith.constant 0 : i32
    %40 = arith.index_cast %c0_i32 : i32 to index
    %c0_24 = arith.constant 0 : index
    %c0_25 = arith.constant 0 : index
    %41 = vector.load %arg16[%40, %c0_24, %c0_25] : memref<8x2x96xf32, #tpu.memory_space<vmem>>, vector<1x2x96xf32>
    %42 = vector.shape_cast %41 : vector<1x2x96xf32> to vector<2x96xf32>
    %c0_26 = arith.constant 0 : index
    %c0_27 = arith.constant 0 : index
    %43 = vector.load %arg3[%c0_26, %c0_27] : memref<32x96xf32, #tpu.memory_space<vmem>>, vector<32x96xf32>
    %cst_28 = arith.constant dense<0.000000e+00> : vector<2x96xf32>
    %44 = tpu.matmul %38, %43, %cst_28 {dimension_numbers = #tpu.dot_dimension_numbers<[1], [0], [0], [1], [0, 0, 1, 1], [], []>} : vector<2x32xf32>, vector<32x96xf32>, vector<2x96xf32> -> vector<2x96xf32>
    %c0_29 = arith.constant 0 : index
    %c96 = arith.constant 96 : index
    %45 = vector.load %arg4[%c0_29, %c96] : memref<1x128xf32, #tpu.memory_space<vmem>>, vector<1x32xf32>
    %46 = vector.extract_strided_slice %42 {offsets = [0, 0], sizes = [2, 32], strides = [1, 1]} : vector<2x96xf32> to vector<2x32xf32>
    %47 = vector.extract_strided_slice %44 {offsets = [0, 0], sizes = [2, 32], strides = [1, 1]} : vector<2x96xf32> to vector<2x32xf32>
    %48 = arith.addf %46, %47 : vector<2x32xf32>
    %cst_30 = arith.constant 0.000000e+00 : f32
    %49 = vector.broadcast %cst_30 : f32 to vector<2x32xf32>
    %50 = arith.subf %49, %48 : vector<2x32xf32>
    %51 = math.exp %50 : vector<2x32xf32>
    %cst_31 = arith.constant 1.000000e+00 : f32
    %52 = vector.broadcast %cst_31 : f32 to vector<2x32xf32>
    %53 = arith.addf %52, %51 : vector<2x32xf32>
    %54 = tpu.reciprocal %53 {approx = true} : vector<2x32xf32> -> vector<2x32xf32>
    %55 = vector.extract_strided_slice %42 {offsets = [0, 32], sizes = [2, 32], strides = [1, 1]} : vector<2x96xf32> to vector<2x32xf32>
    %56 = vector.extract_strided_slice %44 {offsets = [0, 32], sizes = [2, 32], strides = [1, 1]} : vector<2x96xf32> to vector<2x32xf32>
    %57 = arith.addf %55, %56 : vector<2x32xf32>
    %cst_32 = arith.constant 0.000000e+00 : f32
    %58 = vector.broadcast %cst_32 : f32 to vector<2x32xf32>
    %59 = arith.subf %58, %57 : vector<2x32xf32>
    %60 = math.exp %59 : vector<2x32xf32>
    %cst_33 = arith.constant 1.000000e+00 : f32
    %61 = vector.broadcast %cst_33 : f32 to vector<2x32xf32>
    %62 = arith.addf %61, %60 : vector<2x32xf32>
    %63 = tpu.reciprocal %62 {approx = true} : vector<2x32xf32> -> vector<2x32xf32>
    %64 = vector.extract_strided_slice %42 {offsets = [0, 64], sizes = [2, 32], strides = [1, 1]} : vector<2x96xf32> to vector<2x32xf32>
    %65 = vector.extract_strided_slice %44 {offsets = [0, 64], sizes = [2, 32], strides = [1, 1]} : vector<2x96xf32> to vector<2x32xf32>
    %66 = vector.broadcast %45 : vector<1x32xf32> to vector<2x32xf32>
    %67 = arith.addf %65, %66 : vector<2x32xf32>
    %68 = arith.mulf %54, %67 : vector<2x32xf32>
    %69 = arith.addf %64, %68 : vector<2x32xf32>
    %70 = math.tanh %69 : vector<2x32xf32>
    %cst_34 = arith.constant 1.000000e+00 : f32
    %71 = vector.broadcast %cst_34 : f32 to vector<2x32xf32>
    %72 = arith.subf %71, %63 : vector<2x32xf32>
    %73 = arith.mulf %72, %70 : vector<2x32xf32>
    %74 = arith.mulf %63, %38 : vector<2x32xf32>
    %75 = arith.addf %73, %74 : vector<2x32xf32>
    %c0_35 = arith.constant 0 : index
    %c0_36 = arith.constant 0 : index
    %76 = vector.load %arg5[%c0_35, %c0_36] : memref<32x96xf32, #tpu.memory_space<vmem>>, vector<32x96xf32>
    %cst_37 = arith.constant dense<0.000000e+00> : vector<2x96xf32>
    %77 = tpu.matmul %75, %76, %cst_37 {dimension_numbers = #tpu.dot_dimension_numbers<[1], [0], [0], [1], [0, 0, 1, 1], [], []>} : vector<2x32xf32>, vector<32x96xf32>, vector<2x96xf32> -> vector<2x96xf32>
    %c0_38 = arith.constant 0 : index
    %c0_39 = arith.constant 0 : index
    %78 = vector.load %arg7[%c0_38, %c0_39] : memref<1x128xf32, #tpu.memory_space<vmem>>, vector<1x96xf32>
    %79 = vector.broadcast %78 : vector<1x96xf32> to vector<2x96xf32>
    %80 = arith.addf %77, %79 : vector<2x96xf32>
    %c0_40 = arith.constant 0 : index
    %c0_41 = arith.constant 0 : index
    %81 = vector.load %arg6[%c0_40, %c0_41] : memref<32x96xf32, #tpu.memory_space<vmem>>, vector<32x96xf32>
    %cst_42 = arith.constant dense<0.000000e+00> : vector<2x96xf32>
    %82 = tpu.matmul %39, %81, %cst_42 {dimension_numbers = #tpu.dot_dimension_numbers<[1], [0], [0], [1], [0, 0, 1, 1], [], []>} : vector<2x32xf32>, vector<32x96xf32>, vector<2x96xf32> -> vector<2x96xf32>
    %c0_43 = arith.constant 0 : index
    %c96_44 = arith.constant 96 : index
    %83 = vector.load %arg7[%c0_43, %c96_44] : memref<1x128xf32, #tpu.memory_space<vmem>>, vector<1x32xf32>
    %84 = vector.extract_strided_slice %80 {offsets = [0, 0], sizes = [2, 32], strides = [1, 1]} : vector<2x96xf32> to vector<2x32xf32>
    %85 = vector.extract_strided_slice %82 {offsets = [0, 0], sizes = [2, 32], strides = [1, 1]} : vector<2x96xf32> to vector<2x32xf32>
    %86 = arith.addf %84, %85 : vector<2x32xf32>
    %cst_45 = arith.constant 0.000000e+00 : f32
    %87 = vector.broadcast %cst_45 : f32 to vector<2x32xf32>
    %88 = arith.subf %87, %86 : vector<2x32xf32>
    %89 = math.exp %88 : vector<2x32xf32>
    %cst_46 = arith.constant 1.000000e+00 : f32
    %90 = vector.broadcast %cst_46 : f32 to vector<2x32xf32>
    %91 = arith.addf %90, %89 : vector<2x32xf32>
    %92 = tpu.reciprocal %91 {approx = true} : vector<2x32xf32> -> vector<2x32xf32>
    %93 = vector.extract_strided_slice %80 {offsets = [0, 32], sizes = [2, 32], strides = [1, 1]} : vector<2x96xf32> to vector<2x32xf32>
    %94 = vector.extract_strided_slice %82 {offsets = [0, 32], sizes = [2, 32], strides = [1, 1]} : vector<2x96xf32> to vector<2x32xf32>
    %95 = arith.addf %93, %94 : vector<2x32xf32>
    %cst_47 = arith.constant 0.000000e+00 : f32
    %96 = vector.broadcast %cst_47 : f32 to vector<2x32xf32>
    %97 = arith.subf %96, %95 : vector<2x32xf32>
    %98 = math.exp %97 : vector<2x32xf32>
    %cst_48 = arith.constant 1.000000e+00 : f32
    %99 = vector.broadcast %cst_48 : f32 to vector<2x32xf32>
    %100 = arith.addf %99, %98 : vector<2x32xf32>
    %101 = tpu.reciprocal %100 {approx = true} : vector<2x32xf32> -> vector<2x32xf32>
    %102 = vector.extract_strided_slice %80 {offsets = [0, 64], sizes = [2, 32], strides = [1, 1]} : vector<2x96xf32> to vector<2x32xf32>
    %103 = vector.extract_strided_slice %82 {offsets = [0, 64], sizes = [2, 32], strides = [1, 1]} : vector<2x96xf32> to vector<2x32xf32>
    %104 = vector.broadcast %83 : vector<1x32xf32> to vector<2x32xf32>
    %105 = arith.addf %103, %104 : vector<2x32xf32>
    %106 = arith.mulf %92, %105 : vector<2x32xf32>
    %107 = arith.addf %102, %106 : vector<2x32xf32>
    %108 = math.tanh %107 : vector<2x32xf32>
    %cst_49 = arith.constant 1.000000e+00 : f32
    %109 = vector.broadcast %cst_49 : f32 to vector<2x32xf32>
    %110 = arith.subf %109, %101 : vector<2x32xf32>
    %111 = arith.mulf %110, %108 : vector<2x32xf32>
    %112 = arith.mulf %101, %39 : vector<2x32xf32>
    %113 = arith.addf %111, %112 : vector<2x32xf32>
    %c1_i32 = arith.constant 1 : i32
    %114 = arith.index_cast %c1_i32 : i32 to index
    %c0_50 = arith.constant 0 : index
    %c0_51 = arith.constant 0 : index
    %115 = vector.load %arg16[%114, %c0_50, %c0_51] : memref<8x2x96xf32, #tpu.memory_space<vmem>>, vector<1x2x96xf32>
    %116 = vector.shape_cast %115 : vector<1x2x96xf32> to vector<2x96xf32>
    %c0_52 = arith.constant 0 : index
    %c0_53 = arith.constant 0 : index
    %117 = vector.load %arg3[%c0_52, %c0_53] : memref<32x96xf32, #tpu.memory_space<vmem>>, vector<32x96xf32>
    %cst_54 = arith.constant dense<0.000000e+00> : vector<2x96xf32>
    %118 = tpu.matmul %75, %117, %cst_54 {dimension_numbers = #tpu.dot_dimension_numbers<[1], [0], [0], [1], [0, 0, 1, 1], [], []>} : vector<2x32xf32>, vector<32x96xf32>, vector<2x96xf32> -> vector<2x96xf32>
    %c0_55 = arith.constant 0 : index
    %c96_56 = arith.constant 96 : index
    %119 = vector.load %arg4[%c0_55, %c96_56] : memref<1x128xf32, #tpu.memory_space<vmem>>, vector<1x32xf32>
    %120 = vector.extract_strided_slice %116 {offsets = [0, 0], sizes = [2, 32], strides = [1, 1]} : vector<2x96xf32> to vector<2x32xf32>
    %121 = vector.extract_strided_slice %118 {offsets = [0, 0], sizes = [2, 32], strides = [1, 1]} : vector<2x96xf32> to vector<2x32xf32>
    %122 = arith.addf %120, %121 : vector<2x32xf32>
    %cst_57 = arith.constant 0.000000e+00 : f32
    %123 = vector.broadcast %cst_57 : f32 to vector<2x32xf32>
    %124 = arith.subf %123, %122 : vector<2x32xf32>
    %125 = math.exp %124 : vector<2x32xf32>
    %cst_58 = arith.constant 1.000000e+00 : f32
    %126 = vector.broadcast %cst_58 : f32 to vector<2x32xf32>
    %127 = arith.addf %126, %125 : vector<2x32xf32>
    %128 = tpu.reciprocal %127 {approx = true} : vector<2x32xf32> -> vector<2x32xf32>
    %129 = vector.extract_strided_slice %116 {offsets = [0, 32], sizes = [2, 32], strides = [1, 1]} : vector<2x96xf32> to vector<2x32xf32>
    %130 = vector.extract_strided_slice %118 {offsets = [0, 32], sizes = [2, 32], strides = [1, 1]} : vector<2x96xf32> to vector<2x32xf32>
    %131 = arith.addf %129, %130 : vector<2x32xf32>
    %cst_59 = arith.constant 0.000000e+00 : f32
    %132 = vector.broadcast %cst_59 : f32 to vector<2x32xf32>
    %133 = arith.subf %132, %131 : vector<2x32xf32>
    %134 = math.exp %133 : vector<2x32xf32>
    %cst_60 = arith.constant 1.000000e+00 : f32
    %135 = vector.broadcast %cst_60 : f32 to vector<2x32xf32>
    %136 = arith.addf %135, %134 : vector<2x32xf32>
    %137 = tpu.reciprocal %136 {approx = true} : vector<2x32xf32> -> vector<2x32xf32>
    %138 = vector.extract_strided_slice %116 {offsets = [0, 64], sizes = [2, 32], strides = [1, 1]} : vector<2x96xf32> to vector<2x32xf32>
    %139 = vector.extract_strided_slice %118 {offsets = [0, 64], sizes = [2, 32], strides = [1, 1]} : vector<2x96xf32> to vector<2x32xf32>
    %140 = vector.broadcast %119 : vector<1x32xf32> to vector<2x32xf32>
    %141 = arith.addf %139, %140 : vector<2x32xf32>
    %142 = arith.mulf %128, %141 : vector<2x32xf32>
    %143 = arith.addf %138, %142 : vector<2x32xf32>
    %144 = math.tanh %143 : vector<2x32xf32>
    %cst_61 = arith.constant 1.000000e+00 : f32
    %145 = vector.broadcast %cst_61 : f32 to vector<2x32xf32>
    %146 = arith.subf %145, %137 : vector<2x32xf32>
    %147 = arith.mulf %146, %144 : vector<2x32xf32>
    %148 = arith.mulf %137, %75 : vector<2x32xf32>
    %149 = arith.addf %147, %148 : vector<2x32xf32>
    %c0_62 = arith.constant 0 : index
    %c0_63 = arith.constant 0 : index
    %150 = vector.load %arg5[%c0_62, %c0_63] : memref<32x96xf32, #tpu.memory_space<vmem>>, vector<32x96xf32>
    %cst_64 = arith.constant dense<0.000000e+00> : vector<2x96xf32>
    %151 = tpu.matmul %149, %150, %cst_64 {dimension_numbers = #tpu.dot_dimension_numbers<[1], [0], [0], [1], [0, 0, 1, 1], [], []>} : vector<2x32xf32>, vector<32x96xf32>, vector<2x96xf32> -> vector<2x96xf32>
    %c0_65 = arith.constant 0 : index
    %c0_66 = arith.constant 0 : index
    %152 = vector.load %arg7[%c0_65, %c0_66] : memref<1x128xf32, #tpu.memory_space<vmem>>, vector<1x96xf32>
    %153 = vector.broadcast %152 : vector<1x96xf32> to vector<2x96xf32>
    %154 = arith.addf %151, %153 : vector<2x96xf32>
    %c0_67 = arith.constant 0 : index
    %c0_68 = arith.constant 0 : index
    %155 = vector.load %arg6[%c0_67, %c0_68] : memref<32x96xf32, #tpu.memory_space<vmem>>, vector<32x96xf32>
    %cst_69 = arith.constant dense<0.000000e+00> : vector<2x96xf32>
    %156 = tpu.matmul %113, %155, %cst_69 {dimension_numbers = #tpu.dot_dimension_numbers<[1], [0], [0], [1], [0, 0, 1, 1], [], []>} : vector<2x32xf32>, vector<32x96xf32>, vector<2x96xf32> -> vector<2x96xf32>
    %c0_70 = arith.constant 0 : index
    %c96_71 = arith.constant 96 : index
    %157 = vector.load %arg7[%c0_70, %c96_71] : memref<1x128xf32, #tpu.memory_space<vmem>>, vector<1x32xf32>
    %158 = vector.extract_strided_slice %154 {offsets = [0, 0], sizes = [2, 32], strides = [1, 1]} : vector<2x96xf32> to vector<2x32xf32>
    %159 = vector.extract_strided_slice %156 {offsets = [0, 0], sizes = [2, 32], strides = [1, 1]} : vector<2x96xf32> to vector<2x32xf32>
    %160 = arith.addf %158, %159 : vector<2x32xf32>
    %cst_72 = arith.constant 0.000000e+00 : f32
    %161 = vector.broadcast %cst_72 : f32 to vector<2x32xf32>
    %162 = arith.subf %161, %160 : vector<2x32xf32>
    %163 = math.exp %162 : vector<2x32xf32>
    %cst_73 = arith.constant 1.000000e+00 : f32
    %164 = vector.broadcast %cst_73 : f32 to vector<2x32xf32>
    %165 = arith.addf %164, %163 : vector<2x32xf32>
    %166 = tpu.reciprocal %165 {approx = true} : vector<2x32xf32> -> vector<2x32xf32>
    %167 = vector.extract_strided_slice %154 {offsets = [0, 32], sizes = [2, 32], strides = [1, 1]} : vector<2x96xf32> to vector<2x32xf32>
    %168 = vector.extract_strided_slice %156 {offsets = [0, 32], sizes = [2, 32], strides = [1, 1]} : vector<2x96xf32> to vector<2x32xf32>
    %169 = arith.addf %167, %168 : vector<2x32xf32>
    %cst_74 = arith.constant 0.000000e+00 : f32
    %170 = vector.broadcast %cst_74 : f32 to vector<2x32xf32>
    %171 = arith.subf %170, %169 : vector<2x32xf32>
    %172 = math.exp %171 : vector<2x32xf32>
    %cst_75 = arith.constant 1.000000e+00 : f32
    %173 = vector.broadcast %cst_75 : f32 to vector<2x32xf32>
    %174 = arith.addf %173, %172 : vector<2x32xf32>
    %175 = tpu.reciprocal %174 {approx = true} : vector<2x32xf32> -> vector<2x32xf32>
    %176 = vector.extract_strided_slice %154 {offsets = [0, 64], sizes = [2, 32], strides = [1, 1]} : vector<2x96xf32> to vector<2x32xf32>
    %177 = vector.extract_strided_slice %156 {offsets = [0, 64], sizes = [2, 32], strides = [1, 1]} : vector<2x96xf32> to vector<2x32xf32>
    %178 = vector.broadcast %157 : vector<1x32xf32> to vector<2x32xf32>
    %179 = arith.addf %177, %178 : vector<2x32xf32>
    %180 = arith.mulf %166, %179 : vector<2x32xf32>
    %181 = arith.addf %176, %180 : vector<2x32xf32>
    %182 = math.tanh %181 : vector<2x32xf32>
    %cst_76 = arith.constant 1.000000e+00 : f32
    %183 = vector.broadcast %cst_76 : f32 to vector<2x32xf32>
    %184 = arith.subf %183, %175 : vector<2x32xf32>
    %185 = arith.mulf %184, %182 : vector<2x32xf32>
    %186 = arith.mulf %175, %113 : vector<2x32xf32>
    %187 = arith.addf %185, %186 : vector<2x32xf32>
    %c2_i32 = arith.constant 2 : i32
    %188 = arith.index_cast %c2_i32 : i32 to index
    %c0_77 = arith.constant 0 : index
    %c0_78 = arith.constant 0 : index
    %189 = vector.load %arg16[%188, %c0_77, %c0_78] : memref<8x2x96xf32, #tpu.memory_space<vmem>>, vector<1x2x96xf32>
    %190 = vector.shape_cast %189 : vector<1x2x96xf32> to vector<2x96xf32>
    %c0_79 = arith.constant 0 : index
    %c0_80 = arith.constant 0 : index
    %191 = vector.load %arg3[%c0_79, %c0_80] : memref<32x96xf32, #tpu.memory_space<vmem>>, vector<32x96xf32>
    %cst_81 = arith.constant dense<0.000000e+00> : vector<2x96xf32>
    %192 = tpu.matmul %149, %191, %cst_81 {dimension_numbers = #tpu.dot_dimension_numbers<[1], [0], [0], [1], [0, 0, 1, 1], [], []>} : vector<2x32xf32>, vector<32x96xf32>, vector<2x96xf32> -> vector<2x96xf32>
    %c0_82 = arith.constant 0 : index
    %c96_83 = arith.constant 96 : index
    %193 = vector.load %arg4[%c0_82, %c96_83] : memref<1x128xf32, #tpu.memory_space<vmem>>, vector<1x32xf32>
    %194 = vector.extract_strided_slice %190 {offsets = [0, 0], sizes = [2, 32], strides = [1, 1]} : vector<2x96xf32> to vector<2x32xf32>
    %195 = vector.extract_strided_slice %192 {offsets = [0, 0], sizes = [2, 32], strides = [1, 1]} : vector<2x96xf32> to vector<2x32xf32>
    %196 = arith.addf %194, %195 : vector<2x32xf32>
    %cst_84 = arith.constant 0.000000e+00 : f32
    %197 = vector.broadcast %cst_84 : f32 to vector<2x32xf32>
    %198 = arith.subf %197, %196 : vector<2x32xf32>
    %199 = math.exp %198 : vector<2x32xf32>
    %cst_85 = arith.constant 1.000000e+00 : f32
    %200 = vector.broadcast %cst_85 : f32 to vector<2x32xf32>
    %201 = arith.addf %200, %199 : vector<2x32xf32>
    %202 = tpu.reciprocal %201 {approx = true} : vector<2x32xf32> -> vector<2x32xf32>
    %203 = vector.extract_strided_slice %190 {offsets = [0, 32], sizes = [2, 32], strides = [1, 1]} : vector<2x96xf32> to vector<2x32xf32>
    %204 = vector.extract_strided_slice %192 {offsets = [0, 32], sizes = [2, 32], strides = [1, 1]} : vector<2x96xf32> to vector<2x32xf32>
    %205 = arith.addf %203, %204 : vector<2x32xf32>
    %cst_86 = arith.constant 0.000000e+00 : f32
    %206 = vector.broadcast %cst_86 : f32 to vector<2x32xf32>
    %207 = arith.subf %206, %205 : vector<2x32xf32>
    %208 = math.exp %207 : vector<2x32xf32>
    %cst_87 = arith.constant 1.000000e+00 : f32
    %209 = vector.broadcast %cst_87 : f32 to vector<2x32xf32>
    %210 = arith.addf %209, %208 : vector<2x32xf32>
    %211 = tpu.reciprocal %210 {approx = true} : vector<2x32xf32> -> vector<2x32xf32>
    %212 = vector.extract_strided_slice %190 {offsets = [0, 64], sizes = [2, 32], strides = [1, 1]} : vector<2x96xf32> to vector<2x32xf32>
    %213 = vector.extract_strided_slice %192 {offsets = [0, 64], sizes = [2, 32], strides = [1, 1]} : vector<2x96xf32> to vector<2x32xf32>
    %214 = vector.broadcast %193 : vector<1x32xf32> to vector<2x32xf32>
    %215 = arith.addf %213, %214 : vector<2x32xf32>
    %216 = arith.mulf %202, %215 : vector<2x32xf32>
    %217 = arith.addf %212, %216 : vector<2x32xf32>
    %218 = math.tanh %217 : vector<2x32xf32>
    %cst_88 = arith.constant 1.000000e+00 : f32
    %219 = vector.broadcast %cst_88 : f32 to vector<2x32xf32>
    %220 = arith.subf %219, %211 : vector<2x32xf32>
    %221 = arith.mulf %220, %218 : vector<2x32xf32>
    %222 = arith.mulf %211, %149 : vector<2x32xf32>
    %223 = arith.addf %221, %222 : vector<2x32xf32>
    %c0_89 = arith.constant 0 : index
    %c0_90 = arith.constant 0 : index
    %224 = vector.load %arg5[%c0_89, %c0_90] : memref<32x96xf32, #tpu.memory_space<vmem>>, vector<32x96xf32>
    %cst_91 = arith.constant dense<0.000000e+00> : vector<2x96xf32>
    %225 = tpu.matmul %223, %224, %cst_91 {dimension_numbers = #tpu.dot_dimension_numbers<[1], [0], [0], [1], [0, 0, 1, 1], [], []>} : vector<2x32xf32>, vector<32x96xf32>, vector<2x96xf32> -> vector<2x96xf32>
    %c0_92 = arith.constant 0 : index
    %c0_93 = arith.constant 0 : index
    %226 = vector.load %arg7[%c0_92, %c0_93] : memref<1x128xf32, #tpu.memory_space<vmem>>, vector<1x96xf32>
    %227 = vector.broadcast %226 : vector<1x96xf32> to vector<2x96xf32>
    %228 = arith.addf %225, %227 : vector<2x96xf32>
    %c0_94 = arith.constant 0 : index
    %c0_95 = arith.constant 0 : index
    %229 = vector.load %arg6[%c0_94, %c0_95] : memref<32x96xf32, #tpu.memory_space<vmem>>, vector<32x96xf32>
    %cst_96 = arith.constant dense<0.000000e+00> : vector<2x96xf32>
    %230 = tpu.matmul %187, %229, %cst_96 {dimension_numbers = #tpu.dot_dimension_numbers<[1], [0], [0], [1], [0, 0, 1, 1], [], []>} : vector<2x32xf32>, vector<32x96xf32>, vector<2x96xf32> -> vector<2x96xf32>
    %c0_97 = arith.constant 0 : index
    %c96_98 = arith.constant 96 : index
    %231 = vector.load %arg7[%c0_97, %c96_98] : memref<1x128xf32, #tpu.memory_space<vmem>>, vector<1x32xf32>
    %232 = vector.extract_strided_slice %228 {offsets = [0, 0], sizes = [2, 32], strides = [1, 1]} : vector<2x96xf32> to vector<2x32xf32>
    %233 = vector.extract_strided_slice %230 {offsets = [0, 0], sizes = [2, 32], strides = [1, 1]} : vector<2x96xf32> to vector<2x32xf32>
    %234 = arith.addf %232, %233 : vector<2x32xf32>
    %cst_99 = arith.constant 0.000000e+00 : f32
    %235 = vector.broadcast %cst_99 : f32 to vector<2x32xf32>
    %236 = arith.subf %235, %234 : vector<2x32xf32>
    %237 = math.exp %236 : vector<2x32xf32>
    %cst_100 = arith.constant 1.000000e+00 : f32
    %238 = vector.broadcast %cst_100 : f32 to vector<2x32xf32>
    %239 = arith.addf %238, %237 : vector<2x32xf32>
    %240 = tpu.reciprocal %239 {approx = true} : vector<2x32xf32> -> vector<2x32xf32>
    %241 = vector.extract_strided_slice %228 {offsets = [0, 32], sizes = [2, 32], strides = [1, 1]} : vector<2x96xf32> to vector<2x32xf32>
    %242 = vector.extract_strided_slice %230 {offsets = [0, 32], sizes = [2, 32], strides = [1, 1]} : vector<2x96xf32> to vector<2x32xf32>
    %243 = arith.addf %241, %242 : vector<2x32xf32>
    %cst_101 = arith.constant 0.000000e+00 : f32
    %244 = vector.broadcast %cst_101 : f32 to vector<2x32xf32>
    %245 = arith.subf %244, %243 : vector<2x32xf32>
    %246 = math.exp %245 : vector<2x32xf32>
    %cst_102 = arith.constant 1.000000e+00 : f32
    %247 = vector.broadcast %cst_102 : f32 to vector<2x32xf32>
    %248 = arith.addf %247, %246 : vector<2x32xf32>
    %249 = tpu.reciprocal %248 {approx = true} : vector<2x32xf32> -> vector<2x32xf32>
    %250 = vector.extract_strided_slice %228 {offsets = [0, 64], sizes = [2, 32], strides = [1, 1]} : vector<2x96xf32> to vector<2x32xf32>
    %251 = vector.extract_strided_slice %230 {offsets = [0, 64], sizes = [2, 32], strides = [1, 1]} : vector<2x96xf32> to vector<2x32xf32>
    %252 = vector.broadcast %231 : vector<1x32xf32> to vector<2x32xf32>
    %253 = arith.addf %251, %252 : vector<2x32xf32>
    %254 = arith.mulf %240, %253 : vector<2x32xf32>
    %255 = arith.addf %250, %254 : vector<2x32xf32>
    %256 = math.tanh %255 : vector<2x32xf32>
    %cst_103 = arith.constant 1.000000e+00 : f32
    %257 = vector.broadcast %cst_103 : f32 to vector<2x32xf32>
    %258 = arith.subf %257, %249 : vector<2x32xf32>
    %259 = arith.mulf %258, %256 : vector<2x32xf32>
    %260 = arith.mulf %249, %187 : vector<2x32xf32>
    %261 = arith.addf %259, %260 : vector<2x32xf32>
    %c3_i32 = arith.constant 3 : i32
    %262 = arith.index_cast %c3_i32 : i32 to index
    %c0_104 = arith.constant 0 : index
    %c0_105 = arith.constant 0 : index
    %263 = vector.load %arg16[%262, %c0_104, %c0_105] : memref<8x2x96xf32, #tpu.memory_space<vmem>>, vector<1x2x96xf32>
    %264 = vector.shape_cast %263 : vector<1x2x96xf32> to vector<2x96xf32>
    %c0_106 = arith.constant 0 : index
    %c0_107 = arith.constant 0 : index
    %265 = vector.load %arg3[%c0_106, %c0_107] : memref<32x96xf32, #tpu.memory_space<vmem>>, vector<32x96xf32>
    %cst_108 = arith.constant dense<0.000000e+00> : vector<2x96xf32>
    %266 = tpu.matmul %223, %265, %cst_108 {dimension_numbers = #tpu.dot_dimension_numbers<[1], [0], [0], [1], [0, 0, 1, 1], [], []>} : vector<2x32xf32>, vector<32x96xf32>, vector<2x96xf32> -> vector<2x96xf32>
    %c0_109 = arith.constant 0 : index
    %c96_110 = arith.constant 96 : index
    %267 = vector.load %arg4[%c0_109, %c96_110] : memref<1x128xf32, #tpu.memory_space<vmem>>, vector<1x32xf32>
    %268 = vector.extract_strided_slice %264 {offsets = [0, 0], sizes = [2, 32], strides = [1, 1]} : vector<2x96xf32> to vector<2x32xf32>
    %269 = vector.extract_strided_slice %266 {offsets = [0, 0], sizes = [2, 32], strides = [1, 1]} : vector<2x96xf32> to vector<2x32xf32>
    %270 = arith.addf %268, %269 : vector<2x32xf32>
    %cst_111 = arith.constant 0.000000e+00 : f32
    %271 = vector.broadcast %cst_111 : f32 to vector<2x32xf32>
    %272 = arith.subf %271, %270 : vector<2x32xf32>
    %273 = math.exp %272 : vector<2x32xf32>
    %cst_112 = arith.constant 1.000000e+00 : f32
    %274 = vector.broadcast %cst_112 : f32 to vector<2x32xf32>
    %275 = arith.addf %274, %273 : vector<2x32xf32>
    %276 = tpu.reciprocal %275 {approx = true} : vector<2x32xf32> -> vector<2x32xf32>
    %277 = vector.extract_strided_slice %264 {offsets = [0, 32], sizes = [2, 32], strides = [1, 1]} : vector<2x96xf32> to vector<2x32xf32>
    %278 = vector.extract_strided_slice %266 {offsets = [0, 32], sizes = [2, 32], strides = [1, 1]} : vector<2x96xf32> to vector<2x32xf32>
    %279 = arith.addf %277, %278 : vector<2x32xf32>
    %cst_113 = arith.constant 0.000000e+00 : f32
    %280 = vector.broadcast %cst_113 : f32 to vector<2x32xf32>
    %281 = arith.subf %280, %279 : vector<2x32xf32>
    %282 = math.exp %281 : vector<2x32xf32>
    %cst_114 = arith.constant 1.000000e+00 : f32
    %283 = vector.broadcast %cst_114 : f32 to vector<2x32xf32>
    %284 = arith.addf %283, %282 : vector<2x32xf32>
    %285 = tpu.reciprocal %284 {approx = true} : vector<2x32xf32> -> vector<2x32xf32>
    %286 = vector.extract_strided_slice %264 {offsets = [0, 64], sizes = [2, 32], strides = [1, 1]} : vector<2x96xf32> to vector<2x32xf32>
    %287 = vector.extract_strided_slice %266 {offsets = [0, 64], sizes = [2, 32], strides = [1, 1]} : vector<2x96xf32> to vector<2x32xf32>
    %288 = vector.broadcast %267 : vector<1x32xf32> to vector<2x32xf32>
    %289 = arith.addf %287, %288 : vector<2x32xf32>
    %290 = arith.mulf %276, %289 : vector<2x32xf32>
    %291 = arith.addf %286, %290 : vector<2x32xf32>
    %292 = math.tanh %291 : vector<2x32xf32>
    %cst_115 = arith.constant 1.000000e+00 : f32
    %293 = vector.broadcast %cst_115 : f32 to vector<2x32xf32>
    %294 = arith.subf %293, %285 : vector<2x32xf32>
    %295 = arith.mulf %294, %292 : vector<2x32xf32>
    %296 = arith.mulf %285, %223 : vector<2x32xf32>
    %297 = arith.addf %295, %296 : vector<2x32xf32>
    %c0_116 = arith.constant 0 : index
    %c0_117 = arith.constant 0 : index
    %298 = vector.load %arg5[%c0_116, %c0_117] : memref<32x96xf32, #tpu.memory_space<vmem>>, vector<32x96xf32>
    %cst_118 = arith.constant dense<0.000000e+00> : vector<2x96xf32>
    %299 = tpu.matmul %297, %298, %cst_118 {dimension_numbers = #tpu.dot_dimension_numbers<[1], [0], [0], [1], [0, 0, 1, 1], [], []>} : vector<2x32xf32>, vector<32x96xf32>, vector<2x96xf32> -> vector<2x96xf32>
    %c0_119 = arith.constant 0 : index
    %c0_120 = arith.constant 0 : index
    %300 = vector.load %arg7[%c0_119, %c0_120] : memref<1x128xf32, #tpu.memory_space<vmem>>, vector<1x96xf32>
    %301 = vector.broadcast %300 : vector<1x96xf32> to vector<2x96xf32>
    %302 = arith.addf %299, %301 : vector<2x96xf32>
    %c0_121 = arith.constant 0 : index
    %c0_122 = arith.constant 0 : index
    %303 = vector.load %arg6[%c0_121, %c0_122] : memref<32x96xf32, #tpu.memory_space<vmem>>, vector<32x96xf32>
    %cst_123 = arith.constant dense<0.000000e+00> : vector<2x96xf32>
    %304 = tpu.matmul %261, %303, %cst_123 {dimension_numbers = #tpu.dot_dimension_numbers<[1], [0], [0], [1], [0, 0, 1, 1], [], []>} : vector<2x32xf32>, vector<32x96xf32>, vector<2x96xf32> -> vector<2x96xf32>
    %c0_124 = arith.constant 0 : index
    %c96_125 = arith.constant 96 : index
    %305 = vector.load %arg7[%c0_124, %c96_125] : memref<1x128xf32, #tpu.memory_space<vmem>>, vector<1x32xf32>
    %306 = vector.extract_strided_slice %302 {offsets = [0, 0], sizes = [2, 32], strides = [1, 1]} : vector<2x96xf32> to vector<2x32xf32>
    %307 = vector.extract_strided_slice %304 {offsets = [0, 0], sizes = [2, 32], strides = [1, 1]} : vector<2x96xf32> to vector<2x32xf32>
    %308 = arith.addf %306, %307 : vector<2x32xf32>
    %cst_126 = arith.constant 0.000000e+00 : f32
    %309 = vector.broadcast %cst_126 : f32 to vector<2x32xf32>
    %310 = arith.subf %309, %308 : vector<2x32xf32>
    %311 = math.exp %310 : vector<2x32xf32>
    %cst_127 = arith.constant 1.000000e+00 : f32
    %312 = vector.broadcast %cst_127 : f32 to vector<2x32xf32>
    %313 = arith.addf %312, %311 : vector<2x32xf32>
    %314 = tpu.reciprocal %313 {approx = true} : vector<2x32xf32> -> vector<2x32xf32>
    %315 = vector.extract_strided_slice %302 {offsets = [0, 32], sizes = [2, 32], strides = [1, 1]} : vector<2x96xf32> to vector<2x32xf32>
    %316 = vector.extract_strided_slice %304 {offsets = [0, 32], sizes = [2, 32], strides = [1, 1]} : vector<2x96xf32> to vector<2x32xf32>
    %317 = arith.addf %315, %316 : vector<2x32xf32>
    %cst_128 = arith.constant 0.000000e+00 : f32
    %318 = vector.broadcast %cst_128 : f32 to vector<2x32xf32>
    %319 = arith.subf %318, %317 : vector<2x32xf32>
    %320 = math.exp %319 : vector<2x32xf32>
    %cst_129 = arith.constant 1.000000e+00 : f32
    %321 = vector.broadcast %cst_129 : f32 to vector<2x32xf32>
    %322 = arith.addf %321, %320 : vector<2x32xf32>
    %323 = tpu.reciprocal %322 {approx = true} : vector<2x32xf32> -> vector<2x32xf32>
    %324 = vector.extract_strided_slice %302 {offsets = [0, 64], sizes = [2, 32], strides = [1, 1]} : vector<2x96xf32> to vector<2x32xf32>
    %325 = vector.extract_strided_slice %304 {offsets = [0, 64], sizes = [2, 32], strides = [1, 1]} : vector<2x96xf32> to vector<2x32xf32>
    %326 = vector.broadcast %305 : vector<1x32xf32> to vector<2x32xf32>
    %327 = arith.addf %325, %326 : vector<2x32xf32>
    %328 = arith.mulf %314, %327 : vector<2x32xf32>
    %329 = arith.addf %324, %328 : vector<2x32xf32>
    %330 = math.tanh %329 : vector<2x32xf32>
    %cst_130 = arith.constant 1.000000e+00 : f32
    %331 = vector.broadcast %cst_130 : f32 to vector<2x32xf32>
    %332 = arith.subf %331, %323 : vector<2x32xf32>
    %333 = arith.mulf %332, %330 : vector<2x32xf32>
    %334 = arith.mulf %323, %261 : vector<2x32xf32>
    %335 = arith.addf %333, %334 : vector<2x32xf32>
    %c4_i32 = arith.constant 4 : i32
    %336 = arith.index_cast %c4_i32 : i32 to index
    %c0_131 = arith.constant 0 : index
    %c0_132 = arith.constant 0 : index
    %337 = vector.load %arg16[%336, %c0_131, %c0_132] : memref<8x2x96xf32, #tpu.memory_space<vmem>>, vector<1x2x96xf32>
    %338 = vector.shape_cast %337 : vector<1x2x96xf32> to vector<2x96xf32>
    %c0_133 = arith.constant 0 : index
    %c0_134 = arith.constant 0 : index
    %339 = vector.load %arg3[%c0_133, %c0_134] : memref<32x96xf32, #tpu.memory_space<vmem>>, vector<32x96xf32>
    %cst_135 = arith.constant dense<0.000000e+00> : vector<2x96xf32>
    %340 = tpu.matmul %297, %339, %cst_135 {dimension_numbers = #tpu.dot_dimension_numbers<[1], [0], [0], [1], [0, 0, 1, 1], [], []>} : vector<2x32xf32>, vector<32x96xf32>, vector<2x96xf32> -> vector<2x96xf32>
    %c0_136 = arith.constant 0 : index
    %c96_137 = arith.constant 96 : index
    %341 = vector.load %arg4[%c0_136, %c96_137] : memref<1x128xf32, #tpu.memory_space<vmem>>, vector<1x32xf32>
    %342 = vector.extract_strided_slice %338 {offsets = [0, 0], sizes = [2, 32], strides = [1, 1]} : vector<2x96xf32> to vector<2x32xf32>
    %343 = vector.extract_strided_slice %340 {offsets = [0, 0], sizes = [2, 32], strides = [1, 1]} : vector<2x96xf32> to vector<2x32xf32>
    %344 = arith.addf %342, %343 : vector<2x32xf32>
    %cst_138 = arith.constant 0.000000e+00 : f32
    %345 = vector.broadcast %cst_138 : f32 to vector<2x32xf32>
    %346 = arith.subf %345, %344 : vector<2x32xf32>
    %347 = math.exp %346 : vector<2x32xf32>
    %cst_139 = arith.constant 1.000000e+00 : f32
    %348 = vector.broadcast %cst_139 : f32 to vector<2x32xf32>
    %349 = arith.addf %348, %347 : vector<2x32xf32>
    %350 = tpu.reciprocal %349 {approx = true} : vector<2x32xf32> -> vector<2x32xf32>
    %351 = vector.extract_strided_slice %338 {offsets = [0, 32], sizes = [2, 32], strides = [1, 1]} : vector<2x96xf32> to vector<2x32xf32>
    %352 = vector.extract_strided_slice %340 {offsets = [0, 32], sizes = [2, 32], strides = [1, 1]} : vector<2x96xf32> to vector<2x32xf32>
    %353 = arith.addf %351, %352 : vector<2x32xf32>
    %cst_140 = arith.constant 0.000000e+00 : f32
    %354 = vector.broadcast %cst_140 : f32 to vector<2x32xf32>
    %355 = arith.subf %354, %353 : vector<2x32xf32>
    %356 = math.exp %355 : vector<2x32xf32>
    %cst_141 = arith.constant 1.000000e+00 : f32
    %357 = vector.broadcast %cst_141 : f32 to vector<2x32xf32>
    %358 = arith.addf %357, %356 : vector<2x32xf32>
    %359 = tpu.reciprocal %358 {approx = true} : vector<2x32xf32> -> vector<2x32xf32>
    %360 = vector.extract_strided_slice %338 {offsets = [0, 64], sizes = [2, 32], strides = [1, 1]} : vector<2x96xf32> to vector<2x32xf32>
    %361 = vector.extract_strided_slice %340 {offsets = [0, 64], sizes = [2, 32], strides = [1, 1]} : vector<2x96xf32> to vector<2x32xf32>
    %362 = vector.broadcast %341 : vector<1x32xf32> to vector<2x32xf32>
    %363 = arith.addf %361, %362 : vector<2x32xf32>
    %364 = arith.mulf %350, %363 : vector<2x32xf32>
    %365 = arith.addf %360, %364 : vector<2x32xf32>
    %366 = math.tanh %365 : vector<2x32xf32>
    %cst_142 = arith.constant 1.000000e+00 : f32
    %367 = vector.broadcast %cst_142 : f32 to vector<2x32xf32>
    %368 = arith.subf %367, %359 : vector<2x32xf32>
    %369 = arith.mulf %368, %366 : vector<2x32xf32>
    %370 = arith.mulf %359, %297 : vector<2x32xf32>
    %371 = arith.addf %369, %370 : vector<2x32xf32>
    %c0_143 = arith.constant 0 : index
    %c0_144 = arith.constant 0 : index
    %372 = vector.load %arg5[%c0_143, %c0_144] : memref<32x96xf32, #tpu.memory_space<vmem>>, vector<32x96xf32>
    %cst_145 = arith.constant dense<0.000000e+00> : vector<2x96xf32>
    %373 = tpu.matmul %371, %372, %cst_145 {dimension_numbers = #tpu.dot_dimension_numbers<[1], [0], [0], [1], [0, 0, 1, 1], [], []>} : vector<2x32xf32>, vector<32x96xf32>, vector<2x96xf32> -> vector<2x96xf32>
    %c0_146 = arith.constant 0 : index
    %c0_147 = arith.constant 0 : index
    %374 = vector.load %arg7[%c0_146, %c0_147] : memref<1x128xf32, #tpu.memory_space<vmem>>, vector<1x96xf32>
    %375 = vector.broadcast %374 : vector<1x96xf32> to vector<2x96xf32>
    %376 = arith.addf %373, %375 : vector<2x96xf32>
    %c0_148 = arith.constant 0 : index
    %c0_149 = arith.constant 0 : index
    %377 = vector.load %arg6[%c0_148, %c0_149] : memref<32x96xf32, #tpu.memory_space<vmem>>, vector<32x96xf32>
    %cst_150 = arith.constant dense<0.000000e+00> : vector<2x96xf32>
    %378 = tpu.matmul %335, %377, %cst_150 {dimension_numbers = #tpu.dot_dimension_numbers<[1], [0], [0], [1], [0, 0, 1, 1], [], []>} : vector<2x32xf32>, vector<32x96xf32>, vector<2x96xf32> -> vector<2x96xf32>
    %c0_151 = arith.constant 0 : index
    %c96_152 = arith.constant 96 : index
    %379 = vector.load %arg7[%c0_151, %c96_152] : memref<1x128xf32, #tpu.memory_space<vmem>>, vector<1x32xf32>
    %380 = vector.extract_strided_slice %376 {offsets = [0, 0], sizes = [2, 32], strides = [1, 1]} : vector<2x96xf32> to vector<2x32xf32>
    %381 = vector.extract_strided_slice %378 {offsets = [0, 0], sizes = [2, 32], strides = [1, 1]} : vector<2x96xf32> to vector<2x32xf32>
    %382 = arith.addf %380, %381 : vector<2x32xf32>
    %cst_153 = arith.constant 0.000000e+00 : f32
    %383 = vector.broadcast %cst_153 : f32 to vector<2x32xf32>
    %384 = arith.subf %383, %382 : vector<2x32xf32>
    %385 = math.exp %384 : vector<2x32xf32>
    %cst_154 = arith.constant 1.000000e+00 : f32
    %386 = vector.broadcast %cst_154 : f32 to vector<2x32xf32>
    %387 = arith.addf %386, %385 : vector<2x32xf32>
    %388 = tpu.reciprocal %387 {approx = true} : vector<2x32xf32> -> vector<2x32xf32>
    %389 = vector.extract_strided_slice %376 {offsets = [0, 32], sizes = [2, 32], strides = [1, 1]} : vector<2x96xf32> to vector<2x32xf32>
    %390 = vector.extract_strided_slice %378 {offsets = [0, 32], sizes = [2, 32], strides = [1, 1]} : vector<2x96xf32> to vector<2x32xf32>
    %391 = arith.addf %389, %390 : vector<2x32xf32>
    %cst_155 = arith.constant 0.000000e+00 : f32
    %392 = vector.broadcast %cst_155 : f32 to vector<2x32xf32>
    %393 = arith.subf %392, %391 : vector<2x32xf32>
    %394 = math.exp %393 : vector<2x32xf32>
    %cst_156 = arith.constant 1.000000e+00 : f32
    %395 = vector.broadcast %cst_156 : f32 to vector<2x32xf32>
    %396 = arith.addf %395, %394 : vector<2x32xf32>
    %397 = tpu.reciprocal %396 {approx = true} : vector<2x32xf32> -> vector<2x32xf32>
    %398 = vector.extract_strided_slice %376 {offsets = [0, 64], sizes = [2, 32], strides = [1, 1]} : vector<2x96xf32> to vector<2x32xf32>
    %399 = vector.extract_strided_slice %378 {offsets = [0, 64], sizes = [2, 32], strides = [1, 1]} : vector<2x96xf32> to vector<2x32xf32>
    %400 = vector.broadcast %379 : vector<1x32xf32> to vector<2x32xf32>
    %401 = arith.addf %399, %400 : vector<2x32xf32>
    %402 = arith.mulf %388, %401 : vector<2x32xf32>
    %403 = arith.addf %398, %402 : vector<2x32xf32>
    %404 = math.tanh %403 : vector<2x32xf32>
    %cst_157 = arith.constant 1.000000e+00 : f32
    %405 = vector.broadcast %cst_157 : f32 to vector<2x32xf32>
    %406 = arith.subf %405, %397 : vector<2x32xf32>
    %407 = arith.mulf %406, %404 : vector<2x32xf32>
    %408 = arith.mulf %397, %335 : vector<2x32xf32>
    %409 = arith.addf %407, %408 : vector<2x32xf32>
    %c5_i32 = arith.constant 5 : i32
    %410 = arith.index_cast %c5_i32 : i32 to index
    %c0_158 = arith.constant 0 : index
    %c0_159 = arith.constant 0 : index
    %411 = vector.load %arg16[%410, %c0_158, %c0_159] : memref<8x2x96xf32, #tpu.memory_space<vmem>>, vector<1x2x96xf32>
    %412 = vector.shape_cast %411 : vector<1x2x96xf32> to vector<2x96xf32>
    %c0_160 = arith.constant 0 : index
    %c0_161 = arith.constant 0 : index
    %413 = vector.load %arg3[%c0_160, %c0_161] : memref<32x96xf32, #tpu.memory_space<vmem>>, vector<32x96xf32>
    %cst_162 = arith.constant dense<0.000000e+00> : vector<2x96xf32>
    %414 = tpu.matmul %371, %413, %cst_162 {dimension_numbers = #tpu.dot_dimension_numbers<[1], [0], [0], [1], [0, 0, 1, 1], [], []>} : vector<2x32xf32>, vector<32x96xf32>, vector<2x96xf32> -> vector<2x96xf32>
    %c0_163 = arith.constant 0 : index
    %c96_164 = arith.constant 96 : index
    %415 = vector.load %arg4[%c0_163, %c96_164] : memref<1x128xf32, #tpu.memory_space<vmem>>, vector<1x32xf32>
    %416 = vector.extract_strided_slice %412 {offsets = [0, 0], sizes = [2, 32], strides = [1, 1]} : vector<2x96xf32> to vector<2x32xf32>
    %417 = vector.extract_strided_slice %414 {offsets = [0, 0], sizes = [2, 32], strides = [1, 1]} : vector<2x96xf32> to vector<2x32xf32>
    %418 = arith.addf %416, %417 : vector<2x32xf32>
    %cst_165 = arith.constant 0.000000e+00 : f32
    %419 = vector.broadcast %cst_165 : f32 to vector<2x32xf32>
    %420 = arith.subf %419, %418 : vector<2x32xf32>
    %421 = math.exp %420 : vector<2x32xf32>
    %cst_166 = arith.constant 1.000000e+00 : f32
    %422 = vector.broadcast %cst_166 : f32 to vector<2x32xf32>
    %423 = arith.addf %422, %421 : vector<2x32xf32>
    %424 = tpu.reciprocal %423 {approx = true} : vector<2x32xf32> -> vector<2x32xf32>
    %425 = vector.extract_strided_slice %412 {offsets = [0, 32], sizes = [2, 32], strides = [1, 1]} : vector<2x96xf32> to vector<2x32xf32>
    %426 = vector.extract_strided_slice %414 {offsets = [0, 32], sizes = [2, 32], strides = [1, 1]} : vector<2x96xf32> to vector<2x32xf32>
    %427 = arith.addf %425, %426 : vector<2x32xf32>
    %cst_167 = arith.constant 0.000000e+00 : f32
    %428 = vector.broadcast %cst_167 : f32 to vector<2x32xf32>
    %429 = arith.subf %428, %427 : vector<2x32xf32>
    %430 = math.exp %429 : vector<2x32xf32>
    %cst_168 = arith.constant 1.000000e+00 : f32
    %431 = vector.broadcast %cst_168 : f32 to vector<2x32xf32>
    %432 = arith.addf %431, %430 : vector<2x32xf32>
    %433 = tpu.reciprocal %432 {approx = true} : vector<2x32xf32> -> vector<2x32xf32>
    %434 = vector.extract_strided_slice %412 {offsets = [0, 64], sizes = [2, 32], strides = [1, 1]} : vector<2x96xf32> to vector<2x32xf32>
    %435 = vector.extract_strided_slice %414 {offsets = [0, 64], sizes = [2, 32], strides = [1, 1]} : vector<2x96xf32> to vector<2x32xf32>
    %436 = vector.broadcast %415 : vector<1x32xf32> to vector<2x32xf32>
    %437 = arith.addf %435, %436 : vector<2x32xf32>
    %438 = arith.mulf %424, %437 : vector<2x32xf32>
    %439 = arith.addf %434, %438 : vector<2x32xf32>
    %440 = math.tanh %439 : vector<2x32xf32>
    %cst_169 = arith.constant 1.000000e+00 : f32
    %441 = vector.broadcast %cst_169 : f32 to vector<2x32xf32>
    %442 = arith.subf %441, %433 : vector<2x32xf32>
    %443 = arith.mulf %442, %440 : vector<2x32xf32>
    %444 = arith.mulf %433, %371 : vector<2x32xf32>
    %445 = arith.addf %443, %444 : vector<2x32xf32>
    %c0_170 = arith.constant 0 : index
    %c0_171 = arith.constant 0 : index
    %446 = vector.load %arg5[%c0_170, %c0_171] : memref<32x96xf32, #tpu.memory_space<vmem>>, vector<32x96xf32>
    %cst_172 = arith.constant dense<0.000000e+00> : vector<2x96xf32>
    %447 = tpu.matmul %445, %446, %cst_172 {dimension_numbers = #tpu.dot_dimension_numbers<[1], [0], [0], [1], [0, 0, 1, 1], [], []>} : vector<2x32xf32>, vector<32x96xf32>, vector<2x96xf32> -> vector<2x96xf32>
    %c0_173 = arith.constant 0 : index
    %c0_174 = arith.constant 0 : index
    %448 = vector.load %arg7[%c0_173, %c0_174] : memref<1x128xf32, #tpu.memory_space<vmem>>, vector<1x96xf32>
    %449 = vector.broadcast %448 : vector<1x96xf32> to vector<2x96xf32>
    %450 = arith.addf %447, %449 : vector<2x96xf32>
    %c0_175 = arith.constant 0 : index
    %c0_176 = arith.constant 0 : index
    %451 = vector.load %arg6[%c0_175, %c0_176] : memref<32x96xf32, #tpu.memory_space<vmem>>, vector<32x96xf32>
    %cst_177 = arith.constant dense<0.000000e+00> : vector<2x96xf32>
    %452 = tpu.matmul %409, %451, %cst_177 {dimension_numbers = #tpu.dot_dimension_numbers<[1], [0], [0], [1], [0, 0, 1, 1], [], []>} : vector<2x32xf32>, vector<32x96xf32>, vector<2x96xf32> -> vector<2x96xf32>
    %c0_178 = arith.constant 0 : index
    %c96_179 = arith.constant 96 : index
    %453 = vector.load %arg7[%c0_178, %c96_179] : memref<1x128xf32, #tpu.memory_space<vmem>>, vector<1x32xf32>
    %454 = vector.extract_strided_slice %450 {offsets = [0, 0], sizes = [2, 32], strides = [1, 1]} : vector<2x96xf32> to vector<2x32xf32>
    %455 = vector.extract_strided_slice %452 {offsets = [0, 0], sizes = [2, 32], strides = [1, 1]} : vector<2x96xf32> to vector<2x32xf32>
    %456 = arith.addf %454, %455 : vector<2x32xf32>
    %cst_180 = arith.constant 0.000000e+00 : f32
    %457 = vector.broadcast %cst_180 : f32 to vector<2x32xf32>
    %458 = arith.subf %457, %456 : vector<2x32xf32>
    %459 = math.exp %458 : vector<2x32xf32>
    %cst_181 = arith.constant 1.000000e+00 : f32
    %460 = vector.broadcast %cst_181 : f32 to vector<2x32xf32>
    %461 = arith.addf %460, %459 : vector<2x32xf32>
    %462 = tpu.reciprocal %461 {approx = true} : vector<2x32xf32> -> vector<2x32xf32>
    %463 = vector.extract_strided_slice %450 {offsets = [0, 32], sizes = [2, 32], strides = [1, 1]} : vector<2x96xf32> to vector<2x32xf32>
    %464 = vector.extract_strided_slice %452 {offsets = [0, 32], sizes = [2, 32], strides = [1, 1]} : vector<2x96xf32> to vector<2x32xf32>
    %465 = arith.addf %463, %464 : vector<2x32xf32>
    %cst_182 = arith.constant 0.000000e+00 : f32
    %466 = vector.broadcast %cst_182 : f32 to vector<2x32xf32>
    %467 = arith.subf %466, %465 : vector<2x32xf32>
    %468 = math.exp %467 : vector<2x32xf32>
    %cst_183 = arith.constant 1.000000e+00 : f32
    %469 = vector.broadcast %cst_183 : f32 to vector<2x32xf32>
    %470 = arith.addf %469, %468 : vector<2x32xf32>
    %471 = tpu.reciprocal %470 {approx = true} : vector<2x32xf32> -> vector<2x32xf32>
    %472 = vector.extract_strided_slice %450 {offsets = [0, 64], sizes = [2, 32], strides = [1, 1]} : vector<2x96xf32> to vector<2x32xf32>
    %473 = vector.extract_strided_slice %452 {offsets = [0, 64], sizes = [2, 32], strides = [1, 1]} : vector<2x96xf32> to vector<2x32xf32>
    %474 = vector.broadcast %453 : vector<1x32xf32> to vector<2x32xf32>
    %475 = arith.addf %473, %474 : vector<2x32xf32>
    %476 = arith.mulf %462, %475 : vector<2x32xf32>
    %477 = arith.addf %472, %476 : vector<2x32xf32>
    %478 = math.tanh %477 : vector<2x32xf32>
    %cst_184 = arith.constant 1.000000e+00 : f32
    %479 = vector.broadcast %cst_184 : f32 to vector<2x32xf32>
    %480 = arith.subf %479, %471 : vector<2x32xf32>
    %481 = arith.mulf %480, %478 : vector<2x32xf32>
    %482 = arith.mulf %471, %409 : vector<2x32xf32>
    %483 = arith.addf %481, %482 : vector<2x32xf32>
    %c6_i32 = arith.constant 6 : i32
    %484 = arith.index_cast %c6_i32 : i32 to index
    %c0_185 = arith.constant 0 : index
    %c0_186 = arith.constant 0 : index
    %485 = vector.load %arg16[%484, %c0_185, %c0_186] : memref<8x2x96xf32, #tpu.memory_space<vmem>>, vector<1x2x96xf32>
    %486 = vector.shape_cast %485 : vector<1x2x96xf32> to vector<2x96xf32>
    %c0_187 = arith.constant 0 : index
    %c0_188 = arith.constant 0 : index
    %487 = vector.load %arg3[%c0_187, %c0_188] : memref<32x96xf32, #tpu.memory_space<vmem>>, vector<32x96xf32>
    %cst_189 = arith.constant dense<0.000000e+00> : vector<2x96xf32>
    %488 = tpu.matmul %445, %487, %cst_189 {dimension_numbers = #tpu.dot_dimension_numbers<[1], [0], [0], [1], [0, 0, 1, 1], [], []>} : vector<2x32xf32>, vector<32x96xf32>, vector<2x96xf32> -> vector<2x96xf32>
    %c0_190 = arith.constant 0 : index
    %c96_191 = arith.constant 96 : index
    %489 = vector.load %arg4[%c0_190, %c96_191] : memref<1x128xf32, #tpu.memory_space<vmem>>, vector<1x32xf32>
    %490 = vector.extract_strided_slice %486 {offsets = [0, 0], sizes = [2, 32], strides = [1, 1]} : vector<2x96xf32> to vector<2x32xf32>
    %491 = vector.extract_strided_slice %488 {offsets = [0, 0], sizes = [2, 32], strides = [1, 1]} : vector<2x96xf32> to vector<2x32xf32>
    %492 = arith.addf %490, %491 : vector<2x32xf32>
    %cst_192 = arith.constant 0.000000e+00 : f32
    %493 = vector.broadcast %cst_192 : f32 to vector<2x32xf32>
    %494 = arith.subf %493, %492 : vector<2x32xf32>
    %495 = math.exp %494 : vector<2x32xf32>
    %cst_193 = arith.constant 1.000000e+00 : f32
    %496 = vector.broadcast %cst_193 : f32 to vector<2x32xf32>
    %497 = arith.addf %496, %495 : vector<2x32xf32>
    %498 = tpu.reciprocal %497 {approx = true} : vector<2x32xf32> -> vector<2x32xf32>
    %499 = vector.extract_strided_slice %486 {offsets = [0, 32], sizes = [2, 32], strides = [1, 1]} : vector<2x96xf32> to vector<2x32xf32>
    %500 = vector.extract_strided_slice %488 {offsets = [0, 32], sizes = [2, 32], strides = [1, 1]} : vector<2x96xf32> to vector<2x32xf32>
    %501 = arith.addf %499, %500 : vector<2x32xf32>
    %cst_194 = arith.constant 0.000000e+00 : f32
    %502 = vector.broadcast %cst_194 : f32 to vector<2x32xf32>
    %503 = arith.subf %502, %501 : vector<2x32xf32>
    %504 = math.exp %503 : vector<2x32xf32>
    %cst_195 = arith.constant 1.000000e+00 : f32
    %505 = vector.broadcast %cst_195 : f32 to vector<2x32xf32>
    %506 = arith.addf %505, %504 : vector<2x32xf32>
    %507 = tpu.reciprocal %506 {approx = true} : vector<2x32xf32> -> vector<2x32xf32>
    %508 = vector.extract_strided_slice %486 {offsets = [0, 64], sizes = [2, 32], strides = [1, 1]} : vector<2x96xf32> to vector<2x32xf32>
    %509 = vector.extract_strided_slice %488 {offsets = [0, 64], sizes = [2, 32], strides = [1, 1]} : vector<2x96xf32> to vector<2x32xf32>
    %510 = vector.broadcast %489 : vector<1x32xf32> to vector<2x32xf32>
    %511 = arith.addf %509, %510 : vector<2x32xf32>
    %512 = arith.mulf %498, %511 : vector<2x32xf32>
    %513 = arith.addf %508, %512 : vector<2x32xf32>
    %514 = math.tanh %513 : vector<2x32xf32>
    %cst_196 = arith.constant 1.000000e+00 : f32
    %515 = vector.broadcast %cst_196 : f32 to vector<2x32xf32>
    %516 = arith.subf %515, %507 : vector<2x32xf32>
    %517 = arith.mulf %516, %514 : vector<2x32xf32>
    %518 = arith.mulf %507, %445 : vector<2x32xf32>
    %519 = arith.addf %517, %518 : vector<2x32xf32>
    %c0_197 = arith.constant 0 : index
    %c0_198 = arith.constant 0 : index
    %520 = vector.load %arg5[%c0_197, %c0_198] : memref<32x96xf32, #tpu.memory_space<vmem>>, vector<32x96xf32>
    %cst_199 = arith.constant dense<0.000000e+00> : vector<2x96xf32>
    %521 = tpu.matmul %519, %520, %cst_199 {dimension_numbers = #tpu.dot_dimension_numbers<[1], [0], [0], [1], [0, 0, 1, 1], [], []>} : vector<2x32xf32>, vector<32x96xf32>, vector<2x96xf32> -> vector<2x96xf32>
    %c0_200 = arith.constant 0 : index
    %c0_201 = arith.constant 0 : index
    %522 = vector.load %arg7[%c0_200, %c0_201] : memref<1x128xf32, #tpu.memory_space<vmem>>, vector<1x96xf32>
    %523 = vector.broadcast %522 : vector<1x96xf32> to vector<2x96xf32>
    %524 = arith.addf %521, %523 : vector<2x96xf32>
    %c0_202 = arith.constant 0 : index
    %c0_203 = arith.constant 0 : index
    %525 = vector.load %arg6[%c0_202, %c0_203] : memref<32x96xf32, #tpu.memory_space<vmem>>, vector<32x96xf32>
    %cst_204 = arith.constant dense<0.000000e+00> : vector<2x96xf32>
    %526 = tpu.matmul %483, %525, %cst_204 {dimension_numbers = #tpu.dot_dimension_numbers<[1], [0], [0], [1], [0, 0, 1, 1], [], []>} : vector<2x32xf32>, vector<32x96xf32>, vector<2x96xf32> -> vector<2x96xf32>
    %c0_205 = arith.constant 0 : index
    %c96_206 = arith.constant 96 : index
    %527 = vector.load %arg7[%c0_205, %c96_206] : memref<1x128xf32, #tpu.memory_space<vmem>>, vector<1x32xf32>
    %528 = vector.extract_strided_slice %524 {offsets = [0, 0], sizes = [2, 32], strides = [1, 1]} : vector<2x96xf32> to vector<2x32xf32>
    %529 = vector.extract_strided_slice %526 {offsets = [0, 0], sizes = [2, 32], strides = [1, 1]} : vector<2x96xf32> to vector<2x32xf32>
    %530 = arith.addf %528, %529 : vector<2x32xf32>
    %cst_207 = arith.constant 0.000000e+00 : f32
    %531 = vector.broadcast %cst_207 : f32 to vector<2x32xf32>
    %532 = arith.subf %531, %530 : vector<2x32xf32>
    %533 = math.exp %532 : vector<2x32xf32>
    %cst_208 = arith.constant 1.000000e+00 : f32
    %534 = vector.broadcast %cst_208 : f32 to vector<2x32xf32>
    %535 = arith.addf %534, %533 : vector<2x32xf32>
    %536 = tpu.reciprocal %535 {approx = true} : vector<2x32xf32> -> vector<2x32xf32>
    %537 = vector.extract_strided_slice %524 {offsets = [0, 32], sizes = [2, 32], strides = [1, 1]} : vector<2x96xf32> to vector<2x32xf32>
    %538 = vector.extract_strided_slice %526 {offsets = [0, 32], sizes = [2, 32], strides = [1, 1]} : vector<2x96xf32> to vector<2x32xf32>
    %539 = arith.addf %537, %538 : vector<2x32xf32>
    %cst_209 = arith.constant 0.000000e+00 : f32
    %540 = vector.broadcast %cst_209 : f32 to vector<2x32xf32>
    %541 = arith.subf %540, %539 : vector<2x32xf32>
    %542 = math.exp %541 : vector<2x32xf32>
    %cst_210 = arith.constant 1.000000e+00 : f32
    %543 = vector.broadcast %cst_210 : f32 to vector<2x32xf32>
    %544 = arith.addf %543, %542 : vector<2x32xf32>
    %545 = tpu.reciprocal %544 {approx = true} : vector<2x32xf32> -> vector<2x32xf32>
    %546 = vector.extract_strided_slice %524 {offsets = [0, 64], sizes = [2, 32], strides = [1, 1]} : vector<2x96xf32> to vector<2x32xf32>
    %547 = vector.extract_strided_slice %526 {offsets = [0, 64], sizes = [2, 32], strides = [1, 1]} : vector<2x96xf32> to vector<2x32xf32>
    %548 = vector.broadcast %527 : vector<1x32xf32> to vector<2x32xf32>
    %549 = arith.addf %547, %548 : vector<2x32xf32>
    %550 = arith.mulf %536, %549 : vector<2x32xf32>
    %551 = arith.addf %546, %550 : vector<2x32xf32>
    %552 = math.tanh %551 : vector<2x32xf32>
    %cst_211 = arith.constant 1.000000e+00 : f32
    %553 = vector.broadcast %cst_211 : f32 to vector<2x32xf32>
    %554 = arith.subf %553, %545 : vector<2x32xf32>
    %555 = arith.mulf %554, %552 : vector<2x32xf32>
    %556 = arith.mulf %545, %483 : vector<2x32xf32>
    %557 = arith.addf %555, %556 : vector<2x32xf32>
    %c7_i32 = arith.constant 7 : i32
    %558 = arith.index_cast %c7_i32 : i32 to index
    %c0_212 = arith.constant 0 : index
    %c0_213 = arith.constant 0 : index
    %559 = vector.load %arg16[%558, %c0_212, %c0_213] : memref<8x2x96xf32, #tpu.memory_space<vmem>>, vector<1x2x96xf32>
    %560 = vector.shape_cast %559 : vector<1x2x96xf32> to vector<2x96xf32>
    %c0_214 = arith.constant 0 : index
    %c0_215 = arith.constant 0 : index
    %561 = vector.load %arg3[%c0_214, %c0_215] : memref<32x96xf32, #tpu.memory_space<vmem>>, vector<32x96xf32>
    %cst_216 = arith.constant dense<0.000000e+00> : vector<2x96xf32>
    %562 = tpu.matmul %519, %561, %cst_216 {dimension_numbers = #tpu.dot_dimension_numbers<[1], [0], [0], [1], [0, 0, 1, 1], [], []>} : vector<2x32xf32>, vector<32x96xf32>, vector<2x96xf32> -> vector<2x96xf32>
    %c0_217 = arith.constant 0 : index
    %c96_218 = arith.constant 96 : index
    %563 = vector.load %arg4[%c0_217, %c96_218] : memref<1x128xf32, #tpu.memory_space<vmem>>, vector<1x32xf32>
    %564 = vector.extract_strided_slice %560 {offsets = [0, 0], sizes = [2, 32], strides = [1, 1]} : vector<2x96xf32> to vector<2x32xf32>
    %565 = vector.extract_strided_slice %562 {offsets = [0, 0], sizes = [2, 32], strides = [1, 1]} : vector<2x96xf32> to vector<2x32xf32>
    %566 = arith.addf %564, %565 : vector<2x32xf32>
    %cst_219 = arith.constant 0.000000e+00 : f32
    %567 = vector.broadcast %cst_219 : f32 to vector<2x32xf32>
    %568 = arith.subf %567, %566 : vector<2x32xf32>
    %569 = math.exp %568 : vector<2x32xf32>
    %cst_220 = arith.constant 1.000000e+00 : f32
    %570 = vector.broadcast %cst_220 : f32 to vector<2x32xf32>
    %571 = arith.addf %570, %569 : vector<2x32xf32>
    %572 = tpu.reciprocal %571 {approx = true} : vector<2x32xf32> -> vector<2x32xf32>
    %573 = vector.extract_strided_slice %560 {offsets = [0, 32], sizes = [2, 32], strides = [1, 1]} : vector<2x96xf32> to vector<2x32xf32>
    %574 = vector.extract_strided_slice %562 {offsets = [0, 32], sizes = [2, 32], strides = [1, 1]} : vector<2x96xf32> to vector<2x32xf32>
    %575 = arith.addf %573, %574 : vector<2x32xf32>
    %cst_221 = arith.constant 0.000000e+00 : f32
    %576 = vector.broadcast %cst_221 : f32 to vector<2x32xf32>
    %577 = arith.subf %576, %575 : vector<2x32xf32>
    %578 = math.exp %577 : vector<2x32xf32>
    %cst_222 = arith.constant 1.000000e+00 : f32
    %579 = vector.broadcast %cst_222 : f32 to vector<2x32xf32>
    %580 = arith.addf %579, %578 : vector<2x32xf32>
    %581 = tpu.reciprocal %580 {approx = true} : vector<2x32xf32> -> vector<2x32xf32>
    %582 = vector.extract_strided_slice %560 {offsets = [0, 64], sizes = [2, 32], strides = [1, 1]} : vector<2x96xf32> to vector<2x32xf32>
    %583 = vector.extract_strided_slice %562 {offsets = [0, 64], sizes = [2, 32], strides = [1, 1]} : vector<2x96xf32> to vector<2x32xf32>
    %584 = vector.broadcast %563 : vector<1x32xf32> to vector<2x32xf32>
    %585 = arith.addf %583, %584 : vector<2x32xf32>
    %586 = arith.mulf %572, %585 : vector<2x32xf32>
    %587 = arith.addf %582, %586 : vector<2x32xf32>
    %588 = math.tanh %587 : vector<2x32xf32>
    %cst_223 = arith.constant 1.000000e+00 : f32
    %589 = vector.broadcast %cst_223 : f32 to vector<2x32xf32>
    %590 = arith.subf %589, %581 : vector<2x32xf32>
    %591 = arith.mulf %590, %588 : vector<2x32xf32>
    %592 = arith.mulf %581, %519 : vector<2x32xf32>
    %593 = arith.addf %591, %592 : vector<2x32xf32>
    %c0_224 = arith.constant 0 : index
    %c0_225 = arith.constant 0 : index
    %594 = vector.load %arg5[%c0_224, %c0_225] : memref<32x96xf32, #tpu.memory_space<vmem>>, vector<32x96xf32>
    %cst_226 = arith.constant dense<0.000000e+00> : vector<2x96xf32>
    %595 = tpu.matmul %593, %594, %cst_226 {dimension_numbers = #tpu.dot_dimension_numbers<[1], [0], [0], [1], [0, 0, 1, 1], [], []>} : vector<2x32xf32>, vector<32x96xf32>, vector<2x96xf32> -> vector<2x96xf32>
    %c0_227 = arith.constant 0 : index
    %c0_228 = arith.constant 0 : index
    %596 = vector.load %arg7[%c0_227, %c0_228] : memref<1x128xf32, #tpu.memory_space<vmem>>, vector<1x96xf32>
    %597 = vector.broadcast %596 : vector<1x96xf32> to vector<2x96xf32>
    %598 = arith.addf %595, %597 : vector<2x96xf32>
    %c0_229 = arith.constant 0 : index
    %c0_230 = arith.constant 0 : index
    %599 = vector.load %arg6[%c0_229, %c0_230] : memref<32x96xf32, #tpu.memory_space<vmem>>, vector<32x96xf32>
    %cst_231 = arith.constant dense<0.000000e+00> : vector<2x96xf32>
    %600 = tpu.matmul %557, %599, %cst_231 {dimension_numbers = #tpu.dot_dimension_numbers<[1], [0], [0], [1], [0, 0, 1, 1], [], []>} : vector<2x32xf32>, vector<32x96xf32>, vector<2x96xf32> -> vector<2x96xf32>
    %c0_232 = arith.constant 0 : index
    %c96_233 = arith.constant 96 : index
    %601 = vector.load %arg7[%c0_232, %c96_233] : memref<1x128xf32, #tpu.memory_space<vmem>>, vector<1x32xf32>
    %602 = vector.extract_strided_slice %598 {offsets = [0, 0], sizes = [2, 32], strides = [1, 1]} : vector<2x96xf32> to vector<2x32xf32>
    %603 = vector.extract_strided_slice %600 {offsets = [0, 0], sizes = [2, 32], strides = [1, 1]} : vector<2x96xf32> to vector<2x32xf32>
    %604 = arith.addf %602, %603 : vector<2x32xf32>
    %cst_234 = arith.constant 0.000000e+00 : f32
    %605 = vector.broadcast %cst_234 : f32 to vector<2x32xf32>
    %606 = arith.subf %605, %604 : vector<2x32xf32>
    %607 = math.exp %606 : vector<2x32xf32>
    %cst_235 = arith.constant 1.000000e+00 : f32
    %608 = vector.broadcast %cst_235 : f32 to vector<2x32xf32>
    %609 = arith.addf %608, %607 : vector<2x32xf32>
    %610 = tpu.reciprocal %609 {approx = true} : vector<2x32xf32> -> vector<2x32xf32>
    %611 = vector.extract_strided_slice %598 {offsets = [0, 32], sizes = [2, 32], strides = [1, 1]} : vector<2x96xf32> to vector<2x32xf32>
    %612 = vector.extract_strided_slice %600 {offsets = [0, 32], sizes = [2, 32], strides = [1, 1]} : vector<2x96xf32> to vector<2x32xf32>
    %613 = arith.addf %611, %612 : vector<2x32xf32>
    %cst_236 = arith.constant 0.000000e+00 : f32
    %614 = vector.broadcast %cst_236 : f32 to vector<2x32xf32>
    %615 = arith.subf %614, %613 : vector<2x32xf32>
    %616 = math.exp %615 : vector<2x32xf32>
    %cst_237 = arith.constant 1.000000e+00 : f32
    %617 = vector.broadcast %cst_237 : f32 to vector<2x32xf32>
    %618 = arith.addf %617, %616 : vector<2x32xf32>
    %619 = tpu.reciprocal %618 {approx = true} : vector<2x32xf32> -> vector<2x32xf32>
    %620 = vector.extract_strided_slice %598 {offsets = [0, 64], sizes = [2, 32], strides = [1, 1]} : vector<2x96xf32> to vector<2x32xf32>
    %621 = vector.extract_strided_slice %600 {offsets = [0, 64], sizes = [2, 32], strides = [1, 1]} : vector<2x96xf32> to vector<2x32xf32>
    %622 = vector.broadcast %601 : vector<1x32xf32> to vector<2x32xf32>
    %623 = arith.addf %621, %622 : vector<2x32xf32>
    %624 = arith.mulf %610, %623 : vector<2x32xf32>
    %625 = arith.addf %620, %624 : vector<2x32xf32>
    %626 = math.tanh %625 : vector<2x32xf32>
    %cst_238 = arith.constant 1.000000e+00 : f32
    %627 = vector.broadcast %cst_238 : f32 to vector<2x32xf32>
    %628 = arith.subf %627, %619 : vector<2x32xf32>
    %629 = arith.mulf %628, %626 : vector<2x32xf32>
    %630 = arith.mulf %619, %557 : vector<2x32xf32>
    %631 = arith.addf %629, %630 : vector<2x32xf32>
    %c8_i32 = arith.constant 8 : i32
    %c0_239 = arith.constant 0 : index
    %c0_240 = arith.constant 0 : index
    %632 = vector.load %arg8[%c0_239, %c0_240] : memref<32x32xf32, #tpu.memory_space<vmem>>, vector<32x32xf32>
    %cst_241 = arith.constant dense<0.000000e+00> : vector<2x32xf32>
    %633 = tpu.matmul %631, %632, %cst_241 {dimension_numbers = #tpu.dot_dimension_numbers<[1], [0], [0], [1], [0, 0, 1, 1], [], []>} : vector<2x32xf32>, vector<32x32xf32>, vector<2x32xf32> -> vector<2x32xf32>
    %c0_242 = arith.constant 0 : index
    %c0_243 = arith.constant 0 : index
    %634 = vector.load %arg9[%c0_242, %c0_243] : memref<1x32xf32, #tpu.memory_space<vmem>>, vector<1x32xf32>
    %635 = vector.broadcast %634 : vector<1x32xf32> to vector<2x32xf32>
    %636 = arith.addf %633, %635 : vector<2x32xf32>
    %cst_244 = arith.constant 0.000000e+00 : f32
    %637 = vector.broadcast %cst_244 : f32 to vector<2x32xf32>
    %638 = arith.maximumf %636, %637 : vector<2x32xf32>
    %c0_245 = arith.constant 0 : index
    %c0_246 = arith.constant 0 : index
    %639 = vector.load %arg10[%c0_245, %c0_246] : memref<32x32xf32, #tpu.memory_space<vmem>>, vector<32x32xf32>
    %cst_247 = arith.constant dense<0.000000e+00> : vector<2x32xf32>
    %640 = tpu.matmul %638, %639, %cst_247 {dimension_numbers = #tpu.dot_dimension_numbers<[1], [0], [0], [1], [0, 0, 1, 1], [], []>} : vector<2x32xf32>, vector<32x32xf32>, vector<2x32xf32> -> vector<2x32xf32>
    %c0_248 = arith.constant 0 : index
    %c0_249 = arith.constant 0 : index
    %641 = vector.load %arg11[%c0_248, %c0_249] : memref<1x32xf32, #tpu.memory_space<vmem>>, vector<1x32xf32>
    %642 = vector.broadcast %641 : vector<1x32xf32> to vector<2x32xf32>
    %643 = arith.addf %640, %642 : vector<2x32xf32>
    %cst_250 = arith.constant 0.000000e+00 : f32
    %644 = vector.broadcast %cst_250 : f32 to vector<2x32xf32>
    %645 = arith.maximumf %643, %644 : vector<2x32xf32>
    %c0_251 = arith.constant 0 : index
    %c0_252 = arith.constant 0 : index
    %646 = vector.load %arg12[%c0_251, %c0_252] : memref<32x8xf32, #tpu.memory_space<vmem>>, vector<32x8xf32>
    %cst_253 = arith.constant dense<0.000000e+00> : vector<2x8xf32>
    %647 = tpu.matmul %645, %646, %cst_253 {dimension_numbers = #tpu.dot_dimension_numbers<[1], [0], [0], [1], [0, 0, 1, 1], [], []>} : vector<2x32xf32>, vector<32x8xf32>, vector<2x8xf32> -> vector<2x8xf32>
    %c0_254 = arith.constant 0 : index
    %c0_255 = arith.constant 0 : index
    %648 = vector.load %arg13[%c0_254, %c0_255] : memref<1x8xf32, #tpu.memory_space<vmem>>, vector<1x8xf32>
    %649 = vector.broadcast %648 : vector<1x8xf32> to vector<2x8xf32>
    %650 = arith.addf %647, %649 : vector<2x8xf32>
    %651 = vector.extract_strided_slice %650 {offsets = [0, 0], sizes = [2, 4], strides = [1, 1]} : vector<2x8xf32> to vector<2x4xf32>
    %652 = vector.extract_strided_slice %650 {offsets = [0, 4], sizes = [2, 4], strides = [1, 1]} : vector<2x8xf32> to vector<2x4xf32>
    %cst_256 = arith.constant -2.000000e+01 : f32
    %cst_257 = arith.constant 2.000000e+00 : f32
    %653 = vector.broadcast %cst_256 : f32 to vector<2x4xf32>
    %654 = arith.maximumf %653, %652 : vector<2x4xf32>
    %655 = vector.broadcast %cst_257 : f32 to vector<2x4xf32>
    %656 = arith.minimumf %655, %654 : vector<2x4xf32>
    %657 = math.exp %656 : vector<2x4xf32>
    %cst_258 = arith.constant 0.000000e+00 : f32
    %658 = vector.broadcast %cst_258 : f32 to vector<2x4xf32>
    %659 = arith.subf %658, %656 : vector<2x4xf32>
    %660 = math.exp %659 : vector<2x4xf32>
    %c0_259 = arith.constant 0 : index
    %c0_260 = arith.constant 0 : index
    %661 = vector.load %arg1[%c0_259, %c0_260] : memref<2x4xf32, #tpu.memory_space<vmem>>, vector<2x4xf32>
    %662 = arith.mulf %657, %661 : vector<2x4xf32>
    %663 = arith.addf %651, %662 : vector<2x4xf32>
    %664 = arith.subf %663, %651 : vector<2x4xf32>
    %665 = arith.mulf %664, %660 : vector<2x4xf32>
    %666 = arith.mulf %665, %665 : vector<2x4xf32>
    %cst_261 = arith.constant -5.000000e-01 : f32
    %667 = vector.broadcast %cst_261 : f32 to vector<2x4xf32>
    %668 = arith.mulf %667, %666 : vector<2x4xf32>
    %669 = arith.subf %668, %656 : vector<2x4xf32>
    %cst_262 = arith.constant 5.000000e-01 : f32
    %cst_263 = arith.constant 1.83787704 : f32
    %670 = arith.mulf %cst_262, %cst_263 : f32
    %671 = vector.broadcast %670 : f32 to vector<2x4xf32>
    %672 = arith.subf %669, %671 : vector<2x4xf32>
    %cst_264 = arith.constant dense<0.000000e+00> : vector<2xf32>
    %673 = vector.multi_reduction <add>, %672, %cst_264 [1] : vector<2x4xf32> to vector<2xf32>
    %674 = vector.shape_cast %673 : vector<2xf32> to vector<2x1xf32>
    %cst_265 = arith.constant 0.693147182 : f32
    %675 = vector.broadcast %cst_265 : f32 to vector<2x4xf32>
    %676 = arith.subf %675, %663 : vector<2x4xf32>
    %cst_266 = arith.constant -2.000000e+00 : f32
    %677 = vector.broadcast %cst_266 : f32 to vector<2x4xf32>
    %678 = arith.mulf %677, %663 : vector<2x4xf32>
    %cst_267 = arith.constant 0.000000e+00 : f32
    %679 = vector.broadcast %cst_267 : f32 to vector<2x4xf32>
    %680 = arith.maximumf %678, %679 : vector<2x4xf32>
    %681 = math.absf %678 : vector<2x4xf32>
    %cst_268 = arith.constant 0.000000e+00 : f32
    %682 = vector.broadcast %cst_268 : f32 to vector<2x4xf32>
    %683 = arith.subf %682, %681 : vector<2x4xf32>
    %684 = math.exp %683 : vector<2x4xf32>
    %685 = math.log1p %684 : vector<2x4xf32>
    %686 = arith.addf %680, %685 : vector<2x4xf32>
    %687 = arith.subf %676, %686 : vector<2x4xf32>
    %cst_269 = arith.constant 2.000000e+00 : f32
    %688 = vector.broadcast %cst_269 : f32 to vector<2x4xf32>
    %689 = arith.mulf %688, %687 : vector<2x4xf32>
    %cst_270 = arith.constant dense<0.000000e+00> : vector<2xf32>
    %690 = vector.multi_reduction <add>, %689, %cst_270 [1] : vector<2x4xf32> to vector<2xf32>
    %691 = vector.shape_cast %690 : vector<2xf32> to vector<2x1xf32>
    %692 = arith.subf %674, %691 : vector<2x1xf32>
    %693 = math.tanh %663 : vector<2x4xf32>
    %cst_271 = arith.constant 1.000000e+00 : f32
    %694 = vector.broadcast %cst_271 : f32 to vector<2x4xf32>
    %695 = arith.mulf %694, %693 : vector<2x4xf32>
    %c0_272 = arith.constant 0 : index
    %c0_273 = arith.constant 0 : index
    %696 = vector.load %arg14[%c0_272, %c0_273] : memref<2x4xf32, #tpu.memory_space<vmem>>, vector<2x4xf32>
    tpu.vector_store %arg14[%c0_272, %c0_273], %695 {strides = array<i32>} : memref<2x4xf32, #tpu.memory_space<vmem>>, vector<2x4xf32>,
    %c0_274 = arith.constant 0 : index
    %c0_275 = arith.constant 0 : index
    %697 = vector.load %arg15[%c0_274, %c0_275] : memref<2x1xf32, #tpu.memory_space<vmem>>, vector<2x1xf32>
    tpu.vector_store %arg15[%c0_274, %c0_275], %692 {strides = array<i32>} : memref<2x1xf32, #tpu.memory_space<vmem>>, vector<2x1xf32>,
    return
  }
}

</mosaic_0001>

<bundles_post_ra>
// kernel: tpu_custom_call.1
= control target key start
LH: loop header
LB: loop body
LE: loop exit
PB: predicated region body
PF: predicated region fallthrough
CT: control target
= control target key end

     0   :  { %21 = vsyncpa [#allocation4], 0  ;;  %s4217_s0 = inlined_call_operand.hbm [shape: f32[16,16], index: 0, kind: input, shape index: {}]   ;;  %s4218_s1 = inlined_call_operand.vmem [shape: f32[2,4], index: 1, kind: input, shape index: {}]   ;;  %s4219_s2 = inlined_call_operand.hbm [shape: f32[16,96], index: 2, kind: input, shape index: {}]   ;;  %s4220_s3 = inlined_call_operand.vmem [shape: f32[32,96], index: 3, kind: input, shape index: {}]   ;;  %s4221_s4 = inlined_call_operand.vmem [shape: f32[1,128], index: 4, kind: input, shape index: {}]   ;;  %s4222_s5 = inlined_call_operand.hbm [shape: f32[32,96], index: 5, kind: input, shape index: {}]   ;;  %s4223_s6 = inlined_call_operand.hbm [shape: f32[32,96], index: 6, kind: input, shape index: {}]   ;;  %s4224_s7 = inlined_call_operand.vmem [shape: f32[1,128], index: 7, kind: input, shape index: {}]   ;;  %s4225_s8 = inlined_call_operand.hbm [shape: f32[32,32], index: 8, kind: input, shape index: {}]   ;;  %s4226_s9 = inlined_call_operand.vmem [shape: f32[1,32], index: 9, kind: input, shape index: {}]   ;;  %s4227_s10 = inlined_call_operand.hbm [shape: f32[32,32], index: 10, kind: input, shape index: {}]   ;;  %s4228_s11 = inlined_call_operand.vmem [shape: f32[1,32], index: 11, kind: input, shape index: {}]   ;;  %s4229_s12 = inlined_call_operand.vmem [shape: f32[32,8], index: 12, kind: input, shape index: {}]   ;;  %s4230_s13 = inlined_call_operand.vmem [shape: f32[1,8], index: 13, kind: input, shape index: {}]   ;;  %s4231_s14 = inlined_call_operand.hbm [shape: f32[2,4], index: 14, kind: output, shape index: {0}]   ;;  %s4232_s15 = inlined_call_operand.vmem [shape: f32[2,1], index: 15, kind: output, shape index: {1}]  }
   0x1   :  { %22 = vsyncpa [#allocation7], 0 }
   0x2   :  { %23 = vsyncpa [#allocation10], 0 }
   0x3   :  { %24 = vsyncpa [#allocation13], 0 }
   0x4   :  { %25 = vsyncpa [#allocation5], 0  ;;  %s3560_s18 = smov [#allocation6]   ;;  %s3561_s20 = smov [#allocation9]  }
   0x5   :  { %s45_s19 = sshll.u32 %s3560_s18, 4  ;;  %s73_s21 = sshll.u32 %s3561_s20, 4  ;;  %s46_s19 = int_to_ptr.vmem [resolvable:$true] %s45_s19  ;;  %s74_s21 = int_to_ptr.vmem [resolvable:$true] %s73_s21 }
   0x6   :  { %s3418_s22 = scalar_lea.vmem %s46_s19, 256  ;;  %p3423_p1 = scmp.lt.s32.totalorder %s46_s19, %s46_s19 }
   0x7   :  { %p3419_p0 = scmp.ne.s32.totalorder %s46_s19, %s3418_s22  ;;  %p3424_p2 = scmp.lt.s32.totalorder %s3418_s22, %s3418_s22 }
   0x9   :  { %p3425_p3 = por %p3424_p2, %p3423_p1 }
   0xb   :  { %p3426_p4 = pnand %p3425_p3, %p3419_p0 }
   0xd   :  { %3429 = shalt.err (!%p3426_p4)
}
   0xe   :  { %s3562_s23 = smov 128   ;;  %s3563_s24 = smov 8  }
   0xf   :  { %51 = dma.hbm_to_vmem [thread:$0]  %s4219_s2, 256, %s46_s19, [#allocation7], %s3562_s23, %s3562_s23, %s3563_s24  }
  0x10   :  { %s3438_s27 = scalar_lea.vmem %s74_s21, 512  ;;  %p3443_p6 = scmp.lt.s32.totalorder %s74_s21, %s74_s21 }
  0x11   :  { %p3439_p5 = scmp.ne.s32.totalorder %s74_s21, %s3438_s27  ;;  %p3444_p7 = scmp.lt.s32.totalorder %s3438_s27, %s3438_s27 }
  0x13   :  { %p3445_p8 = por %p3444_p7, %p3443_p6 }
  0x15   :  { %p3446_p9 = pnand %p3445_p8, %p3439_p5 }
  0x17   :  { %3449 = shalt.err (!%p3446_p9)
}
  0x18   :  { %79 = dma.hbm_to_vmem [thread:$0]  %s4223_s6, 512, %s74_s21, [#allocation10], %s3562_s23, %s3562_s23, %s3563_s24  }
  0x19   :  { %s3564_s30 = smov [#allocation3]   ;;  %s3565_s17 = smov [#allocation8]  }
  0x1a   :  { %s31_s16 = sshll.u32 %s3564_s30, 4  ;;  %s61_s18 = sshll.u32 %s3565_s17, 4  ;;  %s32_s16 = int_to_ptr.vmem [resolvable:$true] %s31_s16  ;;  %s62_s18 = int_to_ptr.vmem [resolvable:$true] %s61_s18 }
  0x1b   :  { %s3458_s2 = scalar_lea.vmem %s32_s16, 256  ;;  %p3463_p11 = scmp.lt.s32.totalorder %s32_s16, %s32_s16 }
  0x1c   :  { %p3459_p10 = scmp.ne.s32.totalorder %s32_s16, %s3458_s2  ;;  %p3464_p12 = scmp.lt.s32.totalorder %s3458_s2, %s3458_s2 }
  0x1e   :  { %p3465_p13 = por %p3464_p12, %p3463_p11 }
  0x20   :  { %p3466_p0 = pnand %p3465_p13, %p3459_p10 }
  0x22   :  { %3469 = shalt.err (!%p3466_p0)
}
  0x23   :  { %37 = dma.hbm_to_vmem [thread:$0]  %s4217_s0, 256, %s32_s16, [#allocation4], %s3562_s23, %s3562_s23, %s3563_s24  }
  0x24   :  { %s3478_s6 = scalar_lea.vmem %s62_s18, 512  ;;  %p3483_p2 = scmp.lt.s32.totalorder %s62_s18, %s62_s18 }
  0x25   :  { %p3479_p1 = scmp.ne.s32.totalorder %s62_s18, %s3478_s6  ;;  %p3484_p3 = scmp.lt.s32.totalorder %s3478_s6, %s3478_s6 }
  0x27   :  { %p3485_p4 = por %p3484_p3, %p3483_p2 }
  0x29   :  { %p3486_p5 = pnand %p3485_p4, %p3479_p1 }
  0x2b   :  { %3489 = shalt.err (!%p3486_p5)
}
  0x2c   :  { %67 = dma.hbm_to_vmem [thread:$0]  %s4222_s5, 512, %s62_s18, [#allocation7], %s3562_s23, %s3562_s23, %s3563_s24  }
  0x2d   :  { %s3566_s25 = smov [#allocation11]   ;;  %s3567_s27 = smov [#allocation12]  }
  0x2e   :  { %s87_s26 = sshll.u32 %s3566_s25, 4  ;;  %s101_s28 = sshll.u32 %s3567_s27, 4  ;;  %s88_s26 = int_to_ptr.vmem [resolvable:$true] %s87_s26  ;;  %s102_s28 = int_to_ptr.vmem [resolvable:$true] %s101_s28 }
  0x2f   :  { %s3498_s0 = scalar_lea.vmem %s88_s26, 512  ;;  %p3503_p7 = scmp.lt.s32.totalorder %s88_s26, %s88_s26 }
  0x30   :  { %p3499_p6 = scmp.ne.s32.totalorder %s88_s26, %s3498_s0  ;;  %p3504_p8 = scmp.lt.s32.totalorder %s3498_s0, %s3498_s0 }
  0x32   :  { %p3505_p9 = por %p3504_p8, %p3503_p7 }
  0x34   :  { %p3506_p10 = pnand %p3505_p9, %p3499_p6 }
  0x36   :  { %3509 = shalt.err (!%p3506_p10)
}
  0x37   :  { %93 = dma.hbm_to_vmem [thread:$0]  %s4225_s8, 512, %s88_s26, [#allocation10], %s3562_s23, %s3562_s23, %s3563_s24  }
  0x38   :  { %s3518_s5 = scalar_lea.vmem %s102_s28, 512  ;;  %p3523_p12 = scmp.lt.s32.totalorder %s102_s28, %s102_s28 }
  0x39   :  { %p3519_p11 = scmp.ne.s32.totalorder %s102_s28, %s3518_s5  ;;  %p3524_p13 = scmp.lt.s32.totalorder %s3518_s5, %s3518_s5 }
  0x3b   :  { %p3525_p0 = por %p3524_p13, %p3523_p12 }
  0x3d   :  { %p3526_p1 = pnand %p3525_p0, %p3519_p11 }
  0x3f   :  { %3529 = shalt.err (!%p3526_p1)
}
  0x40   :  { %107 = dma.hbm_to_vmem [thread:$0]  %s4227_s10, 512, %s102_s28, [#allocation13], %s3562_s23, %s3562_s23, %s3563_s24  }
  0x41   :  { %3550 = dma.done.wait [#allocation4], 256  }
  0x42   :  { %3551 = vsyncadd [#allocation4], 4294967040 }
  0x43   :  { %3552 = dma.done.wait [#allocation7], 768  }
  0x44   :  { %3553 = vsyncadd [#allocation7], 4294966528 }
  0x45   :  { %3554 = dma.done.wait [#allocation10], 1024  }
  0x46   :  { %3555 = vsyncadd [#allocation10], 4294966272 }
  0x47   :  { %3556 = dma.done.wait [#allocation13], 512  }
  0x48   :  { %3557 = vsyncadd [#allocation13], 4294966784  ;;  %v3568_v0 = vmov 0.0   ;;  %vm3569_vm0 = vmmov 0   ;;  %v135_v1 = vld [vmem:[#allocation6 + $0x8] sm:$0xff]  ;;  %v3697_v2 = vld [vmem:[%s4220_s3 + $0x18] sm:$0xff] }
  0x49   :  { %2979 = vmatprep.subr.mxu1 %v3568_v0  ;;  %2987 = vmatprep.mubr.msk.f32.mxu1 %vm3569_vm0, %v3568_v0  ;;  %v134_v3 = vld [vmem:[#allocation6] sm:$0xff]  ;;  %v3703_v4 = vld [vmem:[%s4220_s3 + $0x10] sm:$0xff]  ;;  %vm143_vm1 = vcmask 130048   ;;  %v133_v6 = vld [vmem:[#allocation3 + $0x8] sm:$0xff]  ;;  %s3570_s22 = smov 96   ;;  %vm228_vm2 = vcmask 781314  }
  0x4a   :  { %2972 = vmatprep.subr.mxu0 %v135_v1  ;;  %2980 = vmatpush3.msra.mxu1 %v3697_v2  ;;  %v132_v5 = vld [vmem:[#allocation3] sm:$0xff]  ;;  %v3710_v7 = vld [vmem:[%s4220_s3 + $0x8] sm:$0xff]  ;;  %v2802_v8 = vld [vmem:[%s4221_s4] ss:$0 sm:$0xff]  ;;  %vm231_vm3 = vcmask 783364   ;;  %vm234_vm4 = vcmask 785414  }
  0x4b   :  { %2973 = vmatpush3.msra.mxu0 %v135_v1  ;;  %2981 = vmatprep.subr.mxu1 %v3568_v0  ;;  %v3719_v9 = vld [vmem:[%s4220_s3] sm:$0xff]  ;;  %vm225_vm5 = vcmask 779264   ;;  %s3571_s4 = smov 64   ;;  %v3737_v29 = vld [vmem:[#allocation9 + $0x18] sm:$0xff]  ;;  %v3747_v33 = vld [vmem:[#allocation9 + $0x8] sm:$0xff]  ;;  %vm249_vm6 = vcmask 261120  }
  0x4c   :  { %2974 = vmatprep.subr.mxu0 %v134_v3  ;;  %2982 = vmatpush3.msra.mxu1 %v3703_v4  ;;  %v3739_v30 = vld [vmem:[#allocation9 + $0x10] sm:$0xff]  ;;  %v3742_v31 = vld [vmem:[#allocation8 + $0x18] sm:$0xff]  ;;  %v3752_v34 = vld [vmem:[#allocation8 + $0x8] sm:$0xff]  ;;  %vm2746_vm7 = vcmask 25600  }
  0x4d   :  { %2975 = vmatpush3.msra.mxu0 %v134_v3  ;;  %2976 = vmatprep.mubr.msk.f32.mxu0 %vm143_vm1, %v132_v5  ;;  %v3744_v32 = vld [vmem:[#allocation8 + $0x10] sm:$0xff]  ;;  %v3755_v35 = vld [vmem:[#allocation9] sm:$0xff] }
  0x4e   :  { %2983 = vmatprep.subr.mxu1 %v3568_v0  ;;  %2977 = vmatmul.mubr.msk.f32.vlgmr.msra.gmra.mxu0 %vm143_vm1, %v133_v6  ;;  %v3760_v36 = vld [vmem:[#allocation8] sm:$0xff]  ;;  %v3773_v38 = vld [vmem:[%s4224_s7] ss:$0 sm:$0xff] }
  0x4f   :  { %2984 = vmatpush3.msra.mxu1 %v3710_v7  ;;  %335 = vrot.lane.b32.xlu0 %v2802_v8, %s3570_s22 }
  0x50   :  { %2985 = vmatprep.subr.mxu1 %v3568_v0  ;;  %2990 = vmatprep.subr.mxu0 %v3568_v0 }
  0x51   :  { %2986 = vmatpush3.msra.mxu1 %v3719_v9  ;;  %2998 = vmatprep.mubr.msk.f32.mxu0 %vm3569_vm0, %v3568_v0 }
  0x52   :  { %2988 = vmatmul.mubr.f32.vlgmr.msra.gmra.mxu1 %v3568_v0  ;;  %3001 = vmatprep.subr.mxu1 %v3568_v0 }
  0x53   :  { %3009 = vmatprep.mubr.msk.f32.mxu1 %vm3569_vm0, %v3568_v0  ;;  %3002 = vmatpush3.msra.mxu1 %v3737_v29 }
  0x54   :  { %3003 = vmatprep.subr.mxu1 %v3568_v0  ;;  %2991 = vmatpush3.msra.mxu0 %v3742_v31 }
  0x55   :  { %3004 = vmatpush3.msra.mxu1 %v3739_v30  ;;  %2992 = vmatprep.subr.mxu0 %v3568_v0 }
  0x56   :  { %3005 = vmatprep.subr.mxu1 %v3568_v0  ;;  %2993 = vmatpush3.msra.mxu0 %v3744_v32 }
  0x57   :  { %3006 = vmatpush3.msra.mxu1 %v3747_v33  ;;  %2994 = vmatprep.subr.mxu0 %v3568_v0 }
  0x58   :  { %3007 = vmatprep.subr.mxu1 %v3568_v0  ;;  %2995 = vmatpush3.msra.mxu0 %v3752_v34 }
  0x59   :  { %3008 = vmatpush3.msra.mxu1 %v3755_v35  ;;  %2996 = vmatprep.subr.mxu0 %v3568_v0 }
  0x5a   :  { %3010 = vmatmul.mubr.f32.vlgmr.msra.gmra.mxu1 %v3568_v0  ;;  %2997 = vmatpush3.msra.mxu0 %v3760_v36 }
  0x5b   :  { %3012 = vmatprep.subr.mxu0 %v3568_v0  ;;  %3023 = vmatprep.subr.mxu1 %v3568_v0 }
  0x5c   :  { %3031 = vmatprep.mubr.msk.f32.mxu1 %vm3569_vm0, %v3568_v0  ;;  %3024 = vmatpush3.msra.mxu1 %v3742_v31 }
  0x5d   :  { %3025 = vmatprep.subr.mxu1 %v3568_v0 }
  0x5e   :  { %3026 = vmatpush3.msra.mxu1 %v3744_v32 }
  0x5f   :  { %3027 = vmatprep.subr.mxu1 %v3568_v0 }
  0x60   :  { %3028 = vmatpush3.msra.mxu1 %v3752_v34 }
  0x61   :  { %3029 = vmatprep.subr.mxu1 %v3568_v0 }
  0x62   :  { %3030 = vmatpush3.msra.mxu1 %v3760_v36 }
  0x63   :  { %3045 = vmatprep.subr.mxu1 %v3568_v0 }
  0xc1   :  { %v3732_v13 = vpop.permute.xlu0 %335 }
 0x10e   :  { %v2978_v10 = vpop.f32.mrf.mxu0 }
 0x10f   :  { %v222_v11 = vadd.f32 %v2978_v10, %v2802_v8 }
 0x110   :  { %v216_v12 = vpop.f32.mrf.mxu0 }
 0x111   :  { %237 = vst.msk [vmem:[#allocation2 + $0x8] sm:$0x3] %vm225_vm5, %v222_v11  ;;  %v217_v14 = vadd.f32 %v2802_v8, %v216_v12 }
 0x112   :  { %239 = vst.msk [vmem:[#allocation2 + $0x8] sm:$0xc] %vm228_vm2, %v222_v11  ;;  %v319_v15 = vpop.f32.mrf.mxu1 }
 0x113   :  { %241 = vst.msk [vmem:[#allocation2 + $0x8] sm:$0x30] %vm231_vm3, %v222_v11  ;;  %232 = vst.msk [vmem:[#allocation2] sm:$0x30] %vm231_vm3, %v217_v14  ;;  %v338_v16 = vadd.f32 %v3732_v13, %v319_v15 }
 0x114   :  { %243 = vst.msk [vmem:[#allocation2 + $0x8] sm:$0xc0] %vm234_vm4, %v222_v11  ;;  %235 = vst.msk [vmem:[#allocation2] sm:$0xc0] %vm234_vm4, %v217_v14  ;;  %v2989_v17 = vpop.f32.mrf.mxu1 }
 0x115   :  { %226 = vst.msk [vmem:[#allocation2] sm:$0x3] %vm225_vm5, %v217_v14  ;;  %340 = vrot.lane.b32.xlu0 %v338_v16, %s3571_s4 }
 0x116   :  { %229 = vst.msk [vmem:[#allocation2] sm:$0xc] %vm228_vm2, %v217_v14 }
 0x11a   :  { %v514_v45 = vpop.f32.mrf.mxu1 }
 0x11c   :  { %v244_v18 = vld [vmem:[#allocation2] sm:$0x3]  ;;  %v3011_v47 = vpop.f32.mrf.mxu1 }
 0x11d   :  { %v324_v19 = vadd.f32 %v319_v15, %v244_v18  ;;  %v547_v63 = vld [vmem:[#allocation2 + $0x2] sm:$0x3] }
 0x11f   :  { %v325_v20 = vsub.f32 0.0, %v324_v19 }
 0x121   :  { %v326_v21 = vmul.f32 1.442695, %v325_v20 }
 0x123   :  { %3291 = vpow2.f32 %v326_v21 }
 0x130   :  { %v3292_v22 = vpop.eup %3291 }
 0x131   :  { %v328_v23 = vadd.f32 1.0, %v3292_v22 }
 0x133   :  { %3293 = vrcp.f32 %v328_v23 }
 0x140   :  { %v3294_v24 = vpop.eup %3293 }
 0x141   :  { %v350_v39 = vsub.f32 1.0, %v3294_v24  ;;  %v356_v41 = vmul.f32 0.0, %v3294_v24 }
 0x187   :  { %v341_v25 = vpop.permute.xlu0 %340 }
 0x188   :  { %v343_v26 = vmul.f32 %v3294_v24, %v341_v25 }
 0x18a   :  { %345 = vrot.lane.b32.xlu1 %v343_v26, %s3571_s4 }
 0x1fc   :  { %v346_v27 = vpop.permute.xlu1 %345 }
 0x1fd   :  { %v348_v28 = vadd.f32 %v346_v27, %v244_v18 }
 0x1ff   :  { %3295 = vtanh.f32 %v348_v28 }
 0x20c   :  { %v3296_v37 = vpop.eup %3295 }
 0x20d   :  { %352 = vrot.lane.b32.xlu1 %v3296_v37, %s3570_s22 }
 0x211   :  { %524 = vrot.lane.b32.xlu1 %v3773_v38, %s3570_s22 }
 0x27f   :  { %v353_v40 = vpop.permute.xlu1 %352 }
 0x280   :  { %v355_v42 = vmul.f32 %v353_v40, %v350_v39 }
 0x282   :  { %v3788_v43 = vadd.f32 %v356_v41, %v355_v42 }
 0x283   :  { %v3792_v44 = vpop.permute.xlu1 %524 }
 0x284   :  { %370 = vrot.lane.b32.xlu0 %v3788_v43, %s3570_s22  ;;  %v527_v46 = vadd.f32 %v3792_v44, %v514_v45 }
 0x286   :  { %529 = vrot.lane.b32.xlu1 %v527_v46, %s3571_s4 }
 0x2f6   :  { %v371_v48 = vpop.permute.xlu0 %370 }
 0x2f7   :  { %2999 = vmatmul.mubr.msk.f32.vlgmr.msra.gmra.mxu0 %vm249_vm6, %v371_v48 }
 0x2f8   :  { %3013 = vmatpush3.msra.mxu0 %v3697_v2  ;;  %3020 = vmatprep.mubr.msk.f32.mxu0 %vm3569_vm0, %v3568_v0  ;;  %v530_v60 = vpop.permute.xlu1 %529 }
 0x2f9   :  { %3014 = vmatprep.subr.mxu0 %v3568_v0 }
 0x2fa   :  { %3015 = vmatpush3.msra.mxu0 %v3703_v4 }
 0x2fb   :  { %3016 = vmatprep.subr.mxu0 %v3568_v0 }
 0x2fc   :  { %3017 = vmatpush3.msra.mxu0 %v3710_v7 }
 0x2fd   :  { %3018 = vmatprep.subr.mxu0 %v3568_v0 }
 0x2fe   :  { %3019 = vmatpush3.msra.mxu0 %v3719_v9 }
 0x2ff   :  { %3021 = vmatmul.mubr.msk.f32.vlgmr.msra.gmra.mxu0 %vm249_vm6, %v371_v48  ;;  %3034 = vmatprep.subr.mxu0 %v3568_v0 }
 0x300   :  { %3035 = vmatpush3.msra.mxu0 %v3737_v29  ;;  %3042 = vmatprep.mubr.msk.f32.mxu0 %vm3569_vm0, %v3568_v0 }
 0x301   :  { %3036 = vmatprep.subr.mxu0 %v3568_v0 }
 0x302   :  { %3037 = vmatpush3.msra.mxu0 %v3739_v30 }
 0x303   :  { %3038 = vmatprep.subr.mxu0 %v3568_v0 }
 0x304   :  { %3039 = vmatpush3.msra.mxu0 %v3747_v33 }
 0x305   :  { %3040 = vmatprep.subr.mxu0 %v3568_v0 }
 0x306   :  { %3041 = vmatpush3.msra.mxu0 %v3755_v35 }
 0x307   :  { %3056 = vmatprep.subr.mxu0 %v3568_v0 }
 0x3b7   :  { %v440_v49 = vpop.f32.mrf.mxu0 }
 0x3b8   :  { %v441_v50 = vadd.f32 %v3773_v38, %v440_v49 }
 0x3b9   :  { %v3000_v51 = vpop.f32.mrf.mxu0 }
 0x3ba   :  { %v518_v52 = vadd.f32 %v514_v45, %v441_v50 }
 0x3bc   :  { %v519_v53 = vsub.f32 0.0, %v518_v52 }
 0x3be   :  { %v520_v54 = vmul.f32 1.442695, %v519_v53 }
 0x3bf   :  { %v614_v55 = vpop.f32.mrf.mxu0 }
 0x3c0   :  { %3297 = vpow2.f32 %v520_v54  ;;  %v624_v56 = vadd.f32 %v614_v55, %v3732_v13  ;;  %v618_v1 = vadd.f32 %v614_v55, %v547_v63 }
 0x3c1   :  { %v3022_v57 = vpop.f32.mrf.mxu0 }
 0x3c2   :  { %626 = vrot.lane.b32.xlu0 %v624_v56, %s3571_s4  ;;  %v619_v3 = vsub.f32 0.0, %v618_v1 }
 0x3c4   :  { %v620_v5 = vmul.f32 1.442695, %v619_v3 }
 0x3cd   :  { %v3298_v58 = vpop.eup %3297 }
 0x3ce   :  { %v522_v59 = vadd.f32 1.0, %v3298_v58 }
 0x3d0   :  { %3299 = vrcp.f32 %v522_v59  ;;  %v820_v59 = vld [vmem:[#allocation2 + $0x4] sm:$0x3] }
 0x3d1   :  { %3301 = vpow2.f32 %v620_v5 }
 0x3dd   :  { %v3300_v61 = vpop.eup %3299 }
 0x3de   :  { %v532_v62 = vmul.f32 %v3300_v61, %v530_v60  ;;  %v3302_v6 = vpop.eup %3301  ;;  %v539_v20 = vsub.f32 1.0, %v3300_v61  ;;  %v545_v22 = vmul.f32 0.0, %v3300_v61 }
 0x3df   :  { %v622_v8 = vadd.f32 1.0, %v3302_v6 }
 0x3e0   :  { %534 = vrot.lane.b32.xlu1 %v532_v62, %s3571_s4 }
 0x3e1   :  { %3303 = vrcp.f32 %v622_v8 }
 0x3ee   :  { %v3304_v10 = vpop.eup %3303 }
 0x3ef   :  { %v636_v25 = vsub.f32 1.0, %v3304_v10  ;;  %v642_v27 = vmul.f32 %v3304_v10, %v3788_v43 }
 0x434   :  { %v627_v11 = vpop.permute.xlu0 %626 }
 0x435   :  { %v629_v12 = vmul.f32 %v3304_v10, %v627_v11 }
 0x437   :  { %631 = vrot.lane.b32.xlu0 %v629_v12, %s3571_s4 }
 0x452   :  { %v535_v14 = vpop.permute.xlu1 %534 }
 0x453   :  { %v537_v15 = vadd.f32 %v535_v14, %v441_v50 }
 0x455   :  { %3305 = vtanh.f32 %v537_v15 }
 0x462   :  { %v3306_v16 = vpop.eup %3305 }
 0x463   :  { %541 = vrot.lane.b32.xlu1 %v3306_v16, %s3570_s22 }
 0x4a9   :  { %v632_v17 = vpop.permute.xlu0 %631 }
 0x4aa   :  { %v634_v18 = vadd.f32 %v632_v17, %v547_v63 }
 0x4ac   :  { %3307 = vtanh.f32 %v634_v18 }
 0x4b9   :  { %v3308_v19 = vpop.eup %3307 }
 0x4ba   :  { %638 = vrot.lane.b32.xlu0 %v3308_v19, %s3570_s22 }
 0x4d5   :  { %v542_v21 = vpop.permute.xlu1 %541 }
 0x4d6   :  { %v544_v23 = vmul.f32 %v542_v21, %v539_v20 }
 0x4d8   :  { %v3825_v24 = vadd.f32 %v545_v22, %v544_v23 }
 0x4da   :  { %720 = vrot.lane.b32.xlu1 %v3825_v24, %s3570_s22 }
 0x52c   :  { %v639_v26 = vpop.permute.xlu0 %638 }
 0x52d   :  { %v641_v28 = vmul.f32 %v639_v26, %v636_v25 }
 0x52f   :  { %v3830_v37 = vadd.f32 %v642_v27, %v641_v28 }
 0x531   :  { %645 = vrot.lane.b32.xlu0 %v3830_v37, %s3570_s22 }
 0x54c   :  { %v721_v39 = vpop.permute.xlu1 %720 }
 0x54d   :  { %3043 = vmatmul.mubr.msk.f32.vlgmr.msra.gmra.mxu0 %vm249_vm6, %v721_v39 }
 0x54e   :  { %3057 = vmatpush3.msra.mxu0 %v3742_v31  ;;  %3064 = vmatprep.mubr.msk.f32.mxu0 %vm3569_vm0, %v3568_v0 }
 0x54f   :  { %3058 = vmatprep.subr.mxu0 %v3568_v0 }
 0x550   :  { %3059 = vmatpush3.msra.mxu0 %v3744_v32 }
 0x551   :  { %3060 = vmatprep.subr.mxu0 %v3568_v0 }
 0x552   :  { %3061 = vmatpush3.msra.mxu0 %v3752_v34 }
 0x553   :  { %3062 = vmatprep.subr.mxu0 %v3568_v0 }
 0x554   :  { %3063 = vmatpush3.msra.mxu0 %v3760_v36 }
 0x555   :  { %3078 = vmatprep.subr.mxu0 %v3568_v0 }
 0x5a3   :  { %v646_v40 = vpop.permute.xlu0 %645 }
 0x5a4   :  { %3032 = vmatmul.mubr.msk.f32.vlgmr.msra.gmra.mxu1 %vm249_vm6, %v646_v40 }
 0x5a5   :  { %3046 = vmatpush3.msra.mxu1 %v3697_v2  ;;  %3053 = vmatprep.mubr.msk.f32.mxu1 %vm3569_vm0, %v3568_v0 }
 0x5a6   :  { %3047 = vmatprep.subr.mxu1 %v3568_v0 }
 0x5a7   :  { %3048 = vmatpush3.msra.mxu1 %v3703_v4 }
 0x5a8   :  { %3049 = vmatprep.subr.mxu1 %v3568_v0 }
 0x5a9   :  { %3050 = vmatpush3.msra.mxu1 %v3710_v7 }
 0x5aa   :  { %3051 = vmatprep.subr.mxu1 %v3568_v0 }
 0x5ab   :  { %3052 = vmatpush3.msra.mxu1 %v3719_v9 }
 0x5ac   :  { %3054 = vmatmul.mubr.msk.f32.vlgmr.msra.gmra.mxu1 %vm249_vm6, %v646_v40  ;;  %3067 = vmatprep.subr.mxu1 %v3568_v0 }
 0x5ad   :  { %3068 = vmatpush3.msra.mxu1 %v3737_v29  ;;  %3075 = vmatprep.mubr.msk.f32.mxu1 %vm3569_vm0, %v3568_v0 }
 0x5ae   :  { %3069 = vmatprep.subr.mxu1 %v3568_v0 }
 0x5af   :  { %3070 = vmatpush3.msra.mxu1 %v3739_v30 }
 0x5b0   :  { %3071 = vmatprep.subr.mxu1 %v3568_v0 }
 0x5b1   :  { %3072 = vmatpush3.msra.mxu1 %v3747_v33 }
 0x5b2   :  { %3073 = vmatprep.subr.mxu1 %v3568_v0 }
 0x5b3   :  { %3074 = vmatpush3.msra.mxu1 %v3755_v35 }
 0x5b4   :  { %3089 = vmatprep.subr.mxu1 %v3568_v0 }
 0x60d   :  { %v790_v41 = vpop.f32.mrf.mxu0 }
 0x60e   :  { %v800_v42 = vadd.f32 %v790_v41, %v3792_v44 }
 0x60f   :  { %v3044_v43 = vpop.f32.mrf.mxu0 }
 0x610   :  { %802 = vrot.lane.b32.xlu1 %v800_v42, %s3571_s4 }
 0x664   :  { %v715_v45 = vpop.f32.mrf.mxu1 }
 0x665   :  { %v716_v46 = vadd.f32 %v3773_v38, %v715_v45 }
 0x666   :  { %v3033_v47 = vpop.f32.mrf.mxu1 }
 0x667   :  { %v794_v48 = vadd.f32 %v790_v41, %v716_v46 }
 0x669   :  { %v795_v49 = vsub.f32 0.0, %v794_v48 }
 0x66b   :  { %v796_v50 = vmul.f32 1.442695, %v795_v49 }
 0x66c   :  { %v887_v51 = vpop.f32.mrf.mxu1 }
 0x66d   :  { %3309 = vpow2.f32 %v796_v50  ;;  %v897_v52 = vadd.f32 %v887_v51, %v3732_v13  ;;  %v891_v60 = vadd.f32 %v887_v51, %v820_v59 }
 0x66e   :  { %v3055_v53 = vpop.f32.mrf.mxu1 }
 0x66f   :  { %899 = vrot.lane.b32.xlu0 %v897_v52, %s3571_s4  ;;  %v892_v61 = vsub.f32 0.0, %v891_v60 }
 0x671   :  { %v893_v62 = vmul.f32 1.442695, %v892_v61 }
 0x67a   :  { %v3310_v54 = vpop.eup %3309 }
 0x67b   :  { %v798_v55 = vadd.f32 1.0, %v3310_v54 }
 0x67d   :  { %3311 = vrcp.f32 %v798_v55  ;;  %v1093_v55 = vld [vmem:[#allocation2 + $0x6] sm:$0x3] }
 0x67e   :  { %3313 = vpow2.f32 %v893_v62 }
 0x682   :  { %v803_v57 = vpop.permute.xlu1 %802 }
 0x68a   :  { %v3312_v56 = vpop.eup %3311 }
 0x68b   :  { %v805_v58 = vmul.f32 %v3312_v56, %v803_v57  ;;  %v3314_v63 = vpop.eup %3313  ;;  %v812_v16 = vsub.f32 1.0, %v3312_v56  ;;  %v818_v18 = vmul.f32 %v3312_v56, %v3825_v24 }
 0x68c   :  { %v895_v1 = vadd.f32 1.0, %v3314_v63 }
 0x68d   :  { %807 = vrot.lane.b32.xlu1 %v805_v58, %s3571_s4 }
 0x68e   :  { %3315 = vrcp.f32 %v895_v1 }
 0x69b   :  { %v3316_v3 = vpop.eup %3315 }
 0x69c   :  { %v909_v21 = vsub.f32 1.0, %v3316_v3  ;;  %v915_v23 = vmul.f32 %v3316_v3, %v3830_v37 }
 0x6e1   :  { %v900_v5 = vpop.permute.xlu0 %899 }
 0x6e2   :  { %v902_v6 = vmul.f32 %v3316_v3, %v900_v5 }
 0x6e4   :  { %904 = vrot.lane.b32.xlu0 %v902_v6, %s3571_s4 }
 0x6ff   :  { %v808_v8 = vpop.permute.xlu1 %807 }
 0x700   :  { %v810_v10 = vadd.f32 %v808_v8, %v716_v46 }
 0x702   :  { %3317 = vtanh.f32 %v810_v10 }
 0x70f   :  { %v3318_v11 = vpop.eup %3317 }
 0x710   :  { %814 = vrot.lane.b32.xlu1 %v3318_v11, %s3570_s22 }
 0x756   :  { %v905_v12 = vpop.permute.xlu0 %904 }
 0x757   :  { %v907_v14 = vadd.f32 %v905_v12, %v820_v59 }
 0x759   :  { %3319 = vtanh.f32 %v907_v14 }
 0x766   :  { %v3320_v15 = vpop.eup %3319 }
 0x767   :  { %911 = vrot.lane.b32.xlu0 %v3320_v15, %s3570_s22 }
 0x782   :  { %v815_v17 = vpop.permute.xlu1 %814 }
 0x783   :  { %v817_v19 = vmul.f32 %v815_v17, %v812_v16 }
 0x785   :  { %v3877_v20 = vadd.f32 %v818_v18, %v817_v19 }
 0x787   :  { %993 = vrot.lane.b32.xlu1 %v3877_v20, %s3570_s22 }
 0x7d9   :  { %v912_v22 = vpop.permute.xlu0 %911 }
 0x7da   :  { %v914_v25 = vmul.f32 %v912_v22, %v909_v21 }
 0x7dc   :  { %v3882_v26 = vadd.f32 %v915_v23, %v914_v25 }
 0x7de   :  { %918 = vrot.lane.b32.xlu0 %v3882_v26, %s3570_s22 }
 0x7f9   :  { %v994_v27 = vpop.permute.xlu1 %993 }
 0x7fa   :  { %3076 = vmatmul.mubr.msk.f32.vlgmr.msra.gmra.mxu1 %vm249_vm6, %v994_v27 }
 0x7fb   :  { %3090 = vmatpush3.msra.mxu1 %v3742_v31  ;;  %3097 = vmatprep.mubr.msk.f32.mxu1 %vm3569_vm0, %v3568_v0 }
 0x7fc   :  { %3091 = vmatprep.subr.mxu1 %v3568_v0 }
 0x7fd   :  { %3092 = vmatpush3.msra.mxu1 %v3744_v32 }
 0x7fe   :  { %3093 = vmatprep.subr.mxu1 %v3568_v0 }
 0x7ff   :  { %3094 = vmatpush3.msra.mxu1 %v3752_v34 }
 0x800   :  { %3095 = vmatprep.subr.mxu1 %v3568_v0 }
 0x801   :  { %3096 = vmatpush3.msra.mxu1 %v3760_v36 }
 0x802   :  { %3111 = vmatprep.subr.mxu1 %v3568_v0 }
 0x850   :  { %v919_v24 = vpop.permute.xlu0 %918 }
 0x851   :  { %3065 = vmatmul.mubr.msk.f32.vlgmr.msra.gmra.mxu0 %vm249_vm6, %v919_v24 }
 0x852   :  { %3079 = vmatpush3.msra.mxu0 %v3697_v2  ;;  %3086 = vmatprep.mubr.msk.f32.mxu0 %vm3569_vm0, %v3568_v0 }
 0x853   :  { %3080 = vmatprep.subr.mxu0 %v3568_v0 }
 0x854   :  { %3081 = vmatpush3.msra.mxu0 %v3703_v4 }
 0x855   :  { %3082 = vmatprep.subr.mxu0 %v3568_v0 }
 0x856   :  { %3083 = vmatpush3.msra.mxu0 %v3710_v7 }
 0x857   :  { %3084 = vmatprep.subr.mxu0 %v3568_v0 }
 0x858   :  { %3085 = vmatpush3.msra.mxu0 %v3719_v9 }
 0x859   :  { %3087 = vmatmul.mubr.msk.f32.vlgmr.msra.gmra.mxu0 %vm249_vm6, %v919_v24  ;;  %3100 = vmatprep.subr.mxu0 %v3568_v0 }
 0x85a   :  { %3101 = vmatpush3.msra.mxu0 %v3737_v29  ;;  %3108 = vmatprep.mubr.msk.f32.mxu0 %vm3569_vm0, %v3568_v0 }
 0x85b   :  { %3102 = vmatprep.subr.mxu0 %v3568_v0 }
 0x85c   :  { %3103 = vmatpush3.msra.mxu0 %v3739_v30 }
 0x85d   :  { %3104 = vmatprep.subr.mxu0 %v3568_v0 }
 0x85e   :  { %3105 = vmatpush3.msra.mxu0 %v3747_v33 }
 0x85f   :  { %3106 = vmatprep.subr.mxu0 %v3568_v0 }
 0x860   :  { %3107 = vmatpush3.msra.mxu0 %v3755_v35 }
 0x861   :  { %3122 = vmatprep.subr.mxu0 %v3568_v0 }
 0x8ba   :  { %v1063_v28 = vpop.f32.mrf.mxu1 }
 0x8bb   :  { %v1073_v37 = vadd.f32 %v1063_v28, %v3792_v44 }
 0x8bc   :  { %v3077_v39 = vpop.f32.mrf.mxu1 }
 0x8bd   :  { %1075 = vrot.lane.b32.xlu1 %v1073_v37, %s3571_s4 }
 0x911   :  { %v988_v40 = vpop.f32.mrf.mxu0 }
 0x912   :  { %v989_v41 = vadd.f32 %v3773_v38, %v988_v40 }
 0x913   :  { %v3066_v42 = vpop.f32.mrf.mxu0 }
 0x914   :  { %v1067_v43 = vadd.f32 %v1063_v28, %v989_v41 }
 0x916   :  { %v1068_v45 = vsub.f32 0.0, %v1067_v43 }
 0x918   :  { %v1069_v46 = vmul.f32 1.442695, %v1068_v45 }
 0x919   :  { %v1160_v47 = vpop.f32.mrf.mxu0 }
 0x91a   :  { %3321 = vpow2.f32 %v1069_v46  ;;  %v1170_v48 = vadd.f32 %v1160_v47, %v3732_v13  ;;  %v1164_v56 = vadd.f32 %v1160_v47, %v1093_v55 }
 0x91b   :  { %v3088_v49 = vpop.f32.mrf.mxu0 }
 0x91c   :  { %1172 = vrot.lane.b32.xlu0 %v1170_v48, %s3571_s4  ;;  %v1165_v57 = vsub.f32 0.0, %v1164_v56 }
 0x91e   :  { %v1166_v58 = vmul.f32 1.442695, %v1165_v57 }
 0x927   :  { %v3322_v50 = vpop.eup %3321 }
 0x928   :  { %v1071_v51 = vadd.f32 1.0, %v3322_v50 }
 0x92a   :  { %3323 = vrcp.f32 %v1071_v51  ;;  %v1366_v51 = vld [vmem:[#allocation2 + $0x8] sm:$0x3] }
 0x92b   :  { %3325 = vpow2.f32 %v1166_v58 }
 0x92f   :  { %v1076_v53 = vpop.permute.xlu1 %1075 }
 0x937   :  { %v3324_v52 = vpop.eup %3323 }
 0x938   :  { %v1078_v54 = vmul.f32 %v3324_v52, %v1076_v53  ;;  %v3326_v59 = vpop.eup %3325  ;;  %v1085_v11 = vsub.f32 1.0, %v3324_v52  ;;  %v1091_v14 = vmul.f32 %v3324_v52, %v3877_v20 }
 0x939   :  { %v1168_v60 = vadd.f32 1.0, %v3326_v59 }
 0x93a   :  { %1080 = vrot.lane.b32.xlu1 %v1078_v54, %s3571_s4 }
 0x93b   :  { %3327 = vrcp.f32 %v1168_v60 }
 0x948   :  { %v3328_v61 = vpop.eup %3327 }
 0x949   :  { %v1182_v17 = vsub.f32 1.0, %v3328_v61  ;;  %v1188_v19 = vmul.f32 %v3328_v61, %v3882_v26 }
 0x98e   :  { %v1173_v62 = vpop.permute.xlu0 %1172 }
 0x98f   :  { %v1175_v63 = vmul.f32 %v3328_v61, %v1173_v62 }
 0x991   :  { %1177 = vrot.lane.b32.xlu0 %v1175_v63, %s3571_s4 }
 0x9ac   :  { %v1081_v1 = vpop.permute.xlu1 %1080 }
 0x9ad   :  { %v1083_v3 = vadd.f32 %v1081_v1, %v989_v41 }
 0x9af   :  { %3329 = vtanh.f32 %v1083_v3 }
 0x9bc   :  { %v3330_v5 = vpop.eup %3329 }
 0x9bd   :  { %1087 = vrot.lane.b32.xlu1 %v3330_v5, %s3570_s22 }
 0xa03   :  { %v1178_v6 = vpop.permute.xlu0 %1177 }
 0xa04   :  { %v1180_v8 = vadd.f32 %v1178_v6, %v1093_v55 }
 0xa06   :  { %3331 = vtanh.f32 %v1180_v8 }
 0xa13   :  { %v3332_v10 = vpop.eup %3331 }
 0xa14   :  { %1184 = vrot.lane.b32.xlu0 %v3332_v10, %s3570_s22 }
 0xa2f   :  { %v1088_v12 = vpop.permute.xlu1 %1087 }
 0xa30   :  { %v1090_v15 = vmul.f32 %v1088_v12, %v1085_v11 }
 0xa32   :  { %v3929_v16 = vadd.f32 %v1091_v14, %v1090_v15 }
 0xa34   :  { %1266 = vrot.lane.b32.xlu1 %v3929_v16, %s3570_s22 }
 0xa86   :  { %v1185_v18 = vpop.permute.xlu0 %1184 }
 0xa87   :  { %v1187_v21 = vmul.f32 %v1185_v18, %v1182_v17 }
 0xa89   :  { %v3934_v22 = vadd.f32 %v1188_v19, %v1187_v21 }
 0xa8b   :  { %1191 = vrot.lane.b32.xlu0 %v3934_v22, %s3570_s22 }
 0xaa6   :  { %v1267_v23 = vpop.permute.xlu1 %1266 }
 0xaa7   :  { %3109 = vmatmul.mubr.msk.f32.vlgmr.msra.gmra.mxu0 %vm249_vm6, %v1267_v23 }
 0xaa8   :  { %3123 = vmatpush3.msra.mxu0 %v3742_v31  ;;  %3130 = vmatprep.mubr.msk.f32.mxu0 %vm3569_vm0, %v3568_v0 }
 0xaa9   :  { %3124 = vmatprep.subr.mxu0 %v3568_v0 }
 0xaaa   :  { %3125 = vmatpush3.msra.mxu0 %v3744_v32 }
 0xaab   :  { %3126 = vmatprep.subr.mxu0 %v3568_v0 }
 0xaac   :  { %3127 = vmatpush3.msra.mxu0 %v3752_v34 }
 0xaad   :  { %3128 = vmatprep.subr.mxu0 %v3568_v0 }
 0xaae   :  { %3129 = vmatpush3.msra.mxu0 %v3760_v36 }
 0xaaf   :  { %3144 = vmatprep.subr.mxu0 %v3568_v0 }
 0xafd   :  { %v1192_v20 = vpop.permute.xlu0 %1191 }
 0xafe   :  { %3098 = vmatmul.mubr.msk.f32.vlgmr.msra.gmra.mxu1 %vm249_vm6, %v1192_v20 }
 0xaff   :  { %3112 = vmatpush3.msra.mxu1 %v3697_v2  ;;  %3119 = vmatprep.mubr.msk.f32.mxu1 %vm3569_vm0, %v3568_v0 }
 0xb00   :  { %3113 = vmatprep.subr.mxu1 %v3568_v0 }
 0xb01   :  { %3114 = vmatpush3.msra.mxu1 %v3703_v4 }
 0xb02   :  { %3115 = vmatprep.subr.mxu1 %v3568_v0 }
 0xb03   :  { %3116 = vmatpush3.msra.mxu1 %v3710_v7 }
 0xb04   :  { %3117 = vmatprep.subr.mxu1 %v3568_v0 }
 0xb05   :  { %3118 = vmatpush3.msra.mxu1 %v3719_v9 }
 0xb06   :  { %3120 = vmatmul.mubr.msk.f32.vlgmr.msra.gmra.mxu1 %vm249_vm6, %v1192_v20  ;;  %3133 = vmatprep.subr.mxu1 %v3568_v0 }
 0xb07   :  { %3134 = vmatpush3.msra.mxu1 %v3737_v29  ;;  %3141 = vmatprep.mubr.msk.f32.mxu1 %vm3569_vm0, %v3568_v0 }
 0xb08   :  { %3135 = vmatprep.subr.mxu1 %v3568_v0 }
 0xb09   :  { %3136 = vmatpush3.msra.mxu1 %v3739_v30 }
 0xb0a   :  { %3137 = vmatprep.subr.mxu1 %v3568_v0 }
 0xb0b   :  { %3138 = vmatpush3.msra.mxu1 %v3747_v33 }
 0xb0c   :  { %3139 = vmatprep.subr.mxu1 %v3568_v0 }
 0xb0d   :  { %3140 = vmatpush3.msra.mxu1 %v3755_v35 }
 0xb0e   :  { %3155 = vmatprep.subr.mxu1 %v3568_v0 }
 0xb67   :  { %v1336_v25 = vpop.f32.mrf.mxu0 }
 0xb68   :  { %v1346_v26 = vadd.f32 %v1336_v25, %v3792_v44 }
 0xb69   :  { %v3110_v27 = vpop.f32.mrf.mxu0 }
 0xb6a   :  { %1348 = vrot.lane.b32.xlu0 %v1346_v26, %s3571_s4 }
 0xbbe   :  { %v1261_v24 = vpop.f32.mrf.mxu1 }
 0xbbf   :  { %v1262_v28 = vadd.f32 %v3773_v38, %v1261_v24 }
 0xbc0   :  { %v3099_v37 = vpop.f32.mrf.mxu1 }
 0xbc1   :  { %v1340_v39 = vadd.f32 %v1336_v25, %v1262_v28 }
 0xbc3   :  { %v1341_v40 = vsub.f32 0.0, %v1340_v39 }
 0xbc5   :  { %v1342_v41 = vmul.f32 1.442695, %v1341_v40 }
 0xbc6   :  { %v1433_v42 = vpop.f32.mrf.mxu1 }
 0xbc7   :  { %3333 = vpow2.f32 %v1342_v41  ;;  %v1443_v43 = vadd.f32 %v1433_v42, %v3732_v13  ;;  %v1437_v52 = vadd.f32 %v1433_v42, %v1366_v51  ;;  %v1639_v42 = vld [vmem:[#allocation2 + $0xa] sm:$0x3] }
 0xbc8   :  { %v3121_v45 = vpop.f32.mrf.mxu1 }
 0xbc9   :  { %1445 = vrot.lane.b32.xlu1 %v1443_v43, %s3571_s4  ;;  %v1438_v53 = vsub.f32 0.0, %v1437_v52 }
 0xbcb   :  { %v1439_v54 = vmul.f32 1.442695, %v1438_v53 }
 0xbd4   :  { %v3334_v46 = vpop.eup %3333 }
 0xbd5   :  { %v1344_v47 = vadd.f32 1.0, %v3334_v46 }
 0xbd7   :  { %3335 = vrcp.f32 %v1344_v47 }
 0xbd8   :  { %3337 = vpow2.f32 %v1439_v54 }
 0xbdc   :  { %v1349_v49 = vpop.permute.xlu0 %1348 }
 0xbe4   :  { %v3336_v48 = vpop.eup %3335 }
 0xbe5   :  { %v1351_v50 = vmul.f32 %v3336_v48, %v1349_v49  ;;  %v3338_v55 = vpop.eup %3337  ;;  %v1358_v5 = vsub.f32 1.0, %v3336_v48  ;;  %v1364_v8 = vmul.f32 %v3336_v48, %v3929_v16 }
 0xbe6   :  { %v1441_v56 = vadd.f32 1.0, %v3338_v55 }
 0xbe7   :  { %1353 = vrot.lane.b32.xlu0 %v1351_v50, %s3571_s4 }
 0xbe8   :  { %3339 = vrcp.f32 %v1441_v56 }
 0xbf5   :  { %v3340_v57 = vpop.eup %3339 }
 0xbf6   :  { %v1455_v12 = vsub.f32 1.0, %v3340_v57  ;;  %v1461_v15 = vmul.f32 %v3340_v57, %v3934_v22 }
 0xc3b   :  { %v1446_v58 = vpop.permute.xlu1 %1445 }
 0xc3c   :  { %v1448_v59 = vmul.f32 %v3340_v57, %v1446_v58 }
 0xc3e   :  { %1450 = vrot.lane.b32.xlu1 %v1448_v59, %s3571_s4 }
 0xc59   :  { %v1354_v60 = vpop.permute.xlu0 %1353 }
 0xc5a   :  { %v1356_v61 = vadd.f32 %v1354_v60, %v1262_v28 }
 0xc5c   :  { %3341 = vtanh.f32 %v1356_v61 }
 0xc69   :  { %v3342_v62 = vpop.eup %3341 }
 0xc6a   :  { %1360 = vrot.lane.b32.xlu0 %v3342_v62, %s3570_s22 }
 0xcb0   :  { %v1451_v63 = vpop.permute.xlu1 %1450 }
 0xcb1   :  { %v1453_v1 = vadd.f32 %v1451_v63, %v1366_v51 }
 0xcb3   :  { %3343 = vtanh.f32 %v1453_v1 }
 0xcc0   :  { %v3344_v3 = vpop.eup %3343 }
 0xcc1   :  { %1457 = vrot.lane.b32.xlu1 %v3344_v3, %s3570_s22 }
 0xcdc   :  { %v1361_v6 = vpop.permute.xlu0 %1360 }
 0xcdd   :  { %v1363_v10 = vmul.f32 %v1361_v6, %v1358_v5 }
 0xcdf   :  { %v3981_v11 = vadd.f32 %v1364_v8, %v1363_v10 }
 0xce1   :  { %1539 = vrot.lane.b32.xlu0 %v3981_v11, %s3570_s22 }
 0xd33   :  { %v1458_v14 = vpop.permute.xlu1 %1457 }
 0xd34   :  { %v1460_v17 = vmul.f32 %v1458_v14, %v1455_v12 }
 0xd36   :  { %v3986_v18 = vadd.f32 %v1461_v15, %v1460_v17 }
 0xd38   :  { %1464 = vrot.lane.b32.xlu1 %v3986_v18, %s3570_s22 }
 0xd53   :  { %v1540_v19 = vpop.permute.xlu0 %1539 }
 0xd54   :  { %3142 = vmatmul.mubr.msk.f32.vlgmr.msra.gmra.mxu1 %vm249_vm6, %v1540_v19 }
 0xd55   :  { %3156 = vmatpush3.msra.mxu1 %v3742_v31  ;;  %3163 = vmatprep.mubr.msk.f32.mxu1 %vm3569_vm0, %v3568_v0 }
 0xd56   :  { %3157 = vmatprep.subr.mxu1 %v3568_v0 }
 0xd57   :  { %3158 = vmatpush3.msra.mxu1 %v3744_v32 }
 0xd58   :  { %3159 = vmatprep.subr.mxu1 %v3568_v0 }
 0xd59   :  { %3160 = vmatpush3.msra.mxu1 %v3752_v34 }
 0xd5a   :  { %3161 = vmatprep.subr.mxu1 %v3568_v0 }
 0xd5b   :  { %3162 = vmatpush3.msra.mxu1 %v3760_v36 }
 0xd5c   :  { %3177 = vmatprep.subr.mxu1 %v3568_v0 }
 0xdaa   :  { %v1465_v16 = vpop.permute.xlu1 %1464 }
 0xdab   :  { %3131 = vmatmul.mubr.msk.f32.vlgmr.msra.gmra.mxu0 %vm249_vm6, %v1465_v16 }
 0xdac   :  { %3145 = vmatpush3.msra.mxu0 %v3697_v2  ;;  %3152 = vmatprep.mubr.msk.f32.mxu0 %vm3569_vm0, %v3568_v0 }
 0xdad   :  { %3146 = vmatprep.subr.mxu0 %v3568_v0 }
 0xdae   :  { %3147 = vmatpush3.msra.mxu0 %v3703_v4 }
 0xdaf   :  { %3148 = vmatprep.subr.mxu0 %v3568_v0 }
 0xdb0   :  { %3149 = vmatpush3.msra.mxu0 %v3710_v7 }
 0xdb1   :  { %3150 = vmatprep.subr.mxu0 %v3568_v0 }
 0xdb2   :  { %3151 = vmatpush3.msra.mxu0 %v3719_v9 }
 0xdb3   :  { %3153 = vmatmul.mubr.msk.f32.vlgmr.msra.gmra.mxu0 %vm249_vm6, %v1465_v16  ;;  %3166 = vmatprep.subr.mxu0 %v3568_v0 }
 0xdb4   :  { %3167 = vmatpush3.msra.mxu0 %v3737_v29  ;;  %3174 = vmatprep.mubr.msk.f32.mxu0 %vm3569_vm0, %v3568_v0 }
 0xdb5   :  { %3168 = vmatprep.subr.mxu0 %v3568_v0 }
 0xdb6   :  { %3169 = vmatpush3.msra.mxu0 %v3739_v30 }
 0xdb7   :  { %3170 = vmatprep.subr.mxu0 %v3568_v0 }
 0xdb8   :  { %3171 = vmatpush3.msra.mxu0 %v3747_v33 }
 0xdb9   :  { %3172 = vmatprep.subr.mxu0 %v3568_v0 }
 0xdba   :  { %3173 = vmatpush3.msra.mxu0 %v3755_v35 }
 0xdbb   :  { %3188 = vmatprep.subr.mxu0 %v3568_v0 }
 0xe14   :  { %v1609_v2 = vpop.f32.mrf.mxu1 }
 0xe15   :  { %v1619_v4 = vadd.f32 %v1609_v2, %v3792_v44 }
 0xe16   :  { %v3143_v7 = vpop.f32.mrf.mxu1 }
 0xe17   :  { %1621 = vrot.lane.b32.xlu0 %v1619_v4, %s3571_s4 }
 0xe6b   :  { %v1534_v9 = vpop.f32.mrf.mxu0 }
 0xe6c   :  { %v1535_v21 = vadd.f32 %v3773_v38, %v1534_v9 }
 0xe6d   :  { %v3132_v22 = vpop.f32.mrf.mxu0 }
 0xe6e   :  { %v1613_v23 = vadd.f32 %v1609_v2, %v1535_v21 }
 0xe70   :  { %v1614_v20 = vsub.f32 0.0, %v1613_v23 }
 0xe72   :  { %v1615_v25 = vmul.f32 1.442695, %v1614_v20 }
 0xe73   :  { %v1706_v26 = vpop.f32.mrf.mxu0 }
 0xe74   :  { %3345 = vpow2.f32 %v1615_v25  ;;  %v1716_v27 = vadd.f32 %v1706_v26, %v3732_v13  ;;  %v1710_v43 = vadd.f32 %v1706_v26, %v1639_v42 }
 0xe75   :  { %v3154_v24 = vpop.f32.mrf.mxu0 }
 0xe76   :  { %1718 = vrot.lane.b32.xlu1 %v1716_v27, %s3571_s4  ;;  %v1711_v45 = vsub.f32 0.0, %v1710_v43 }
 0xe78   :  { %v1712_v46 = vmul.f32 1.442695, %v1711_v45 }
 0xe81   :  { %v3346_v28 = vpop.eup %3345 }
 0xe82   :  { %v1617_v37 = vadd.f32 1.0, %v3346_v28 }
 0xe84   :  { %3347 = vrcp.f32 %v1617_v37 }
 0xe85   :  { %3349 = vpow2.f32 %v1712_v46 }
 0xe89   :  { %v1622_v40 = vpop.permute.xlu0 %1621 }
 0xe91   :  { %v3348_v39 = vpop.eup %3347 }
 0xe92   :  { %v1624_v41 = vmul.f32 %v3348_v39, %v1622_v40  ;;  %v3350_v47 = vpop.eup %3349  ;;  %v1631_v58 = vsub.f32 1.0, %v3348_v39  ;;  %v1637_v60 = vmul.f32 %v3348_v39, %v3981_v11 }
 0xe93   :  { %v1714_v48 = vadd.f32 1.0, %v3350_v47 }
 0xe94   :  { %1626 = vrot.lane.b32.xlu0 %v1624_v41, %s3571_s4 }
 0xe95   :  { %3351 = vrcp.f32 %v1714_v48 }
 0xea2   :  { %v3352_v49 = vpop.eup %3351 }
 0xea3   :  { %v1728_v63 = vsub.f32 1.0, %v3352_v49  ;;  %v1734_v3 = vmul.f32 %v3352_v49, %v3986_v18 }
 0xee8   :  { %v1719_v50 = vpop.permute.xlu1 %1718 }
 0xee9   :  { %v1721_v51 = vmul.f32 %v3352_v49, %v1719_v50 }
 0xeeb   :  { %1723 = vrot.lane.b32.xlu1 %v1721_v51, %s3571_s4 }
 0xf06   :  { %v1627_v52 = vpop.permute.xlu0 %1626 }
 0xf07   :  { %v1629_v53 = vadd.f32 %v1627_v52, %v1535_v21 }
 0xf09   :  { %3353 = vtanh.f32 %v1629_v53 }
 0xf16   :  { %v3354_v54 = vpop.eup %3353 }
 0xf17   :  { %1633 = vrot.lane.b32.xlu0 %v3354_v54, %s3570_s22 }
 0xf5d   :  { %v1724_v55 = vpop.permute.xlu1 %1723 }
 0xf5e   :  { %v1726_v56 = vadd.f32 %v1724_v55, %v1639_v42 }
 0xf60   :  { %3355 = vtanh.f32 %v1726_v56  ;;  %v3401_v56 = vld [vmem:[#allocation8 + $0x18] sm:$0xff] }
 0xf6d   :  { %v3356_v57 = vpop.eup %3355 }
 0xf6e   :  { %1730 = vrot.lane.b32.xlu1 %v3356_v57, %s3570_s22  ;;  %v3402_v57 = vld [vmem:[#allocation8 + $0x10] sm:$0xff] }
 0xf89   :  { %v1634_v59 = vpop.permute.xlu0 %1633 }
 0xf8a   :  { %v1636_v61 = vmul.f32 %v1634_v59, %v1631_v58  ;;  %v3403_v58 = vld [vmem:[#allocation8 + $0x8] sm:$0xff]  ;;  %v3404_v59 = vld [vmem:[#allocation8] sm:$0xff] }
 0xf8c   :  { %v4033_v62 = vadd.f32 %v1637_v60, %v1636_v61  ;;  %v3405_v61 = vld [vmem:[#allocation9 + $0x18] sm:$0xff] }
 0xf8e   :  { %1812 = vrot.lane.b32.xlu0 %v4033_v62, %s3570_s22 }
 0xfe0   :  { %v1731_v1 = vpop.permute.xlu1 %1730 }
 0xfe1   :  { %v1733_v5 = vmul.f32 %v1731_v1, %v1728_v63  ;;  %v3407_v63 = vld [vmem:[#allocation9 + $0x8] sm:$0xff]  ;;  %v3408_v1 = vld [vmem:[#allocation9] sm:$0xff] }
 0xfe3   :  { %v4038_v6 = vadd.f32 %v1734_v3, %v1733_v5 }
 0xfe5   :  { %1737 = vrot.lane.b32.xlu1 %v4038_v6, %s3570_s22 }
0x1000   :  { %v1813_v8 = vpop.permute.xlu0 %1812 }
0x1001   :  { %3175 = vmatmul.mubr.msk.f32.vlgmr.msra.gmra.mxu0 %vm249_vm6, %v1813_v8 }
0x1002   :  { %3189 = vmatpush3.msra.mxu0 %v3742_v31  ;;  %3196 = vmatprep.mubr.msk.f32.mxu0 %vm3569_vm0, %v3568_v0  ;;  %v4057_v31 = vld [vmem:[%s4220_s3 + $0x18] sm:$0xff] }
0x1003   :  { %3190 = vmatprep.subr.mxu0 %v3568_v0 }
0x1004   :  { %3191 = vmatpush3.msra.mxu0 %v3744_v32  ;;  %v4066_v32 = vld [vmem:[%s4220_s3 + $0x10] sm:$0xff] }
0x1005   :  { %3192 = vmatprep.subr.mxu0 %v3568_v0 }
0x1006   :  { %3193 = vmatpush3.msra.mxu0 %v3752_v34  ;;  %v4073_v34 = vld [vmem:[%s4220_s3 + $0x8] sm:$0xff] }
0x1007   :  { %3194 = vmatprep.subr.mxu0 %v3568_v0 }
0x1008   :  { %3195 = vmatpush3.msra.mxu0 %v3760_v36  ;;  %v4080_v36 = vld [vmem:[%s4220_s3] sm:$0xff] }
0x1009   :  { %3210 = vmatprep.subr.mxu0 %v3568_v0 }
0x1057   :  { %v1738_v10 = vpop.permute.xlu1 %1737 }
0x1058   :  { %3164 = vmatmul.mubr.msk.f32.vlgmr.msra.gmra.mxu1 %vm249_vm6, %v1738_v10 }
0x1059   :  { %3178 = vmatpush3.msra.mxu1 %v4057_v31  ;;  %3185 = vmatprep.mubr.msk.f32.mxu1 %vm3569_vm0, %v3568_v0 }
0x105a   :  { %3179 = vmatprep.subr.mxu1 %v3568_v0 }
0x105b   :  { %3180 = vmatpush3.msra.mxu1 %v4066_v32 }
0x105c   :  { %3181 = vmatprep.subr.mxu1 %v3568_v0 }
0x105d   :  { %3182 = vmatpush3.msra.mxu1 %v4073_v34 }
0x105e   :  { %3183 = vmatprep.subr.mxu1 %v3568_v0 }
0x105f   :  { %3184 = vmatpush3.msra.mxu1 %v4080_v36 }
0x1060   :  { %3186 = vmatmul.mubr.msk.f32.vlgmr.msra.gmra.mxu1 %vm249_vm6, %v1738_v10  ;;  %3199 = vmatprep.subr.mxu1 %v3568_v0  ;;  %v4144_v10 = vld [vmem:[%s4224_s7] ss:$0 sm:$0xff] }
0x1061   :  { %3200 = vmatpush3.msra.mxu1 %v3737_v29  ;;  %3207 = vmatprep.mubr.msk.f32.mxu1 %vm3569_vm0, %v3568_v0 }
0x1062   :  { %3201 = vmatprep.subr.mxu1 %v3568_v0 }
0x1063   :  { %3202 = vmatpush3.msra.mxu1 %v3739_v30 }
0x1064   :  { %3203 = vmatprep.subr.mxu1 %v3568_v0 }
0x1065   :  { %3204 = vmatpush3.msra.mxu1 %v3747_v33 }
0x1066   :  { %3205 = vmatprep.subr.mxu1 %v3568_v0 }
0x1067   :  { %3206 = vmatpush3.msra.mxu1 %v3755_v35 }
0x1068   :  { %3221 = vmatprep.subr.mxu1 %v3568_v0 }
0x10c1   :  { %v1882_v11 = vpop.f32.mrf.mxu0 }
0x10c2   :  { %v1892_v29 = vadd.f32 %v1882_v11, %v3792_v44 }
0x10c3   :  { %v3176_v12 = vpop.f32.mrf.mxu0 }
0x10c4   :  { %1894 = vrot.lane.b32.xlu0 %v1892_v29, %s3571_s4 }
0x1118   :  { %v1807_v14 = vpop.f32.mrf.mxu1 }
0x1119   :  { %v1808_v15 = vadd.f32 %v3773_v38, %v1807_v14  ;;  %v1912_v38 = vld [vmem:[#allocation2 + $0xc] sm:$0x3] }
0x111a   :  { %v3165_v30 = vpop.f32.mrf.mxu1 }
0x111b   :  { %v1886_v17 = vadd.f32 %v1882_v11, %v1808_v15 }
0x111d   :  { %v1887_v18 = vsub.f32 0.0, %v1886_v17 }
0x111f   :  { %v1888_v19 = vmul.f32 1.442695, %v1887_v18 }
0x1120   :  { %v1979_v33 = vpop.f32.mrf.mxu1 }
0x1121   :  { %3357 = vpow2.f32 %v1888_v19  ;;  %v1989_v16 = vadd.f32 %v1979_v33, %v3732_v13  ;;  %v1983_v22 = vadd.f32 %v1979_v33, %v1912_v38  ;;  %v2185_v33 = vld [vmem:[#allocation2 + $0xe] sm:$0x3] }
0x1122   :  { %v3187_v35 = vpop.f32.mrf.mxu1 }
0x1123   :  { %1991 = vrot.lane.b32.xlu1 %v1989_v16, %s3571_s4  ;;  %v1984_v23 = vsub.f32 0.0, %v1983_v22 }
0x1125   :  { %v1985_v20 = vmul.f32 1.442695, %v1984_v23 }
0x112e   :  { %v3358_v2 = vpop.eup %3357 }
0x112f   :  { %v1890_v4 = vadd.f32 1.0, %v3358_v2 }
0x1131   :  { %3359 = vrcp.f32 %v1890_v4 }
0x1132   :  { %3361 = vpow2.f32 %v1985_v20 }
0x1136   :  { %v1895_v9 = vpop.permute.xlu0 %1894 }
0x113e   :  { %v3360_v7 = vpop.eup %3359 }
0x113f   :  { %v1897_v21 = vmul.f32 %v3360_v7, %v1895_v9  ;;  %v3362_v25 = vpop.eup %3361  ;;  %v1904_v45 = vsub.f32 1.0, %v3360_v7  ;;  %v1910_v47 = vmul.f32 %v3360_v7, %v4033_v62  ;;  %v3406_v62 = vld [vmem:[#allocation9 + $0x10] sm:$0xff] }
0x1140   :  { %v1987_v26 = vadd.f32 1.0, %v3362_v25 }
0x1141   :  { %1899 = vrot.lane.b32.xlu0 %v1897_v21, %s3571_s4 }
0x1142   :  { %3363 = vrcp.f32 %v1987_v26 }
0x114f   :  { %v3364_v27 = vpop.eup %3363 }
0x1150   :  { %v2001_v50 = vsub.f32 1.0, %v3364_v27  ;;  %v2007_v52 = vmul.f32 %v3364_v27, %v4038_v6 }
0x1195   :  { %v1992_v24 = vpop.permute.xlu1 %1991 }
0x1196   :  { %v1994_v28 = vmul.f32 %v3364_v27, %v1992_v24 }
0x1198   :  { %1996 = vrot.lane.b32.xlu1 %v1994_v28, %s3571_s4 }
0x11b3   :  { %v1900_v37 = vpop.permute.xlu0 %1899 }
0x11b4   :  { %v1902_v39 = vadd.f32 %v1900_v37, %v1808_v15 }
0x11b6   :  { %3365 = vtanh.f32 %v1902_v39 }
0x11c3   :  { %v3366_v40 = vpop.eup %3365 }
0x11c4   :  { %1906 = vrot.lane.b32.xlu0 %v3366_v40, %s3570_s22 }
0x120a   :  { %v1997_v41 = vpop.permute.xlu1 %1996 }
0x120b   :  { %v1999_v42 = vadd.f32 %v1997_v41, %v1912_v38 }
0x120d   :  { %3367 = vtanh.f32 %v1999_v42 }
0x121a   :  { %v3368_v43 = vpop.eup %3367 }
0x121b   :  { %2003 = vrot.lane.b32.xlu1 %v3368_v43, %s3570_s22 }
0x1236   :  { %v1907_v46 = vpop.permute.xlu0 %1906 }
0x1237   :  { %v1909_v48 = vmul.f32 %v1907_v46, %v1904_v45 }
0x1239   :  { %v4105_v49 = vadd.f32 %v1910_v47, %v1909_v48 }
0x123b   :  { %2085 = vrot.lane.b32.xlu0 %v4105_v49, %s3570_s22 }
0x128d   :  { %v2004_v51 = vpop.permute.xlu1 %2003 }
0x128e   :  { %v2006_v53 = vmul.f32 %v2004_v51, %v2001_v50 }
0x1290   :  { %v4110_v54 = vadd.f32 %v2007_v52, %v2006_v53 }
0x1292   :  { %2010 = vrot.lane.b32.xlu1 %v4110_v54, %s3570_s22 }
0x12ad   :  { %v2086_v55 = vpop.permute.xlu0 %2085 }
0x12ae   :  { %3208 = vmatmul.mubr.msk.f32.vlgmr.msra.gmra.mxu1 %vm249_vm6, %v2086_v55 }
0x12af   :  { %3222 = vmatpush3.msra.mxu1 %v3401_v56  ;;  %3229 = vmatprep.mubr.msk.f32.mxu1 %vm3569_vm0, %v3568_v0 }
0x12b0   :  { %3223 = vmatprep.subr.mxu1 %v3568_v0 }
0x12b1   :  { %3224 = vmatpush3.msra.mxu1 %v3402_v57 }
0x12b2   :  { %3225 = vmatprep.subr.mxu1 %v3568_v0 }
0x12b3   :  { %3226 = vmatpush3.msra.mxu1 %v3403_v58 }
0x12b4   :  { %3227 = vmatprep.subr.mxu1 %v3568_v0 }
0x12b5   :  { %3228 = vmatpush3.msra.mxu1 %v3404_v59 }
0x12b6   :  { %3243 = vmatprep.subr.mxu1 %v3568_v0 }
0x1304   :  { %v2011_v60 = vpop.permute.xlu1 %2010 }
0x1305   :  { %3197 = vmatmul.mubr.msk.f32.vlgmr.msra.gmra.mxu0 %vm249_vm6, %v2011_v60 }
0x1306   :  { %3211 = vmatpush3.msra.mxu0 %v4057_v31  ;;  %3218 = vmatprep.mubr.msk.f32.mxu0 %vm3569_vm0, %v3568_v0 }
0x1307   :  { %3212 = vmatprep.subr.mxu0 %v3568_v0 }
0x1308   :  { %3213 = vmatpush3.msra.mxu0 %v4066_v32 }
0x1309   :  { %3214 = vmatprep.subr.mxu0 %v3568_v0 }
0x130a   :  { %3215 = vmatpush3.msra.mxu0 %v4073_v34 }
0x130b   :  { %3216 = vmatprep.subr.mxu0 %v3568_v0 }
0x130c   :  { %3217 = vmatpush3.msra.mxu0 %v4080_v36 }
0x130d   :  { %3219 = vmatmul.mubr.msk.f32.vlgmr.msra.gmra.mxu0 %vm249_vm6, %v2011_v60  ;;  %3232 = vmatprep.subr.mxu0 %v3568_v0 }
0x130e   :  { %3233 = vmatpush3.msra.mxu0 %v3405_v61  ;;  %3240 = vmatprep.mubr.msk.f32.mxu0 %vm3569_vm0, %v3568_v0 }
0x130f   :  { %3234 = vmatprep.subr.mxu0 %v3568_v0 }
0x1310   :  { %3235 = vmatpush3.msra.mxu0 %v3406_v62 }
0x1311   :  { %3236 = vmatprep.subr.mxu0 %v3568_v0 }
0x1312   :  { %3237 = vmatpush3.msra.mxu0 %v3407_v63  ;;  %v2461_v63 = vld [vmem:[#allocation11 + $0x18] sm:$0xff] }
0x1313   :  { %3238 = vmatprep.subr.mxu0 %v3568_v0 }
0x1314   :  { %3239 = vmatpush3.msra.mxu0 %v3408_v1  ;;  %v2460_v1 = vld [vmem:[#allocation11 + $0x10] sm:$0xff] }
0x1315   :  { %3254 = vmatprep.subr.mxu0 %v3568_v0 }
0x136e   :  { %v2155_v3 = vpop.f32.mrf.mxu1 }
0x136f   :  { %v2165_v5 = vadd.f32 %v2155_v3, %v3792_v44 }
0x1370   :  { %v3209_v6 = vpop.f32.mrf.mxu1 }
0x1371   :  { %2167 = vrot.lane.b32.xlu0 %v2165_v5, %s3571_s4  ;;  %v2458_v5 = vld [vmem:[#allocation11] sm:$0xff] }
0x13c5   :  { %v2080_v8 = vpop.f32.mrf.mxu0 }
0x13c6   :  { %v2081_v31 = vadd.f32 %v4144_v10, %v2080_v8  ;;  %v2548_v8 = vld [vmem:[#allocation12 + $0x18] sm:$0xff] }
0x13c7   :  { %v3198_v32 = vpop.f32.mrf.mxu0 }
0x13c8   :  { %v2159_v34 = vadd.f32 %v2155_v3, %v2081_v31  ;;  %v2459_v3 = vld [vmem:[#allocation11 + $0x8] sm:$0xff] }
0x13ca   :  { %v2160_v36 = vsub.f32 0.0, %v2159_v34 }
0x13cc   :  { %v2161_v11 = vmul.f32 1.442695, %v2160_v36 }
0x13cd   :  { %v2252_v29 = vpop.f32.mrf.mxu0 }
0x13ce   :  { %3369 = vpow2.f32 %v2161_v11  ;;  %v2262_v12 = vadd.f32 %v2252_v29, %v3732_v13  ;;  %v2256_v16 = vadd.f32 %v2252_v29, %v2185_v33  ;;  %v2547_v29 = vld [vmem:[#allocation12 + $0x10] sm:$0xff] }
0x13cf   :  { %v3220_v14 = vpop.f32.mrf.mxu0 }
0x13d0   :  { %2264 = vrot.lane.b32.xlu1 %v2262_v12, %s3571_s4  ;;  %v2257_v35 = vsub.f32 0.0, %v2256_v16  ;;  %v2546_v12 = vld [vmem:[#allocation12 + $0x8] sm:$0xff]  ;;  %v2545_v14 = vld [vmem:[#allocation12] sm:$0xff] }
0x13d1   :  { %v2632_v16 = vld [vmem:[%s4229_s12 + $0x10] sm:$0xff] }
0x13d2   :  { %v2258_v2 = vmul.f32 1.442695, %v2257_v35  ;;  %v2631_v35 = vld [vmem:[%s4229_s12 + $0x8] sm:$0xff] }
0x13db   :  { %v3370_v15 = vpop.eup %3369 }
0x13dc   :  { %v2163_v30 = vadd.f32 1.0, %v3370_v15  ;;  %v2633_v15 = vld [vmem:[%s4229_s12 + $0x18] sm:$0xff] }
0x13de   :  { %3371 = vrcp.f32 %v2163_v30  ;;  %v2826_v30 = vld [vmem:[%s4226_s9] ss:$0 sm:$0xff] }
0x13df   :  { %3373 = vpow2.f32 %v2258_v2  ;;  %v2630_v2 = vld [vmem:[%s4229_s12] sm:$0xff] }
0x13e3   :  { %v2168_v18 = vpop.permute.xlu0 %2167 }
0x13eb   :  { %v3372_v17 = vpop.eup %3371 }
0x13ec   :  { %v2170_v19 = vmul.f32 %v3372_v17, %v2168_v18  ;;  %v3374_v4 = vpop.eup %3373  ;;  %v2177_v27 = vsub.f32 1.0, %v3372_v17  ;;  %v2183_v28 = vmul.f32 %v3372_v17, %v4105_v49 }
0x13ed   :  { %v2260_v7 = vadd.f32 1.0, %v3374_v4  ;;  %v2721_v4 = vld [vmem:[%s4218_s1] sm:$0x3]  ;;  %s3573_s1 = smov 124  }
0x13ee   :  { %2172 = vrot.lane.b32.xlu0 %v2170_v19, %s3571_s4 }
0x13ef   :  { %3375 = vrcp.f32 %v2260_v7  ;;  %v2828_v7 = vld [vmem:[%s4228_s11] ss:$0 sm:$0xff]  ;;  %s3574_s11 = smov [#allocation14]  }
0x13f0   :  { %s2783_s12 = sshll.u32 %s3574_s11, 4  ;;  %s2784_s12 = int_to_ptr.vmem [resolvable:$true] %s2783_s12 }
0x13f1   :  { %p3535_p3 = scmp.lt.s32.totalorder %s2784_s12, %s2784_s12 }
0x13fc   :  { %v3376_v13 = vpop.eup %3375 }
0x13fd   :  { %v2274_v40 = vsub.f32 1.0, %v3376_v13  ;;  %v2280_v42 = vmul.f32 %v3376_v13, %v4110_v54 }
0x1442   :  { %v2265_v9 = vpop.permute.xlu1 %2264 }
0x1443   :  { %v2267_v21 = vmul.f32 %v3376_v13, %v2265_v9 }
0x1445   :  { %2269 = vrot.lane.b32.xlu1 %v2267_v21, %s3571_s4 }
0x1460   :  { %v2173_v38 = vpop.permute.xlu0 %2172 }
0x1461   :  { %v2175_v22 = vadd.f32 %v2173_v38, %v2081_v31 }
0x1463   :  { %3377 = vtanh.f32 %v2175_v22 }
0x1470   :  { %v3378_v23 = vpop.eup %3377 }
0x1471   :  { %2179 = vrot.lane.b32.xlu0 %v3378_v23, %s3570_s22 }
0x14b7   :  { %v2270_v20 = vpop.permute.xlu1 %2269 }
0x14b8   :  { %v2272_v25 = vadd.f32 %v2270_v20, %v2185_v33 }
0x14ba   :  { %3379 = vtanh.f32 %v2272_v25 }
0x14c7   :  { %v3380_v26 = vpop.eup %3379 }
0x14c8   :  { %2276 = vrot.lane.b32.xlu1 %v3380_v26, %s3570_s22 }
0x14e3   :  { %v2180_v24 = vpop.permute.xlu0 %2179 }
0x14e4   :  { %v2182_v37 = vmul.f32 %v2180_v24, %v2177_v27 }
0x14e6   :  { %v2184_v39 = vadd.f32 %v2183_v28, %v2182_v37 }
0x14e8   :  { %2358 = vrot.lane.b32.xlu0 %v2184_v39, %s3570_s22 }
0x153a   :  { %v2277_v41 = vpop.permute.xlu1 %2276 }
0x153b   :  { %v2279_v43 = vmul.f32 %v2277_v41, %v2274_v40 }
0x153d   :  { %v2281_v45 = vadd.f32 %v2280_v42, %v2279_v43 }
0x153f   :  { %2283 = vrot.lane.b32.xlu1 %v2281_v45, %s3570_s22 }
0x155a   :  { %v2359_v46 = vpop.permute.xlu0 %2358 }
0x155b   :  { %3241 = vmatmul.mubr.msk.f32.vlgmr.msra.gmra.mxu0 %vm249_vm6, %v2359_v46 }
0x155c   :  { %3262 = vmatprep.mubr.msk.f32.mxu0 %vm3569_vm0, %v3568_v0  ;;  %3255 = vmatpush3.msra.mxu0 %v2548_v8 }
0x155d   :  { %3256 = vmatprep.subr.mxu0 %v3568_v0 }
0x155e   :  { %3257 = vmatpush3.msra.mxu0 %v2547_v29 }
0x155f   :  { %3258 = vmatprep.subr.mxu0 %v3568_v0 }
0x1560   :  { %3259 = vmatpush3.msra.mxu0 %v2546_v12 }
0x1561   :  { %3260 = vmatprep.subr.mxu0 %v3568_v0 }
0x1562   :  { %3261 = vmatpush3.msra.mxu0 %v2545_v14 }
0x15b1   :  { %v2284_v47 = vpop.permute.xlu1 %2283 }
0x15b2   :  { %3230 = vmatmul.mubr.msk.f32.vlgmr.msra.gmra.mxu1 %vm249_vm6, %v2284_v47 }
0x15b3   :  { %3251 = vmatprep.mubr.msk.f32.mxu1 %vm3569_vm0, %v3568_v0  ;;  %3244 = vmatpush3.msra.mxu1 %v2461_v63 }
0x15b4   :  { %3245 = vmatprep.subr.mxu1 %v3568_v0 }
0x15b5   :  { %3246 = vmatpush3.msra.mxu1 %v2460_v1 }
0x15b6   :  { %3247 = vmatprep.subr.mxu1 %v3568_v0 }
0x15b7   :  { %3248 = vmatpush3.msra.mxu1 %v2459_v3 }
0x15b8   :  { %3249 = vmatprep.subr.mxu1 %v3568_v0 }
0x15b9   :  { %3250 = vmatpush3.msra.mxu1 %v2458_v5 }
0x15ba   :  { %3265 = vmatprep.subr.mxu1 %v3568_v0 }
0x161b   :  { %v2428_v48 = vpop.f32.mrf.mxu0 }
0x161c   :  { %v2438_v49 = vadd.f32 %v2428_v48, %v3792_v44 }
0x161d   :  { %v3242_v50 = vpop.f32.mrf.mxu0 }
0x161e   :  { %2440 = vrot.lane.b32.xlu0 %v2438_v49, %s3571_s4 }
0x1672   :  { %v2353_v51 = vpop.f32.mrf.mxu1 }
0x1673   :  { %v2354_v52 = vadd.f32 %v4144_v10, %v2353_v51 }
0x1674   :  { %v3231_v53 = vpop.f32.mrf.mxu1 }
0x1675   :  { %v2432_v54 = vadd.f32 %v2428_v48, %v2354_v52 }
0x1677   :  { %v2433_v55 = vsub.f32 0.0, %v2432_v54 }
0x1679   :  { %v2434_v56 = vmul.f32 1.442695, %v2433_v55 }
0x167b   :  { %3381 = vpow2.f32 %v2434_v56 }
0x1688   :  { %v3382_v57 = vpop.eup %3381 }
0x1689   :  { %v2436_v58 = vadd.f32 1.0, %v3382_v57 }
0x168b   :  { %3383 = vrcp.f32 %v2436_v58 }
0x1690   :  { %v2441_v60 = vpop.permute.xlu0 %2440 }
0x1698   :  { %v3384_v59 = vpop.eup %3383 }
0x1699   :  { %v2443_v61 = vmul.f32 %v3384_v59, %v2441_v60  ;;  %v2450_v10 = vsub.f32 1.0, %v3384_v59  ;;  %v2456_v32 = vmul.f32 %v3384_v59, %v2184_v39 }
0x169b   :  { %2445 = vrot.lane.b32.xlu1 %v2443_v61, %s3571_s4  ;;  %s3572_s4 = smov 4  }
0x170d   :  { %v2446_v44 = vpop.permute.xlu1 %2445 }
0x170e   :  { %v2448_v62 = vadd.f32 %v2446_v44, %v2354_v52 }
0x1710   :  { %3385 = vtanh.f32 %v2448_v62 }
0x171d   :  { %v3386_v6 = vpop.eup %3385 }
0x171e   :  { %2452 = vrot.lane.b32.xlu0 %v3386_v6, %s3570_s22 }
0x1722   :  { %2723 = vrot.lane.b32.xlu0 %v2721_v4, %s3572_s4 }
0x1790   :  { %v2453_v31 = vpop.permute.xlu0 %2452 }
0x1791   :  { %v2455_v34 = vmul.f32 %v2453_v31, %v2450_v10 }
0x1793   :  { %v2457_v36 = vadd.f32 %v2456_v32, %v2455_v34 }
0x1794   :  { %v2724_v37 = vpop.permute.xlu0 %2723 }
0x1795   :  { %2470 = vrot.lane.b32.xlu1 %v2457_v36, %s3570_s22 }
0x1807   :  { %v2471_v11 = vpop.permute.xlu1 %2470 }
0x1808   :  { %3252 = vmatmul.mubr.msk.f32.vlgmr.msra.gmra.mxu1 %vm249_vm6, %v2471_v11 }
0x1809   :  { %3273 = vmatprep.mubr.msk.f32.mxu1 %vm3569_vm0, %v3568_v0  ;;  %3266 = vmatpush3.msra.mxu1 %v2633_v15 }
0x180a   :  { %3267 = vmatprep.subr.mxu1 %v3568_v0 }
0x180b   :  { %3268 = vmatpush3.msra.mxu1 %v2632_v16 }
0x180c   :  { %3269 = vmatprep.subr.mxu1 %v3568_v0 }
0x180d   :  { %3270 = vmatpush3.msra.mxu1 %v2631_v35 }
0x180e   :  { %3271 = vmatprep.subr.mxu1 %v3568_v0  ;;  %v2830_v0 = vld [vmem:[%s4230_s13] ss:$0 sm:$0xff]  ;;  %s3530_s13 = scalar_lea.vmem %s2784_s12, 32 }
0x180f   :  { %3272 = vmatpush3.msra.mxu1 %v2630_v2  ;;  %p3531_p2 = scmp.ne.s32.totalorder %s2784_s12, %s3530_s13  ;;  %p3536_p4 = scmp.lt.s32.totalorder %s3530_s13, %s3530_s13 }
0x1811   :  { %p3537_p5 = por %p3536_p4, %p3535_p3 }
0x1813   :  { %p3538_p6 = pnand %p3537_p5, %p3531_p2 }
0x18c8   :  { %v2540_v17 = vpop.f32.mrf.mxu1 }
0x18c9   :  { %v2541_v18 = vadd.f32 %v2826_v30, %v2540_v17 }
0x18ca   :  { %v3253_v19 = vpop.f32.mrf.mxu1 }
0x18cb   :  { %v2544_v33 = vmax.f32 %v2541_v18, 0.0 }
0x18cd   :  { %3263 = vmatmul.mubr.msk.f32.vlgmr.msra.gmra.mxu0 %vm249_vm6, %v2544_v33 }
0x198d   :  { %v2625_v13 = vpop.f32.mrf.mxu0 }
0x198e   :  { %v2626_v9 = vadd.f32 %v2828_v7, %v2625_v13 }
0x198f   :  { %v3264_v21 = vpop.f32.mrf.mxu0 }
0x1990   :  { %v2629_v38 = vmax.f32 %v2626_v9, 0.0 }
0x1992   :  { %3274 = vmatmul.mubr.msk.f32.vlgmr.msra.gmra.mxu1 %vm249_vm6, %v2629_v38 }
0x1a52   :  { %v2710_v22 = vpop.f32.mrf.mxu1 }
0x1a53   :  { %v2711_v23 = vadd.f32 %v2830_v0, %v2710_v22 }
0x1a54   :  { %v3275_v20 = vpop.f32.mrf.mxu1 }
0x1a55   :  { %v2714_v25 = vmax.f32 %v2711_v23, -20.0 }
0x1a57   :  { %v2715_v26 = vmin.f32 %v2714_v25, 2.0 }
0x1a59   :  { %v2716_v27 = vmul.f32 1.442695, %v2715_v26  ;;  %v2718_v24 = vsub.f32 0.0, %v2715_v26 }
0x1a5b   :  { %3387 = vpow2.f32 %v2716_v27  ;;  %v2719_v28 = vmul.f32 1.442695, %v2718_v24 }
0x1a5d   :  { %3389 = vpow2.f32 %v2719_v28 }
0x1a68   :  { %v3388_v39 = vpop.eup %3387 }
0x1a69   :  { %v2726_v40 = vmul.f32 %v3388_v39, %v2724_v37 }
0x1a6a   :  { %v3390_v41 = vpop.eup %3389 }
0x1a6b   :  { %2734 = vrot.lane.b32.xlu0 %v3390_v41, %s3573_s1  ;;  %2728 = vrot.lane.b32.xlu1 %v2726_v40, %s3573_s1 }
0x1a6f   :  { %2741 = vrot.lane.b32.xlu1 %v2715_v26, %s3573_s1 }
0x1add   :  { %v2729_v42 = vpop.permute.xlu1 %2728  ;;  %v2735_v47 = vpop.permute.xlu0 %2734 }
0x1ade   :  { %v2731_v43 = vadd.f32 %v2729_v42, %v2711_v23 }
0x1ae0   :  { %v2751_v45 = vmul.f32 -2.0, %v2731_v43  ;;  %3391 = vtanh.f32 %v2731_v43  ;;  %v2732_v46 = vsub.f32 %v2731_v43, %v2711_v23  ;;  %v2750_v8 = vsub.f32 0.6931472, %v2731_v43 }
0x1ae1   :  { %v2742_v54 = vpop.permute.xlu1 %2741 }
0x1ae2   :  { %v2753_v48 = vand.u32 2147483647, %v2751_v45  ;;  %v2737_v49 = vmul.f32 %v2735_v47, %v2732_v46  ;;  %v2752_v5 = vmax.f32 %v2751_v45, 0.0 }
0x1ae4   :  { %v2754_v50 = vsub.f32 0.0, %v2753_v48  ;;  %v2738_v51 = vmul.f32 %v2737_v49, %v2737_v49 }
0x1ae6   :  { %v2755_v52 = vmul.f32 1.442695, %v2754_v50  ;;  %v2739_v53 = vmul.f32 -0.5, %v2738_v51 }
0x1ae8   :  { %3393 = vpow2.f32 %v2755_v52  ;;  %v2744_v55 = vsub.f32 %v2739_v53, %v2742_v54 }
0x1aea   :  { %v2832_v56 = vadd.f32 -0.9189385, %v2744_v55 }
0x1aec   :  { %v2747_v57 = vsel %vm2746_vm7, %v2832_v56, 0.0 }
0x1aed   :  { %v3392_v58 = vpop.eup %3391  ;;  %2748 = vadd.xlane.f32.xlu0 %v2747_v57 }
0x1aee   :  { %2774 = vst.msk [vmem:[#allocation14] sm:$0x3] %vm2746_vm7, %v3392_v58 }
0x1af5   :  { %v3394_v59 = vpop.eup %3393 }
0x1af6   :  { %v2757_v60 = vadd.f32 1.0, %v3394_v59  ;;  %v2760_v61 = vmul.f32 -0.5, %v3394_v59  ;;  %v2763_v62 = vand.u32 2147483647, %v3394_v59 }
0x1af8   :  { %3395 = vlog2.f32 %v2757_v60  ;;  %v2761_v44 = vadd.f32 1.0, %v2760_v61  ;;  %vm2764_vm8 = vcmp.lt.f32.partialorder %v2763_v62, 0.0004427343 }
0x1afa   :  { %v2762_v3 = vmul.f32 %v3394_v59, %v2761_v44 }
0x1b05   :  { %v3396_v63 = vpop.eup %3395 }
0x1b06   :  { %v2759_v1 = vmul.f32 0.6931472, %v3396_v63 }
0x1b08   :  { %v2765_v6 = vsel %vm2764_vm8, %v2762_v3, %v2759_v1 }
0x1b09   :  { %v2766_v10 = vadd.f32 %v2765_v6, %v2752_v5 }
0x1b0b   :  { %v2767_v31 = vsub.f32 %v2750_v8, %v2766_v10 }
0x1b0d   :  { %v2768_v32 = vmul.f32 2.0, %v2767_v31 }
0x1b0f   :  { %v2769_v34 = vsel %vm2746_vm7, %v2768_v32, 0.0 }
0x1b10   :  { %2770 = vadd.xlane.f32.xlu1 %v2769_v34 }
0x1b11   :  { %3541 = shalt.err (!%p3538_p6)
}
0x1b12   :  { %2786 = dma.vmem_to_hbm [thread:$0]  %s2784_s12, 32, %s4231_s14, [#allocation5]   ;;  %vm2775_vm9 = vcmask 1024  }
0x1b76   :  { %v2749_v36 = vpop.xlane.xlu0 %2748 }
0x1b99   :  { %v2771_v11 = vpop.xlane.xlu1 %2770 }
0x1b9a   :  { %v2772_v29 = vsub.f32 %v2749_v36, %v2771_v11 }
0x1b9c   :  { %2776 = vst.msk [vmem:[%s4232_s15] sm:$0x3] %vm2775_vm9, %v2772_v29 }
0x1b9d   :  { %3558 = dma.done.wait [#allocation5], 32  }
0x1b9e   :  { %3559 = vsyncadd [#allocation5], 4294967264 }
0x1b9f   :  { %2794 = vsyncpa [#allocation4], 1 }
0x1ba0   :  { %2795 = vsyncpa [#allocation7], 1 }
0x1ba1   :  { %2796 = vsyncpa [#allocation10], 1 }
0x1ba2   :  { %2797 = vsyncpa [#allocation13], 1 }
0x1ba3   :  { %2798 = vsyncpa [#allocation5], 1 }

</bundles_post_ra>
